<compile_context>
chip_gen: v6e
topology: v6e:2x2x1
jax: 0.10.0
libtpu: 0.0.40
codegen_flags: <defaults>
</compile_context>

<pallas_src>
from functools import partial

import numpy as np
import jax
import jax.numpy as jnp
from jax.experimental import pallas as pl
from jax.experimental.pallas import tpu as pltpu


_SUBLANE = 8


def _round_up(x, m):
    return ((x + m - 1) // m) * m


def _tile_and_vmem():
    """Generation-aware (row-tile cap, scoped-VMEM budget)."""
    kind = jax.devices()[0].device_kind.lower()
    if "v5" in kind:
        # v5e: MXU-bound for this MLP at large M; bigger tiles only add VMEM
        # pressure.  Default scoped VMEM is 16 MiB -> raise explicitly to 32 MiB.
        return 512, 32 * 1024 * 1024
    if "v6" in kind:
        # v6e: near the roofline ridge; bigger tiles amortize the ~0.35 us per-grid-
        # step cost and improve DMA efficiency.  128 MiB physical VMEM.
        return 1024, 64 * 1024 * 1024
    # v7x (64 MiB VMEM per TC) and unknown/newer chips: 1024-row tiles fit with
    # single-buffered weights; do not go to 2048 here.
    return 1024, 48 * 1024 * 1024


_CONST_MAP = lambda i: (0, 0)     # grid-invariant operands (weights / biases)


def _resident_spec(shape):
    """BlockSpec for a grid-invariant operand, single-buffered when supported."""
    try:
        return pl.BlockSpec(shape, _CONST_MAP, pipeline_mode=pl.Buffered(1))
    except TypeError:  # older jax without pipeline_mode kwarg
        return pl.BlockSpec(shape, _CONST_MAP)


# ----------------------------- Pallas kernel --------------------------------

def _fused_mlp_kernel(*refs, n_layers):
    """Fused [split-concat Linear -> ReLU] + (n_layers-1) x [Linear -> ReLU].

    refs = (x3d, x2d, w0a, w0b, b0, [w_i, b_i]*, out)
    Weights arrive pre-cast to bf16; activations are cast to bf16 right before
    each MXU dot; accumulation, bias add and ReLU are f32.
    """
    x3d_ref, x2d_ref = refs[0], refs[1]
    w0a_ref, w0b_ref, b0_ref = refs[2], refs[3], refs[4]
    layer_refs = refs[5:-1]
    o_ref = refs[-1]

    # Layer 0: split-K matmul -- cat([fea3d, fea2d], -1) never exists in HBM.
    y = jnp.dot(x3d_ref[...].astype(jnp.bfloat16), w0a_ref[...],
                preferred_element_type=jnp.float32)
    y = y + jnp.dot(x2d_ref[...].astype(jnp.bfloat16), w0b_ref[...],
                    preferred_element_type=jnp.float32)
    y = jnp.maximum(y + b0_ref[...], 0.0)

    # Remaining layers: intermediate activations stay on-chip, no HBM round-trip.
    for li in range(n_layers - 1):
        w_ref = layer_refs[2 * li]
        b_ref = layer_refs[2 * li + 1]
        y = jnp.dot(y.astype(jnp.bfloat16), w_ref[...],
                    preferred_element_type=jnp.float32)
        y = jnp.maximum(y + b_ref[...], 0.0)

    o_ref[...] = y


@jax.jit
def _global_fusing_2d(x3, x2, w0a, w0b, b0, tail):
    """x3:(M,D3), x2:(M,D2) f32 -> (M, Dout) f32.  Weights already bf16."""
    M, D3 = x3.shape
    D2 = x2.shape[1]
    dout0 = w0a.shape[1]
    n_layers = 1 + len(tail)
    dout = tail[-1][0].shape[1] if tail else dout0

    tm_max, vmem_limit = _tile_and_vmem()

    # Balanced row tiles: pad by at most (_SUBLANE - 1) rows instead of up to a
    # full tile for awkward M.
    n_tiles = pl.cdiv(M, tm_max)
    tm = _round_up(pl.cdiv(M, n_tiles), _SUBLANE)
    m_pad = _round_up(M, tm)
    if m_pad != M:
        # Padded rows are zero -> they compute ReLU(bias); finite, sliced off below.
        x3 = jnp.pad(x3, ((0, m_pad - M), (0, 0)))
        x2 = jnp.pad(x2, ((0, m_pad - M), (0, 0)))

    args = [x3, x2, w0a, w0b, b0]
    in_specs = [
        pl.BlockSpec((tm, D3), lambda i: (i, 0)),
        pl.BlockSpec((tm, D2), lambda i: (i, 0)),
        _resident_spec((D3, dout0)),
        _resident_spec((D2, dout0)),
        _resident_spec((1, dout0)),
    ]
    for (w, b) in tail:
        args += [w, b]
        in_specs += [_resident_spec(w.shape),
                     _resident_spec((1, w.shape[1]))]

    out = pl.pallas_call(
        partial(_fused_mlp_kernel, n_layers=n_layers),
        out_shape=jax.ShapeDtypeStruct((m_pad, dout), jnp.float32),
        grid=(m_pad // tm,),
        in_specs=in_specs,
        out_specs=pl.BlockSpec((tm, dout), lambda i: (i, 0)),
        compiler_params=pltpu.CompilerParams(
            dimension_semantics=("parallel",),
            vmem_limit_bytes=vmem_limit,
        ),
    )(*args)
    # Only slice when padding was actually applied (avoids a copy for aligned M).
    return out if m_pad == M else out[:M]


# ----------------------- global_fusingModule forward ------------------------

def prepare_global_fusing_params(nn_layers, d3):
    """One-time param prep (call once, outside the hot path):
       - split the first Linear's weight by input rows so the concat never hits HBM,
       - pre-cast weights to bf16 (half the weight DMA, no per-call cast pass),
       - reshape biases to (1, dout) f32."""
    w0, b0 = nn_layers[0]
    assert w0.shape[0] > d3
    w0a = jnp.asarray(w0[:d3], jnp.bfloat16)
    w0b = jnp.asarray(w0[d3:], jnp.bfloat16)
    b0p = jnp.asarray(b0, jnp.float32).reshape(1, -1)
    tail = tuple(
        (jnp.asarray(w, jnp.bfloat16), jnp.asarray(b, jnp.float32).reshape(1, -1))
        for (w, b) in nn_layers[1:]
    )
    return (w0a, w0b, b0p, tail)


def global_fusing_forward(prepared, fea3d, fea2d):
    """out = nn(cat([fea3d, fea2d], -1));  prepared = prepare_global_fusing_params()."""
    w0a, w0b, b0, tail = prepared
    lead = fea3d.shape[:-1]
    assert fea2d.shape[:-1] == lead, (fea3d.shape, fea2d.shape)
    d3 = fea3d.shape[-1]
    assert w0a.shape[0] == d3 and w0b.shape[0] == fea2d.shape[-1]
    out2d = _global_fusing_2d(
        fea3d.reshape(-1, d3),
        fea2d.reshape(-1, fea2d.shape[-1]),
        w0a, w0b, b0, tail,
    )
    return out2d.reshape(*lead, out2d.shape[-1])


# ------------------------ Deterministic parameter init ----------------------

def init_linear(key, din, dout):
    kw, kb = jax.random.split(key)
    bound = 1.0 / np.sqrt(din)
    w = jax.random.uniform(kw, (din, dout), jnp.float32, -bound, bound)
    b = jax.random.uniform(kb, (dout,), jnp.float32, -bound, bound)
    return (w, b)


def init_mlp(key, channels):
    keys = jax.random.split(key, len(channels) - 1)
    return [init_linear(keys[i], channels[i], channels[i + 1])
            for i in range(len(channels) - 1)]


# ---------------------------------- Main -------------------------------------

if __name__ == "__main__":
    key = jax.random.PRNGKey(0)
    k3, k2, kp = jax.random.split(key, 3)

    B = 2
    C = 512                              # fea3d / fea2d channel width in BSANet
    fea3d = jax.random.normal(k3, (B, C), jnp.float32)
    fea2d = jax.random.normal(k2, (B, C), jnp.float32)

    # nn = MLP([1024, 1024, 512, 512]) -- the global fusing MLP used in BSANet.
    channels = [2 * C, 1024, 512, 512]
    layers = init_mlp(kp, channels)

    prepared = prepare_global_fusing_params(layers, d3=C)   # one-time prep
    out = global_fusing_forward(prepared, fea3d, fea2d)
    out = jax.block_until_ready(out)

    assert out.shape == (B, channels[-1]), out.shape
    assert bool(jnp.all(jnp.isfinite(out)))

    # Reference: plain-JAX f32 concat + [Linear->ReLU] stack (bf16-MXU tolerance).
    ref = jnp.concatenate([fea3d, fea2d], -1)
    for (w, b) in layers:
        ref = jnp.maximum(ref @ w + b, 0.0)
    rel_err = float(jnp.max(jnp.abs(out - ref)) / (jnp.max(jnp.abs(ref)) + 1e-6))
    assert rel_err < 2e-2, rel_err

    print("KERNEL_OK")
</pallas_src>

<mosaic_0001>
module attributes {stable_mosaic.version = 11 : i64} {
  func.func @_fused_mlp_kernel(%arg0: i32, %arg1: memref<8x512xf32, #tpu.memory_space<vmem>>, %arg2: memref<8x512xf32, #tpu.memory_space<vmem>>, %arg3: memref<512x1024xbf16, #tpu.memory_space<vmem>>, %arg4: memref<512x1024xbf16, #tpu.memory_space<vmem>>, %arg5: memref<1x1024xf32, #tpu.memory_space<vmem>>, %arg6: memref<1024x512xbf16, #tpu.memory_space<vmem>>, %arg7: memref<1x512xf32, #tpu.memory_space<vmem>>, %arg8: memref<512x512xbf16, #tpu.memory_space<vmem>>, %arg9: memref<1x512xf32, #tpu.memory_space<vmem>>, %arg10: memref<8x512xf32, #tpu.memory_space<vmem>>) attributes {dimension_semantics = [#tpu.dimension_semantics<parallel>], iteration_bounds = array<i64: 1>, scalar_prefetch = 0 : i64, scratch_operands = 0 : i64, tpu.core_type = #tpu.core_type<tc>, window_params = [{transform_indices = @transform_0, window_bounds = array<i64: 8, 512>}, {transform_indices = @transform_1, window_bounds = array<i64: 8, 512>}, {pipeline_mode = #tpu.pipeline_mode<synchronous>, transform_indices = @transform_2, window_bounds = array<i64: 512, 1024>}, {pipeline_mode = #tpu.pipeline_mode<synchronous>, transform_indices = @transform_3, window_bounds = array<i64: 512, 1024>}, {pipeline_mode = #tpu.pipeline_mode<synchronous>, transform_indices = @transform_4, window_bounds = array<i64: 1, 1024>}, {pipeline_mode = #tpu.pipeline_mode<synchronous>, transform_indices = @transform_5, window_bounds = array<i64: 1024, 512>}, {pipeline_mode = #tpu.pipeline_mode<synchronous>, transform_indices = @transform_6, window_bounds = array<i64: 1, 512>}, {pipeline_mode = #tpu.pipeline_mode<synchronous>, transform_indices = @transform_7, window_bounds = array<i64: 512, 512>}, {pipeline_mode = #tpu.pipeline_mode<synchronous>, transform_indices = @transform_8, window_bounds = array<i64: 1, 512>}, {transform_indices = @transform_9, window_bounds = array<i64: 8, 512>}]} {
    %c0 = arith.constant 0 : index
    %c0_0 = arith.constant 0 : index
    %0 = vector.load %arg1[%c0, %c0_0] : memref<8x512xf32, #tpu.memory_space<vmem>>, vector<8x512xf32>
    %1 = arith.truncf %0 : vector<8x512xf32> to vector<8x512xbf16>
    %c0_1 = arith.constant 0 : index
    %c0_2 = arith.constant 0 : index
    %2 = vector.load %arg3[%c0_1, %c0_2] : memref<512x1024xbf16, #tpu.memory_space<vmem>>, vector<512x1024xbf16>
    %cst = arith.constant dense<0.000000e+00> : vector<8x1024xf32>
    %3 = tpu.matmul %1, %2, %cst {dimension_numbers = #tpu.dot_dimension_numbers<[1], [0], [0], [1], [0, 0, 1, 1], [], []>} : vector<8x512xbf16>, vector<512x1024xbf16>, vector<8x1024xf32> -> vector<8x1024xf32>
    %c0_3 = arith.constant 0 : index
    %c0_4 = arith.constant 0 : index
    %4 = vector.load %arg2[%c0_3, %c0_4] : memref<8x512xf32, #tpu.memory_space<vmem>>, vector<8x512xf32>
    %5 = arith.truncf %4 : vector<8x512xf32> to vector<8x512xbf16>
    %c0_5 = arith.constant 0 : index
    %c0_6 = arith.constant 0 : index
    %6 = vector.load %arg4[%c0_5, %c0_6] : memref<512x1024xbf16, #tpu.memory_space<vmem>>, vector<512x1024xbf16>
    %cst_7 = arith.constant dense<0.000000e+00> : vector<8x1024xf32>
    %7 = tpu.matmul %5, %6, %cst_7 {dimension_numbers = #tpu.dot_dimension_numbers<[1], [0], [0], [1], [0, 0, 1, 1], [], []>} : vector<8x512xbf16>, vector<512x1024xbf16>, vector<8x1024xf32> -> vector<8x1024xf32>
    %8 = arith.addf %3, %7 : vector<8x1024xf32>
    %c0_8 = arith.constant 0 : index
    %c0_9 = arith.constant 0 : index
    %9 = vector.load %arg5[%c0_8, %c0_9] : memref<1x1024xf32, #tpu.memory_space<vmem>>, vector<1x1024xf32>
    %10 = vector.broadcast %9 : vector<1x1024xf32> to vector<8x1024xf32>
    %11 = arith.addf %8, %10 : vector<8x1024xf32>
    %cst_10 = arith.constant 0.000000e+00 : f32
    %12 = vector.broadcast %cst_10 : f32 to vector<8x1024xf32>
    %13 = arith.maximumf %11, %12 : vector<8x1024xf32>
    %14 = arith.truncf %13 : vector<8x1024xf32> to vector<8x1024xbf16>
    %c0_11 = arith.constant 0 : index
    %c0_12 = arith.constant 0 : index
    %15 = vector.load %arg6[%c0_11, %c0_12] : memref<1024x512xbf16, #tpu.memory_space<vmem>>, vector<1024x512xbf16>
    %cst_13 = arith.constant dense<0.000000e+00> : vector<8x512xf32>
    %16 = tpu.matmul %14, %15, %cst_13 {dimension_numbers = #tpu.dot_dimension_numbers<[1], [0], [0], [1], [0, 0, 1, 1], [], []>} : vector<8x1024xbf16>, vector<1024x512xbf16>, vector<8x512xf32> -> vector<8x512xf32>
    %c0_14 = arith.constant 0 : index
    %c0_15 = arith.constant 0 : index
    %17 = vector.load %arg7[%c0_14, %c0_15] : memref<1x512xf32, #tpu.memory_space<vmem>>, vector<1x512xf32>
    %18 = vector.broadcast %17 : vector<1x512xf32> to vector<8x512xf32>
    %19 = arith.addf %16, %18 : vector<8x512xf32>
    %cst_16 = arith.constant 0.000000e+00 : f32
    %20 = vector.broadcast %cst_16 : f32 to vector<8x512xf32>
    %21 = arith.maximumf %19, %20 : vector<8x512xf32>
    %22 = arith.truncf %21 : vector<8x512xf32> to vector<8x512xbf16>
    %c0_17 = arith.constant 0 : index
    %c0_18 = arith.constant 0 : index
    %23 = vector.load %arg8[%c0_17, %c0_18] : memref<512x512xbf16, #tpu.memory_space<vmem>>, vector<512x512xbf16>
    %cst_19 = arith.constant dense<0.000000e+00> : vector<8x512xf32>
    %24 = tpu.matmul %22, %23, %cst_19 {dimension_numbers = #tpu.dot_dimension_numbers<[1], [0], [0], [1], [0, 0, 1, 1], [], []>} : vector<8x512xbf16>, vector<512x512xbf16>, vector<8x512xf32> -> vector<8x512xf32>
    %c0_20 = arith.constant 0 : index
    %c0_21 = arith.constant 0 : index
    %25 = vector.load %arg9[%c0_20, %c0_21] : memref<1x512xf32, #tpu.memory_space<vmem>>, vector<1x512xf32>
    %26 = vector.broadcast %25 : vector<1x512xf32> to vector<8x512xf32>
    %27 = arith.addf %24, %26 : vector<8x512xf32>
    %cst_22 = arith.constant 0.000000e+00 : f32
    %28 = vector.broadcast %cst_22 : f32 to vector<8x512xf32>
    %29 = arith.maximumf %27, %28 : vector<8x512xf32>
    %c0_23 = arith.constant 0 : index
    %c0_24 = arith.constant 0 : index
    %30 = vector.load %arg10[%c0_23, %c0_24] : memref<8x512xf32, #tpu.memory_space<vmem>>, vector<8x512xf32>
    tpu.vector_store %arg10[%c0_23, %c0_24], %29 {strides = array<i32>} : memref<8x512xf32, #tpu.memory_space<vmem>>, vector<8x512xf32>,
    return
  }
  func.func @transform_0(%arg0: i32) -> (i32, i32) {
    %c0_i32 = arith.constant 0 : i32
    %c0_i32_0 = arith.constant 0 : i32
    return %arg0, %c0_i32 : i32, i32
  }
  func.func @transform_1(%arg0: i32) -> (i32, i32) {
    %c0_i32 = arith.constant 0 : i32
    %c0_i32_0 = arith.constant 0 : i32
    return %arg0, %c0_i32 : i32, i32
  }
  func.func @transform_2(%arg0: i32) -> (i32, i32) {
    %c0_i32 = arith.constant 0 : i32
    %c0_i32_0 = arith.constant 0 : i32
    %c0_i32_1 = arith.constant 0 : i32
    return %c0_i32, %c0_i32_0 : i32, i32
  }
  func.func @transform_3(%arg0: i32) -> (i32, i32) {
    %c0_i32 = arith.constant 0 : i32
    %c0_i32_0 = arith.constant 0 : i32
    %c0_i32_1 = arith.constant 0 : i32
    return %c0_i32, %c0_i32_0 : i32, i32
  }
  func.func @transform_4(%arg0: i32) -> (i32, i32) {
    %c0_i32 = arith.constant 0 : i32
    %c0_i32_0 = arith.constant 0 : i32
    %c0_i32_1 = arith.constant 0 : i32
    return %c0_i32, %c0_i32_0 : i32, i32
  }
  func.func @transform_5(%arg0: i32) -> (i32, i32) {
    %c0_i32 = arith.constant 0 : i32
    %c0_i32_0 = arith.constant 0 : i32
    %c0_i32_1 = arith.constant 0 : i32
    return %c0_i32, %c0_i32_0 : i32, i32
  }
  func.func @transform_6(%arg0: i32) -> (i32, i32) {
    %c0_i32 = arith.constant 0 : i32
    %c0_i32_0 = arith.constant 0 : i32
    %c0_i32_1 = arith.constant 0 : i32
    return %c0_i32, %c0_i32_0 : i32, i32
  }
  func.func @transform_7(%arg0: i32) -> (i32, i32) {
    %c0_i32 = arith.constant 0 : i32
    %c0_i32_0 = arith.constant 0 : i32
    %c0_i32_1 = arith.constant 0 : i32
    return %c0_i32, %c0_i32_0 : i32, i32
  }
  func.func @transform_8(%arg0: i32) -> (i32, i32) {
    %c0_i32 = arith.constant 0 : i32
    %c0_i32_0 = arith.constant 0 : i32
    %c0_i32_1 = arith.constant 0 : i32
    return %c0_i32, %c0_i32_0 : i32, i32
  }
  func.func @transform_9(%arg0: i32) -> (i32, i32) {
    %c0_i32 = arith.constant 0 : i32
    %c0_i32_0 = arith.constant 0 : i32
    return %arg0, %c0_i32 : i32, i32
  }
}

</mosaic_0001>

<bundles_post_ra>
// kernel: _global_fusing_2d.1
= control target key start
LH: loop header
LB: loop body
LE: loop exit
PB: predicated region body
PF: predicated region fallthrough
CT: control target
= control target key end

     0   :  { %14 = vsyncpa [#allocation3], 0  ;;  %s8620_s0 = inlined_call_operand.vmem [shape: f32[8,512], index: 0, kind: input, shape index: {}]   ;;  %s8621_s1 = inlined_call_operand.vmem [shape: f32[8,512], index: 1, kind: input, shape index: {}]   ;;  %s8622_s2 = inlined_call_operand.hbm [shape: bf16[512,1024], index: 2, kind: input, shape index: {}]   ;;  %s8623_s3 = inlined_call_operand.hbm [shape: bf16[512,1024], index: 3, kind: input, shape index: {}]   ;;  %s8624_s4 = inlined_call_operand.vmem [shape: f32[1,1024], index: 4, kind: input, shape index: {}]   ;;  %s8625_s5 = inlined_call_operand.hbm [shape: bf16[1024,512], index: 5, kind: input, shape index: {}]   ;;  %s8626_s6 = inlined_call_operand.vmem [shape: f32[1,512], index: 6, kind: input, shape index: {}]   ;;  %s8627_s7 = inlined_call_operand.hbm [shape: bf16[512,512], index: 7, kind: input, shape index: {}]   ;;  %s8628_s8 = inlined_call_operand.vmem [shape: f32[1,512], index: 8, kind: input, shape index: {}]   ;;  %s8629_s9 = inlined_call_operand.vmem [shape: f32[8,512], index: 9, kind: output, shape index: {}]  }
   0x1   :  { %15 = vsyncpa [#allocation5], 0 }
   0x2   :  { %16 = vsyncpa [#allocation8], 0  ;;  %s8326_s30 = smov [#allocation4]   ;;  %s8327_s11 = smov [#allocation2]  }
   0x3   :  { %s38_s10 = sshll.u32 %s8326_s30, 4  ;;  %s26_s12 = sshll.u32 %s8327_s11, 4  ;;  %s39_s10 = int_to_ptr.vmem [resolvable:$true] %s38_s10  ;;  %s27_s12 = int_to_ptr.vmem [resolvable:$true] %s26_s12 }
   0x4   :  { %s8248_s13 = scalar_lea.vmem %s39_s10, 32768  ;;  %p8253_p1 = scmp.lt.s32.totalorder %s39_s10, %s39_s10 }
   0x5   :  { %p8249_p0 = scmp.ne.s32.totalorder %s39_s10, %s8248_s13  ;;  %p8254_p2 = scmp.lt.s32.totalorder %s8248_s13, %s8248_s13 }
   0x7   :  { %p8255_p3 = por %p8254_p2, %p8253_p1 }
   0x9   :  { %p8256_p4 = pnand %p8255_p3, %p8249_p0 }
   0xb   :  { %8259 = shalt.err (!%p8256_p4)
}
   0xc   :  { %s8328_s14 = smov 512   ;;  %s8329_s15 = smov 32  }
   0xd   :  { %44 = dma.hbm_to_vmem [thread:$0]  %s8623_s3, 32768, %s39_s10, [#allocation5], %s8328_s14, %s8328_s14, %s8329_s15  }
   0xe   :  { %s8268_s18 = scalar_lea.vmem %s27_s12, 32768  ;;  %p8273_p6 = scmp.lt.s32.totalorder %s27_s12, %s27_s12 }
   0xf   :  { %p8269_p5 = scmp.ne.s32.totalorder %s27_s12, %s8268_s18  ;;  %p8274_p7 = scmp.lt.s32.totalorder %s8268_s18, %s8268_s18 }
  0x11   :  { %p8275_p8 = por %p8274_p7, %p8273_p6 }
  0x13   :  { %p8276_p9 = pnand %p8275_p8, %p8269_p5 }
  0x15   :  { %8279 = shalt.err (!%p8276_p9)
}
  0x16   :  { %32 = dma.hbm_to_vmem [thread:$0]  %s8622_s2, 32768, %s27_s12, [#allocation3], %s8328_s14, %s8328_s14, %s8329_s15  }
  0x17   :  { %s8330_s21 = smov [#allocation6]  }
  0x18   :  { %s52_s22 = sshll.u32 %s8330_s21, 4  ;;  %s53_s22 = int_to_ptr.vmem [resolvable:$true] %s52_s22 }
  0x19   :  { %s8288_s23 = scalar_lea.vmem %s53_s22, 32768  ;;  %p8293_p11 = scmp.lt.s32.totalorder %s53_s22, %s53_s22 }
  0x1a   :  { %p8289_p10 = scmp.ne.s32.totalorder %s53_s22, %s8288_s23  ;;  %p8294_p12 = scmp.lt.s32.totalorder %s8288_s23, %s8288_s23 }
  0x1c   :  { %p8295_p13 = por %p8294_p12, %p8293_p11 }
  0x1e   :  { %p8296_p0 = pnand %p8295_p13, %p8289_p10 }
  0x20   :  { %8299 = shalt.err (!%p8296_p0)
}
  0x21   :  { %s8331_s3 = smov 256   ;;  %s8332_s24 = smov 16  }
  0x22   :  { %58 = dma.hbm_to_vmem [thread:$0]  %s8625_s5, 32768, %s53_s22, [#allocation5], %s8331_s3, %s8331_s3, %s8332_s24  }
  0x23   :  { %s8333_s27 = smov [#allocation7]  }
  0x24   :  { %s66_s28 = sshll.u32 %s8333_s27, 4  ;;  %s67_s28 = int_to_ptr.vmem [resolvable:$true] %s66_s28 }
  0x25   :  { %s8308_s2 = scalar_lea.vmem %s67_s28, 16384  ;;  %p8313_p2 = scmp.lt.s32.totalorder %s67_s28, %s67_s28 }
  0x26   :  { %p8309_p1 = scmp.ne.s32.totalorder %s67_s28, %s8308_s2  ;;  %p8314_p3 = scmp.lt.s32.totalorder %s8308_s2, %s8308_s2 }
  0x28   :  { %p8315_p4 = por %p8314_p3, %p8313_p2 }
  0x2a   :  { %p8316_p5 = pnand %p8315_p4, %p8309_p1 }
  0x2c   :  { %8319 = shalt.err (!%p8316_p5)
}
  0x2d   :  { %72 = dma.hbm_to_vmem [thread:$0]  %s8627_s7, 16384, %s67_s28, [#allocation8], %s8331_s3, %s8331_s3, %s8332_s24  }
  0x2e   :  { %8320 = dma.done.wait [#allocation3], 32768  }
  0x2f   :  { %8321 = vsyncadd [#allocation3], 4294934528 }
  0x30   :  { %8322 = dma.done.wait [#allocation5], 65536  }
  0x31   :  { %8323 = vsyncadd [#allocation5], 4294901760 }
  0x32   :  { %8324 = dma.done.wait [#allocation8], 16384  }
  0x33   :  { %8325 = vsyncadd [#allocation8], 4294950912  ;;  %v415_v0 = vld [vmem:[#allocation4 + $0x1c0] sm:$0xff]  ;;  %v352_v53 = vld [vmem:[%s8621_s1 + $0x8] sm:$0xff] }
  0x34   :  { %v419_v1 = vld [vmem:[#allocation4 + $0x1e0] sm:$0xff]  ;;  %v354_v54 = vld [vmem:[%s8621_s1 + $0x18] sm:$0xff]  ;;  %v8402_v58 = vpack.c.bf16 %v352_v53, %v352_v53 }
  0x35   :  { %v543_v2 = vld [vmem:[#allocation4 + $0x5c0] sm:$0xff]  ;;  %v6817_v3 = vcombine.high %v415_v0, %v419_v1  ;;  %v6816_v5 = vcombine.low %v415_v0, %v419_v1  ;;  %v8404_v59 = vpack.c.bf16 %v354_v54, %v354_v54 }
  0x36   :  { %v547_v4 = vld [vmem:[#allocation4 + $0x5e0] sm:$0xff]  ;;  %1927 = vmatprep.mubr.bf16.mxu0 %v8402_v58 }
  0x37   :  { %v407_v6 = vld [vmem:[#allocation4 + $0x180] sm:$0xff]  ;;  %v6945_v8 = vcombine.high %v543_v2, %v547_v4  ;;  %v6944_v9 = vcombine.low %v543_v2, %v547_v4  ;;  %1895 = vmatprep.subr.bf16.mxu0 %v6817_v3  ;;  %1968 = vmatprep.mubr.bf16.mxu1 %v8404_v59 }
  0x38   :  { %v411_v7 = vld [vmem:[#allocation4 + $0x1a0] sm:$0xff]  ;;  %1896 = vmatpush1.bf16.msra.mxu0 %v6816_v5 }
  0x39   :  { %v6809_v10 = vcombine.high %v407_v6, %v411_v7  ;;  %v535_v11 = vld [vmem:[#allocation4 + $0x580] sm:$0xff]  ;;  %1936 = vmatprep.subr.bf16.mxu1 %v6945_v8  ;;  %v6808_v18 = vcombine.low %v407_v6, %v411_v7 }
  0x3a   :  { %v539_v12 = vld [vmem:[#allocation4 + $0x5a0] sm:$0xff]  ;;  %1937 = vmatpush1.bf16.msra.mxu1 %v6944_v9 }
  0x3b   :  { %v399_v13 = vld [vmem:[#allocation4 + $0x140] sm:$0xff]  ;;  %v6937_v14 = vcombine.high %v535_v11, %v539_v12  ;;  %1897 = vmatprep.subr.bf16.mxu0 %v6809_v10  ;;  %v6936_v19 = vcombine.low %v535_v11, %v539_v12 }
  0x3c   :  { %v403_v15 = vld [vmem:[#allocation4 + $0x160] sm:$0xff]  ;;  %1898 = vmatpush1.bf16.msra.mxu0 %v6808_v18 }
  0x3d   :  { %v527_v16 = vld [vmem:[#allocation4 + $0x540] sm:$0xff]  ;;  %v6801_v20 = vcombine.high %v399_v13, %v403_v15  ;;  %1938 = vmatprep.subr.bf16.mxu1 %v6937_v14  ;;  %v6800_v26 = vcombine.low %v399_v13, %v403_v15 }
  0x3e   :  { %v531_v17 = vld [vmem:[#allocation4 + $0x560] sm:$0xff]  ;;  %1939 = vmatpush1.bf16.msra.mxu1 %v6936_v19 }
  0x3f   :  { %v6929_v21 = vcombine.high %v527_v16, %v531_v17  ;;  %v391_v22 = vld [vmem:[#allocation4 + $0x100] sm:$0xff]  ;;  %1899 = vmatprep.subr.bf16.mxu0 %v6801_v20  ;;  %v6928_v27 = vcombine.low %v527_v16, %v531_v17 }
  0x40   :  { %v395_v23 = vld [vmem:[#allocation4 + $0x120] sm:$0xff]  ;;  %1900 = vmatpush1.bf16.msra.mxu0 %v6800_v26 }
  0x41   :  { %v519_v24 = vld [vmem:[#allocation4 + $0x500] sm:$0xff]  ;;  %v6793_v28 = vcombine.high %v391_v22, %v395_v23  ;;  %1940 = vmatprep.subr.bf16.mxu1 %v6929_v21  ;;  %v6792_v34 = vcombine.low %v391_v22, %v395_v23 }
  0x42   :  { %v523_v25 = vld [vmem:[#allocation4 + $0x520] sm:$0xff]  ;;  %1941 = vmatpush1.bf16.msra.mxu1 %v6928_v27 }
  0x43   :  { %v6921_v29 = vcombine.high %v519_v24, %v523_v25  ;;  %v383_v30 = vld [vmem:[#allocation4 + $0xc0] sm:$0xff]  ;;  %1901 = vmatprep.subr.bf16.mxu0 %v6793_v28  ;;  %v6920_v35 = vcombine.low %v519_v24, %v523_v25 }
  0x44   :  { %v387_v31 = vld [vmem:[#allocation4 + $0xe0] sm:$0xff]  ;;  %1902 = vmatpush1.bf16.msra.mxu0 %v6792_v34 }
  0x45   :  { %v511_v32 = vld [vmem:[#allocation4 + $0x4c0] sm:$0xff]  ;;  %v6785_v36 = vcombine.high %v383_v30, %v387_v31  ;;  %1942 = vmatprep.subr.bf16.mxu1 %v6921_v29  ;;  %v6784_v42 = vcombine.low %v383_v30, %v387_v31 }
  0x46   :  { %v515_v33 = vld [vmem:[#allocation4 + $0x4e0] sm:$0xff]  ;;  %1943 = vmatpush1.bf16.msra.mxu1 %v6920_v35 }
  0x47   :  { %v6913_v37 = vcombine.high %v511_v32, %v515_v33  ;;  %v375_v38 = vld [vmem:[#allocation4 + $0x80] sm:$0xff]  ;;  %1903 = vmatprep.subr.bf16.mxu0 %v6785_v36  ;;  %v6912_v43 = vcombine.low %v511_v32, %v515_v33 }
  0x48   :  { %v379_v39 = vld [vmem:[#allocation4 + $0xa0] sm:$0xff]  ;;  %1904 = vmatpush1.bf16.msra.mxu0 %v6784_v42 }
  0x49   :  { %v503_v40 = vld [vmem:[#allocation4 + $0x480] sm:$0xff]  ;;  %v6777_v44 = vcombine.high %v375_v38, %v379_v39  ;;  %1944 = vmatprep.subr.bf16.mxu1 %v6913_v37  ;;  %v6776_v50 = vcombine.low %v375_v38, %v379_v39 }
  0x4a   :  { %v507_v41 = vld [vmem:[#allocation4 + $0x4a0] sm:$0xff]  ;;  %1945 = vmatpush1.bf16.msra.mxu1 %v6912_v43 }
  0x4b   :  { %v6905_v45 = vcombine.high %v503_v40, %v507_v41  ;;  %v367_v46 = vld [vmem:[#allocation4 + $0x40] sm:$0xff]  ;;  %1905 = vmatprep.subr.bf16.mxu0 %v6777_v44  ;;  %v6904_v51 = vcombine.low %v503_v40, %v507_v41 }
  0x4c   :  { %v371_v47 = vld [vmem:[#allocation4 + $0x60] sm:$0xff]  ;;  %1906 = vmatpush1.bf16.msra.mxu0 %v6776_v50 }
  0x4d   :  { %v495_v48 = vld [vmem:[#allocation4 + $0x440] sm:$0xff]  ;;  %v6769_v52 = vcombine.high %v367_v46, %v371_v47  ;;  %1946 = vmatprep.subr.bf16.mxu1 %v6905_v45  ;;  %v6768_v62 = vcombine.low %v367_v46, %v371_v47 }
  0x4e   :  { %v499_v49 = vld [vmem:[#allocation4 + $0x460] sm:$0xff]  ;;  %1947 = vmatpush1.bf16.msra.mxu1 %v6904_v51 }
  0x4f   :  { %v6897_v55 = vcombine.high %v495_v48, %v499_v49  ;;  %v359_v56 = vld [vmem:[#allocation4] sm:$0xff]  ;;  %1907 = vmatprep.subr.bf16.mxu0 %v6769_v52  ;;  %v6896_v63 = vcombine.low %v495_v48, %v499_v49 }
  0x50   :  { %v363_v57 = vld [vmem:[#allocation4 + $0x20] sm:$0xff]  ;;  %1908 = vmatpush1.bf16.msra.mxu0 %v6768_v62 }
  0x51   :  { %v487_v60 = vld [vmem:[#allocation4 + $0x400] sm:$0xff]  ;;  %v6761_v0 = vcombine.high %v359_v56, %v363_v57  ;;  %1948 = vmatprep.subr.bf16.mxu1 %v6897_v55  ;;  %v6760_v6 = vcombine.low %v359_v56, %v363_v57 }
  0x52   :  { %v491_v61 = vld [vmem:[#allocation4 + $0x420] sm:$0xff]  ;;  %1949 = vmatpush1.bf16.msra.mxu1 %v6896_v63 }
  0x53   :  { %v6889_v1 = vcombine.high %v487_v60, %v491_v61  ;;  %v479_v2 = vld [vmem:[#allocation4 + $0x3c0] sm:$0xff]  ;;  %1909 = vmatprep.subr.bf16.mxu0 %v6761_v0  ;;  %v6888_v7 = vcombine.low %v487_v60, %v491_v61 }
  0x54   :  { %v483_v3 = vld [vmem:[#allocation4 + $0x3e0] sm:$0xff]  ;;  %1910 = vmatpush1.bf16.msra.mxu0 %v6760_v6  ;;  %v544_v6 = vld [vmem:[#allocation4 + $0x5c8] sm:$0xff] }
  0x55   :  { %v607_v4 = vld [vmem:[#allocation4 + $0x7c0] sm:$0xff]  ;;  %v6881_v8 = vcombine.high %v479_v2, %v483_v3  ;;  %1950 = vmatprep.subr.bf16.mxu1 %v6889_v1  ;;  %v6880_v14 = vcombine.low %v479_v2, %v483_v3 }
  0x56   :  { %v611_v5 = vld [vmem:[#allocation4 + $0x7e0] sm:$0xff]  ;;  %1951 = vmatpush1.bf16.msra.mxu1 %v6888_v7  ;;  %v548_v7 = vld [vmem:[#allocation4 + $0x5e8] sm:$0xff] }
  0x57   :  { %v7009_v9 = vcombine.high %v607_v4, %v611_v5  ;;  %v471_v10 = vld [vmem:[#allocation4 + $0x380] sm:$0xff]  ;;  %1911 = vmatprep.subr.bf16.mxu0 %v6881_v8  ;;  %v7008_v15 = vcombine.low %v607_v4, %v611_v5  ;;  %v416_v4 = vld [vmem:[#allocation4 + $0x1c8] sm:$0xff] }
  0x58   :  { %v475_v11 = vld [vmem:[#allocation4 + $0x3a0] sm:$0xff]  ;;  %1912 = vmatpush2.bf16.msra.mxu0 %v6880_v14  ;;  %v420_v5 = vld [vmem:[#allocation4 + $0x1e8] sm:$0xff] }
  0x59   :  { %v599_v12 = vld [vmem:[#allocation4 + $0x780] sm:$0xff]  ;;  %v6873_v16 = vcombine.high %v471_v10, %v475_v11  ;;  %1952 = vmatprep.subr.bf16.mxu1 %v7009_v9  ;;  %v6872_v22 = vcombine.low %v471_v10, %v475_v11  ;;  %v353_v11 = vld [vmem:[%s8621_s1 + $0x10] sm:$0xff]  ;;  %v408_v14 = vld [vmem:[#allocation4 + $0x188] sm:$0xff] }
  0x5a   :  { %v603_v13 = vld [vmem:[#allocation4 + $0x7a0] sm:$0xff]  ;;  %1953 = vmatpush2.bf16.msra.mxu1 %v7008_v15  ;;  %v412_v15 = vld [vmem:[#allocation4 + $0x1a8] sm:$0xff] }
  0x5b   :  { %v7001_v17 = vcombine.high %v599_v12, %v603_v13  ;;  %v463_v18 = vld [vmem:[#allocation4 + $0x340] sm:$0xff]  ;;  %1913 = vmatprep.subr.bf16.mxu0 %v6873_v16  ;;  %v7000_v23 = vcombine.low %v599_v12, %v603_v13  ;;  %v6819_v12 = vcombine.high %v416_v4, %v420_v5  ;;  %v6947_v13 = vcombine.high %v544_v6, %v548_v7 }
  0x5c   :  { %v467_v19 = vld [vmem:[#allocation4 + $0x360] sm:$0xff]  ;;  %1914 = vmatpush2.bf16.msra.mxu0 %v6872_v22  ;;  %v6811_v22 = vcombine.high %v408_v14, %v412_v15 }
  0x5d   :  { %v591_v20 = vld [vmem:[#allocation4 + $0x740] sm:$0xff]  ;;  %v6865_v24 = vcombine.high %v463_v18, %v467_v19  ;;  %1954 = vmatprep.subr.bf16.mxu1 %v7001_v17  ;;  %v6864_v30 = vcombine.low %v463_v18, %v467_v19  ;;  %v536_v17 = vld [vmem:[#allocation4 + $0x588] sm:$0xff]  ;;  %v8416_v19 = vpack.c.bf16 %v353_v11, %v353_v11 }
  0x5e   :  { %v595_v21 = vld [vmem:[#allocation4 + $0x760] sm:$0xff]  ;;  %1955 = vmatpush2.bf16.msra.mxu1 %v7000_v23  ;;  %v540_v18 = vld [vmem:[#allocation4 + $0x5a8] sm:$0xff] }
  0x5f   :  { %v6993_v25 = vcombine.high %v591_v20, %v595_v21  ;;  %v455_v26 = vld [vmem:[#allocation4 + $0x300] sm:$0xff]  ;;  %1915 = vmatprep.subr.bf16.mxu0 %v6865_v24  ;;  %v6992_v31 = vcombine.low %v591_v20, %v595_v21  ;;  %v6818_v20 = vcombine.low %v416_v4, %v420_v5  ;;  %v6946_v21 = vcombine.low %v544_v6, %v548_v7  ;;  %v400_v23 = vld [vmem:[#allocation4 + $0x148] sm:$0xff] }
  0x60   :  { %v459_v27 = vld [vmem:[#allocation4 + $0x320] sm:$0xff]  ;;  %1916 = vmatpush2.bf16.msra.mxu0 %v6864_v30  ;;  %v404_v24 = vld [vmem:[#allocation4 + $0x168] sm:$0xff] }
  0x61   :  { %v583_v28 = vld [vmem:[#allocation4 + $0x700] sm:$0xff]  ;;  %v6857_v32 = vcombine.high %v455_v26, %v459_v27  ;;  %1956 = vmatprep.subr.bf16.mxu1 %v6993_v25  ;;  %v6856_v38 = vcombine.low %v455_v26, %v459_v27  ;;  %v6939_v25 = vcombine.high %v536_v17, %v540_v18  ;;  %v528_v26 = vld [vmem:[#allocation4 + $0x548] sm:$0xff]  ;;  %v6803_v30 = vcombine.high %v400_v23, %v404_v24 }
  0x62   :  { %v587_v29 = vld [vmem:[#allocation4 + $0x720] sm:$0xff]  ;;  %1957 = vmatpush2.bf16.msra.mxu1 %v6992_v31  ;;  %v532_v27 = vld [vmem:[#allocation4 + $0x568] sm:$0xff] }
  0x63   :  { %v6985_v33 = vcombine.high %v583_v28, %v587_v29  ;;  %v447_v34 = vld [vmem:[#allocation4 + $0x2c0] sm:$0xff]  ;;  %1917 = vmatprep.subr.bf16.mxu0 %v6857_v32  ;;  %v6984_v39 = vcombine.low %v583_v28, %v587_v29  ;;  %v6810_v28 = vcombine.low %v408_v14, %v412_v15  ;;  %v6938_v29 = vcombine.low %v536_v17, %v540_v18  ;;  %v392_v31 = vld [vmem:[#allocation4 + $0x108] sm:$0xff] }
  0x64   :  { %v451_v35 = vld [vmem:[#allocation4 + $0x2e0] sm:$0xff]  ;;  %1918 = vmatpush2.bf16.msra.mxu0 %v6856_v38  ;;  %v396_v32 = vld [vmem:[#allocation4 + $0x128] sm:$0xff] }
  0x65   :  { %v575_v36 = vld [vmem:[#allocation4 + $0x6c0] sm:$0xff]  ;;  %v6849_v40 = vcombine.high %v447_v34, %v451_v35  ;;  %1958 = vmatprep.subr.bf16.mxu1 %v6985_v33  ;;  %v6848_v46 = vcombine.low %v447_v34, %v451_v35  ;;  %v520_v33 = vld [vmem:[#allocation4 + $0x508] sm:$0xff]  ;;  %v6931_v34 = vcombine.high %v528_v26, %v532_v27  ;;  %v6795_v38 = vcombine.high %v392_v31, %v396_v32 }
  0x66   :  { %v579_v37 = vld [vmem:[#allocation4 + $0x6e0] sm:$0xff]  ;;  %1959 = vmatpush2.bf16.msra.mxu1 %v6984_v39  ;;  %v524_v35 = vld [vmem:[#allocation4 + $0x528] sm:$0xff] }
  0x67   :  { %v6977_v41 = vcombine.high %v575_v36, %v579_v37  ;;  %v439_v42 = vld [vmem:[#allocation4 + $0x280] sm:$0xff]  ;;  %1919 = vmatprep.subr.bf16.mxu0 %v6849_v40  ;;  %v6976_v47 = vcombine.low %v575_v36, %v579_v37  ;;  %v6802_v36 = vcombine.low %v400_v23, %v404_v24  ;;  %v6930_v37 = vcombine.low %v528_v26, %v532_v27  ;;  %v384_v39 = vld [vmem:[#allocation4 + $0xc8] sm:$0xff] }
  0x68   :  { %v443_v43 = vld [vmem:[#allocation4 + $0x2a0] sm:$0xff]  ;;  %1920 = vmatpush2.bf16.msra.mxu0 %v6848_v46  ;;  %v388_v40 = vld [vmem:[#allocation4 + $0xe8] sm:$0xff] }
  0x69   :  { %v567_v44 = vld [vmem:[#allocation4 + $0x680] sm:$0xff]  ;;  %v6841_v48 = vcombine.high %v439_v42, %v443_v43  ;;  %1960 = vmatprep.subr.bf16.mxu1 %v6977_v41  ;;  %v6840_v54 = vcombine.low %v439_v42, %v443_v43  ;;  %v512_v41 = vld [vmem:[#allocation4 + $0x4c8] sm:$0xff]  ;;  %v6923_v42 = vcombine.high %v520_v33, %v524_v35  ;;  %v6787_v46 = vcombine.high %v384_v39, %v388_v40 }
  0x6a   :  { %v571_v45 = vld [vmem:[#allocation4 + $0x6a0] sm:$0xff]  ;;  %1961 = vmatpush2.bf16.msra.mxu1 %v6976_v47  ;;  %v516_v43 = vld [vmem:[#allocation4 + $0x4e8] sm:$0xff] }
  0x6b   :  { %v6969_v49 = vcombine.high %v567_v44, %v571_v45  ;;  %v431_v50 = vld [vmem:[#allocation4 + $0x240] sm:$0xff]  ;;  %1921 = vmatprep.subr.bf16.mxu0 %v6841_v48  ;;  %v6968_v55 = vcombine.low %v567_v44, %v571_v45  ;;  %v6794_v44 = vcombine.low %v392_v31, %v396_v32  ;;  %v6922_v45 = vcombine.low %v520_v33, %v524_v35  ;;  %v376_v47 = vld [vmem:[#allocation4 + $0x88] sm:$0xff] }
  0x6c   :  { %v435_v51 = vld [vmem:[#allocation4 + $0x260] sm:$0xff]  ;;  %1922 = vmatpush2.bf16.msra.mxu0 %v6840_v54  ;;  %v380_v48 = vld [vmem:[#allocation4 + $0xa8] sm:$0xff] }
  0x6d   :  { %v559_v52 = vld [vmem:[#allocation4 + $0x640] sm:$0xff]  ;;  %v6833_v56 = vcombine.high %v431_v50, %v435_v51  ;;  %1962 = vmatprep.subr.bf16.mxu1 %v6969_v49  ;;  %v6832_v0 = vcombine.low %v431_v50, %v435_v51  ;;  %v504_v49 = vld [vmem:[#allocation4 + $0x488] sm:$0xff]  ;;  %v6915_v50 = vcombine.high %v512_v41, %v516_v43  ;;  %v6779_v54 = vcombine.high %v376_v47, %v380_v48 }
  0x6e   :  { %v563_v53 = vld [vmem:[#allocation4 + $0x660] sm:$0xff]  ;;  %1963 = vmatpush2.bf16.msra.mxu1 %v6968_v55  ;;  %v508_v51 = vld [vmem:[#allocation4 + $0x4a8] sm:$0xff] }
  0x6f   :  { %v6961_v57 = vcombine.high %v559_v52, %v563_v53  ;;  %v423_v60 = vld [vmem:[#allocation4 + $0x200] sm:$0xff]  ;;  %1923 = vmatprep.subr.bf16.mxu0 %v6833_v56  ;;  %v6960_v1 = vcombine.low %v559_v52, %v563_v53  ;;  %v6786_v52 = vcombine.low %v384_v39, %v388_v40  ;;  %v6914_v53 = vcombine.low %v512_v41, %v516_v43  ;;  %v368_v55 = vld [vmem:[#allocation4 + $0x48] sm:$0xff] }
  0x70   :  { %v427_v61 = vld [vmem:[#allocation4 + $0x220] sm:$0xff]  ;;  %1924 = vmatpush2.bf16.msra.mxu0 %v6832_v0  ;;  %v372_v56 = vld [vmem:[#allocation4 + $0x68] sm:$0xff] }
  0x71   :  { %v551_v62 = vld [vmem:[#allocation4 + $0x600] sm:$0xff]  ;;  %v6825_v2 = vcombine.high %v423_v60, %v427_v61  ;;  %1964 = vmatprep.subr.bf16.mxu1 %v6961_v57  ;;  %v6824_v8 = vcombine.low %v423_v60, %v427_v61  ;;  %v496_v57 = vld [vmem:[#allocation4 + $0x448] sm:$0xff]  ;;  %v6907_v60 = vcombine.high %v504_v49, %v508_v51  ;;  %v6771_v0 = vcombine.high %v368_v55, %v372_v56 }
  0x72   :  { %v555_v63 = vld [vmem:[#allocation4 + $0x620] sm:$0xff]  ;;  %1965 = vmatpush2.bf16.msra.mxu1 %v6960_v1  ;;  %v500_v61 = vld [vmem:[#allocation4 + $0x468] sm:$0xff]  ;;  %v6770_v6 = vcombine.low %v368_v55, %v372_v56 }
  0x73   :  { %v6953_v3 = vcombine.high %v551_v62, %v555_v63  ;;  %v351_v9 = vld [vmem:[%s8621_s1] sm:$0xff]  ;;  %1925 = vmatprep.subr.bf16.mxu0 %v6825_v2  ;;  %v6952_v10 = vcombine.low %v551_v62, %v555_v63  ;;  %v6778_v62 = vcombine.low %v376_v47, %v380_v48  ;;  %v6906_v63 = vcombine.low %v504_v49, %v508_v51  ;;  %v360_v1 = vld [vmem:[#allocation4 + $0x8] sm:$0xff] }
  0x74   :  { %v8414_v16 = vpack.c.bf16 %v351_v9, %v351_v9  ;;  %1926 = vmatpush2.bf16.msra.mxu0 %v6824_v8  ;;  %v364_v2 = vld [vmem:[#allocation4 + $0x28] sm:$0xff]  ;;  %v6899_v4 = vcombine.high %v496_v57, %v500_v61  ;;  %v6898_v7 = vcombine.low %v496_v57, %v500_v61 }
  0x75   :  { %1966 = vmatprep.subr.bf16.mxu1 %v6953_v3  ;;  %1977 = vmatprep.subr.bf16.mxu0 %v6819_v12  ;;  %v488_v3 = vld [vmem:[#allocation4 + $0x408] sm:$0xff]  ;;  %v6763_v8 = vcombine.high %v360_v1, %v364_v2  ;;  %v6762_v14 = vcombine.low %v360_v1, %v364_v2 }
  0x76   :  { %1967 = vmatpush2.bf16.msra.mxu1 %v6952_v10  ;;  %v492_v5 = vld [vmem:[#allocation4 + $0x428] sm:$0xff] }
  0x77   :  { %2018 = vmatprep.subr.bf16.mxu1 %v6947_v13  ;;  %1928 = vmatmul.mubr.bf16.vlgmr.msra.gmra.mxu0 %v8414_v16  ;;  %v480_v9 = vld [vmem:[#allocation4 + $0x3c8] sm:$0xff]  ;;  %v6891_v12 = vcombine.high %v488_v3, %v492_v5  ;;  %v6890_v15 = vcombine.low %v488_v3, %v492_v5 }
  0x78   :  { %1978 = vmatpush1.bf16.msra.mxu0 %v6818_v20  ;;  %2009 = vmatprep.mubr.bf16.mxu0 %v8402_v58  ;;  %v484_v10 = vld [vmem:[#allocation4 + $0x3e8] sm:$0xff] }
  0x79   :  { %1969 = vmatmul.mubr.bf16.vlgmr.msra.gmra.mxu1 %v8416_v19  ;;  %1979 = vmatprep.subr.bf16.mxu0 %v6811_v22  ;;  %v608_v11 = vld [vmem:[#allocation4 + $0x7c8] sm:$0xff]  ;;  %v6883_v17 = vcombine.high %v480_v9, %v484_v10  ;;  %v6882_v24 = vcombine.low %v480_v9, %v484_v10 }
  0x7a   :  { %2019 = vmatpush1.bf16.msra.mxu1 %v6946_v21  ;;  %2050 = vmatprep.mubr.bf16.mxu1 %v8404_v59  ;;  %v612_v13 = vld [vmem:[#allocation4 + $0x7e8] sm:$0xff] }
  0x7b   :  { %2020 = vmatprep.subr.bf16.mxu1 %v6939_v25  ;;  %v472_v18 = vld [vmem:[#allocation4 + $0x388] sm:$0xff]  ;;  %v7011_v22 = vcombine.high %v608_v11, %v612_v13  ;;  %v7010_v25 = vcombine.low %v608_v11, %v612_v13  ;;  %v417_v13 = vld [vmem:[#allocation4 + $0x1d0] sm:$0xff] }
  0x7c   :  { %1980 = vmatpush1.bf16.msra.mxu0 %v6810_v28  ;;  %v476_v20 = vld [vmem:[#allocation4 + $0x3a8] sm:$0xff] }
  0x7d   :  { %1981 = vmatprep.subr.bf16.mxu0 %v6803_v30  ;;  %v600_v21 = vld [vmem:[#allocation4 + $0x788] sm:$0xff]  ;;  %v6875_v26 = vcombine.high %v472_v18, %v476_v20  ;;  %v6874_v32 = vcombine.low %v472_v18, %v476_v20  ;;  %v549_v18 = vld [vmem:[#allocation4 + $0x5f0] sm:$0xff] }
  0x7e   :  { %2021 = vmatpush1.bf16.msra.mxu1 %v6938_v29  ;;  %v604_v23 = vld [vmem:[#allocation4 + $0x7a8] sm:$0xff] }
  0x7f   :  { %2022 = vmatprep.subr.bf16.mxu1 %v6931_v34  ;;  %v464_v27 = vld [vmem:[#allocation4 + $0x348] sm:$0xff]  ;;  %v7003_v30 = vcombine.high %v600_v21, %v604_v23  ;;  %v7002_v33 = vcombine.low %v600_v21, %v604_v23  ;;  %v409_v23 = vld [vmem:[#allocation4 + $0x190] sm:$0xff] }
  0x80   :  { %1982 = vmatpush1.bf16.msra.mxu0 %v6802_v36  ;;  %v468_v28 = vld [vmem:[#allocation4 + $0x368] sm:$0xff] }
  0x81   :  { %1983 = vmatprep.subr.bf16.mxu0 %v6795_v38  ;;  %v592_v29 = vld [vmem:[#allocation4 + $0x748] sm:$0xff]  ;;  %v6867_v34 = vcombine.high %v464_v27, %v468_v28  ;;  %v6866_v40 = vcombine.low %v464_v27, %v468_v28  ;;  %v541_v27 = vld [vmem:[#allocation4 + $0x5b0] sm:$0xff] }
  0x82   :  { %2023 = vmatpush1.bf16.msra.mxu1 %v6930_v37  ;;  %v596_v31 = vld [vmem:[#allocation4 + $0x768] sm:$0xff] }
  0x83   :  { %2024 = vmatprep.subr.bf16.mxu1 %v6923_v42  ;;  %v456_v35 = vld [vmem:[#allocation4 + $0x308] sm:$0xff]  ;;  %v6995_v38 = vcombine.high %v592_v29, %v596_v31  ;;  %v6994_v41 = vcombine.low %v592_v29, %v596_v31  ;;  %v401_v31 = vld [vmem:[#allocation4 + $0x150] sm:$0xff] }
  0x84   :  { %1984 = vmatpush1.bf16.msra.mxu0 %v6794_v44  ;;  %v460_v36 = vld [vmem:[#allocation4 + $0x328] sm:$0xff] }
  0x85   :  { %1985 = vmatprep.subr.bf16.mxu0 %v6787_v46  ;;  %v584_v37 = vld [vmem:[#allocation4 + $0x708] sm:$0xff]  ;;  %v6859_v42 = vcombine.high %v456_v35, %v460_v36  ;;  %v6858_v48 = vcombine.low %v456_v35, %v460_v36  ;;  %v533_v35 = vld [vmem:[#allocation4 + $0x570] sm:$0xff] }
  0x86   :  { %2025 = vmatpush1.bf16.msra.mxu1 %v6922_v45  ;;  %v588_v39 = vld [vmem:[#allocation4 + $0x728] sm:$0xff] }
  0x87   :  { %2026 = vmatprep.subr.bf16.mxu1 %v6915_v50  ;;  %v448_v43 = vld [vmem:[#allocation4 + $0x2c8] sm:$0xff]  ;;  %v6987_v46 = vcombine.high %v584_v37, %v588_v39  ;;  %v6986_v49 = vcombine.low %v584_v37, %v588_v39  ;;  %v393_v39 = vld [vmem:[#allocation4 + $0x110] sm:$0xff] }
  0x88   :  { %1986 = vmatpush1.bf16.msra.mxu0 %v6786_v52  ;;  %v452_v44 = vld [vmem:[#allocation4 + $0x2e8] sm:$0xff] }
  0x89   :  { %1987 = vmatprep.subr.bf16.mxu0 %v6779_v54  ;;  %v576_v45 = vld [vmem:[#allocation4 + $0x6c8] sm:$0xff]  ;;  %v6851_v50 = vcombine.high %v448_v43, %v452_v44  ;;  %v6850_v56 = vcombine.low %v448_v43, %v452_v44  ;;  %v525_v43 = vld [vmem:[#allocation4 + $0x530] sm:$0xff] }
  0x8a   :  { %2027 = vmatpush1.bf16.msra.mxu1 %v6914_v53  ;;  %v580_v47 = vld [vmem:[#allocation4 + $0x6e8] sm:$0xff] }
  0x8b   :  { %2028 = vmatprep.subr.bf16.mxu1 %v6907_v60  ;;  %v440_v51 = vld [vmem:[#allocation4 + $0x288] sm:$0xff]  ;;  %v6979_v54 = vcombine.high %v576_v45, %v580_v47  ;;  %v6978_v57 = vcombine.low %v576_v45, %v580_v47  ;;  %v385_v47 = vld [vmem:[#allocation4 + $0xd0] sm:$0xff] }
  0x8c   :  { %1988 = vmatpush1.bf16.msra.mxu0 %v6778_v62  ;;  %v444_v52 = vld [vmem:[#allocation4 + $0x2a8] sm:$0xff] }
  0x8d   :  { %1989 = vmatprep.subr.bf16.mxu0 %v6771_v0  ;;  %v568_v53 = vld [vmem:[#allocation4 + $0x688] sm:$0xff]  ;;  %v6843_v60 = vcombine.high %v440_v51, %v444_v52  ;;  %v6842_v2 = vcombine.low %v440_v51, %v444_v52  ;;  %v517_v51 = vld [vmem:[#allocation4 + $0x4f0] sm:$0xff] }
  0x8e   :  { %2029 = vmatpush1.bf16.msra.mxu1 %v6906_v63  ;;  %v572_v55 = vld [vmem:[#allocation4 + $0x6a8] sm:$0xff] }
  0x8f   :  { %2030 = vmatprep.subr.bf16.mxu1 %v6899_v4  ;;  %v432_v61 = vld [vmem:[#allocation4 + $0x248] sm:$0xff]  ;;  %v6971_v0 = vcombine.high %v568_v53, %v572_v55  ;;  %v6970_v3 = vcombine.low %v568_v53, %v572_v55  ;;  %v377_v55 = vld [vmem:[#allocation4 + $0x90] sm:$0xff] }
  0x90   :  { %1990 = vmatpush1.bf16.msra.mxu0 %v6770_v6  ;;  %v436_v62 = vld [vmem:[#allocation4 + $0x268] sm:$0xff] }
  0x91   :  { %1991 = vmatprep.subr.bf16.mxu0 %v6763_v8  ;;  %v560_v63 = vld [vmem:[#allocation4 + $0x648] sm:$0xff]  ;;  %v6835_v4 = vcombine.high %v432_v61, %v436_v62  ;;  %v6834_v10 = vcombine.low %v432_v61, %v436_v62  ;;  %v509_v61 = vld [vmem:[#allocation4 + $0x4b0] sm:$0xff] }
  0x92   :  { %2031 = vmatpush1.bf16.msra.mxu1 %v6898_v7  ;;  %v564_v1 = vld [vmem:[#allocation4 + $0x668] sm:$0xff] }
  0x93   :  { %2032 = vmatprep.subr.bf16.mxu1 %v6891_v12  ;;  %v424_v5 = vld [vmem:[#allocation4 + $0x208] sm:$0xff]  ;;  %v6963_v8 = vcombine.high %v560_v63, %v564_v1  ;;  %v6962_v11 = vcombine.low %v560_v63, %v564_v1  ;;  %v369_v1 = vld [vmem:[#allocation4 + $0x50] sm:$0xff] }
  0x94   :  { %1992 = vmatpush1.bf16.msra.mxu0 %v6762_v14  ;;  %v428_v6 = vld [vmem:[#allocation4 + $0x228] sm:$0xff]  ;;  %v421_v14 = vld [vmem:[#allocation4 + $0x1f0] sm:$0xff] }
  0x95   :  { %1993 = vmatprep.subr.bf16.mxu0 %v6883_v17  ;;  %v552_v7 = vld [vmem:[#allocation4 + $0x608] sm:$0xff]  ;;  %v6827_v12 = vcombine.high %v424_v5, %v428_v6  ;;  %v6826_v20 = vcombine.low %v424_v5, %v428_v6  ;;  %v6820_v28 = vcombine.low %v417_v13, %v421_v14  ;;  %v501_v5 = vld [vmem:[#allocation4 + $0x470] sm:$0xff] }
  0x96   :  { %2033 = vmatpush1.bf16.msra.mxu1 %v6890_v15  ;;  %v556_v9 = vld [vmem:[#allocation4 + $0x628] sm:$0xff]  ;;  %v545_v15 = vld [vmem:[#allocation4 + $0x5d0] sm:$0xff] }
  0x97   :  { %2034 = vmatprep.subr.bf16.mxu1 %v7011_v22  ;;  %v6955_v17 = vcombine.high %v552_v7, %v556_v9  ;;  %v6954_v21 = vcombine.low %v552_v7, %v556_v9  ;;  %v6821_v22 = vcombine.high %v417_v13, %v421_v14  ;;  %v6948_v29 = vcombine.low %v545_v15, %v549_v18  ;;  %v361_v9 = vld [vmem:[#allocation4 + $0x10] sm:$0xff] }
  0x98   :  { %1994 = vmatpush2.bf16.msra.mxu0 %v6882_v24  ;;  %v413_v24 = vld [vmem:[#allocation4 + $0x1b0] sm:$0xff] }
  0x99   :  { %1995 = vmatprep.subr.bf16.mxu0 %v6875_v26  ;;  %v6949_v26 = vcombine.high %v545_v15, %v549_v18  ;;  %v6812_v36 = vcombine.low %v409_v23, %v413_v24  ;;  %v493_v13 = vld [vmem:[#allocation4 + $0x430] sm:$0xff] }
  0x9a   :  { %2035 = vmatpush2.bf16.msra.mxu1 %v7010_v25  ;;  %v537_v25 = vld [vmem:[#allocation4 + $0x590] sm:$0xff] }
  0x9b   :  { %2036 = vmatprep.subr.bf16.mxu1 %v7003_v30  ;;  %v6813_v30 = vcombine.high %v409_v23, %v413_v24  ;;  %v6940_v37 = vcombine.low %v537_v25, %v541_v27  ;;  %v481_v18 = vld [vmem:[#allocation4 + $0x3d0] sm:$0xff] }
  0x9c   :  { %1996 = vmatpush2.bf16.msra.mxu0 %v6874_v32  ;;  %v405_v32 = vld [vmem:[#allocation4 + $0x170] sm:$0xff] }
  0x9d   :  { %1997 = vmatprep.subr.bf16.mxu0 %v6867_v34  ;;  %v6941_v34 = vcombine.high %v537_v25, %v541_v27  ;;  %v6804_v44 = vcombine.low %v401_v31, %v405_v32  ;;  %v613_v23 = vld [vmem:[#allocation4 + $0x7f0] sm:$0xff] }
  0x9e   :  { %2037 = vmatpush2.bf16.msra.mxu1 %v7002_v33  ;;  %v529_v33 = vld [vmem:[#allocation4 + $0x550] sm:$0xff] }
  0x9f   :  { %2038 = vmatprep.subr.bf16.mxu1 %v6995_v38  ;;  %v6805_v38 = vcombine.high %v401_v31, %v405_v32  ;;  %v6932_v45 = vcombine.low %v529_v33, %v533_v35  ;;  %v473_v27 = vld [vmem:[#allocation4 + $0x390] sm:$0xff] }
  0xa0   :  { %1998 = vmatpush2.bf16.msra.mxu0 %v6866_v40  ;;  %v397_v40 = vld [vmem:[#allocation4 + $0x130] sm:$0xff] }
  0xa1   :  { %1999 = vmatprep.subr.bf16.mxu0 %v6859_v42  ;;  %v6933_v42 = vcombine.high %v529_v33, %v533_v35  ;;  %v6796_v52 = vcombine.low %v393_v39, %v397_v40  ;;  %v605_v31 = vld [vmem:[#allocation4 + $0x7b0] sm:$0xff] }
  0xa2   :  { %2039 = vmatpush2.bf16.msra.mxu1 %v6994_v41  ;;  %v521_v41 = vld [vmem:[#allocation4 + $0x510] sm:$0xff] }
  0xa3   :  { %2040 = vmatprep.subr.bf16.mxu1 %v6987_v46  ;;  %v6797_v46 = vcombine.high %v393_v39, %v397_v40  ;;  %v6924_v53 = vcombine.low %v521_v41, %v525_v43  ;;  %v465_v35 = vld [vmem:[#allocation4 + $0x350] sm:$0xff] }
  0xa4   :  { %2000 = vmatpush2.bf16.msra.mxu0 %v6858_v48  ;;  %v389_v48 = vld [vmem:[#allocation4 + $0xf0] sm:$0xff] }
  0xa5   :  { %2001 = vmatprep.subr.bf16.mxu0 %v6851_v50  ;;  %v6925_v50 = vcombine.high %v521_v41, %v525_v43  ;;  %v6788_v62 = vcombine.low %v385_v47, %v389_v48  ;;  %v597_v39 = vld [vmem:[#allocation4 + $0x770] sm:$0xff] }
  0xa6   :  { %2041 = vmatpush2.bf16.msra.mxu1 %v6986_v49  ;;  %v513_v49 = vld [vmem:[#allocation4 + $0x4d0] sm:$0xff] }
  0xa7   :  { %2042 = vmatprep.subr.bf16.mxu1 %v6979_v54  ;;  %v6789_v54 = vcombine.high %v385_v47, %v389_v48  ;;  %v6916_v63 = vcombine.low %v513_v49, %v517_v51  ;;  %v457_v43 = vld [vmem:[#allocation4 + $0x310] sm:$0xff] }
  0xa8   :  { %2002 = vmatpush2.bf16.msra.mxu0 %v6850_v56  ;;  %v381_v56 = vld [vmem:[#allocation4 + $0xb0] sm:$0xff] }
  0xa9   :  { %2003 = vmatprep.subr.bf16.mxu0 %v6843_v60  ;;  %v6917_v60 = vcombine.high %v513_v49, %v517_v51  ;;  %v6780_v6 = vcombine.low %v377_v55, %v381_v56  ;;  %v589_v47 = vld [vmem:[#allocation4 + $0x730] sm:$0xff] }
  0xaa   :  { %2043 = vmatpush2.bf16.msra.mxu1 %v6978_v57  ;;  %v505_v57 = vld [vmem:[#allocation4 + $0x490] sm:$0xff] }
  0xab   :  { %2044 = vmatprep.subr.bf16.mxu1 %v6971_v0  ;;  %v6781_v0 = vcombine.high %v377_v55, %v381_v56  ;;  %v6908_v7 = vcombine.low %v505_v57, %v509_v61  ;;  %v449_v51 = vld [vmem:[#allocation4 + $0x2d0] sm:$0xff] }
  0xac   :  { %2004 = vmatpush2.bf16.msra.mxu0 %v6842_v2  ;;  %v373_v2 = vld [vmem:[#allocation4 + $0x70] sm:$0xff] }
  0xad   :  { %2005 = vmatprep.subr.bf16.mxu0 %v6835_v4  ;;  %v6909_v4 = vcombine.high %v505_v57, %v509_v61  ;;  %v6772_v14 = vcombine.low %v369_v1, %v373_v2  ;;  %v581_v55 = vld [vmem:[#allocation4 + $0x6f0] sm:$0xff] }
  0xae   :  { %2045 = vmatpush2.bf16.msra.mxu1 %v6970_v3  ;;  %v497_v3 = vld [vmem:[#allocation4 + $0x450] sm:$0xff] }
  0xaf   :  { %2046 = vmatprep.subr.bf16.mxu1 %v6963_v8  ;;  %v6773_v8 = vcombine.high %v369_v1, %v373_v2  ;;  %v6900_v15 = vcombine.low %v497_v3, %v501_v5  ;;  %v441_v61 = vld [vmem:[#allocation4 + $0x290] sm:$0xff] }
  0xb0   :  { %2006 = vmatpush2.bf16.msra.mxu0 %v6834_v10  ;;  %v365_v10 = vld [vmem:[#allocation4 + $0x30] sm:$0xff] }
  0xb1   :  { %2007 = vmatprep.subr.bf16.mxu0 %v6827_v12  ;;  %v6901_v12 = vcombine.high %v497_v3, %v501_v5  ;;  %v6764_v24 = vcombine.low %v361_v9, %v365_v10  ;;  %v573_v1 = vld [vmem:[#allocation4 + $0x6b0] sm:$0xff] }
  0xb2   :  { %2047 = vmatpush2.bf16.msra.mxu1 %v6962_v11  ;;  %v489_v11 = vld [vmem:[#allocation4 + $0x410] sm:$0xff] }
  0xb3   :  { %2048 = vmatprep.subr.bf16.mxu1 %v6955_v17  ;;  %v6765_v17 = vcombine.high %v361_v9, %v365_v10  ;;  %v6892_v25 = vcombine.low %v489_v11, %v493_v13  ;;  %v433_v5 = vld [vmem:[#allocation4 + $0x250] sm:$0xff] }
  0xb4   :  { %2008 = vmatpush2.bf16.msra.mxu0 %v6826_v20  ;;  %v485_v20 = vld [vmem:[#allocation4 + $0x3f0] sm:$0xff] }
  0xb5   :  { %2059 = vmatprep.subr.bf16.mxu0 %v6821_v22  ;;  %v6893_v22 = vcombine.high %v489_v11, %v493_v13  ;;  %v6884_v32 = vcombine.low %v481_v18, %v485_v20  ;;  %v565_v9 = vld [vmem:[#allocation4 + $0x670] sm:$0xff] }
  0xb6   :  { %2049 = vmatpush2.bf16.msra.mxu1 %v6954_v21  ;;  %v609_v21 = vld [vmem:[#allocation4 + $0x7d0] sm:$0xff] }
  0xb7   :  { %2100 = vmatprep.subr.bf16.mxu1 %v6949_v26  ;;  %2010 = vmatmul.mubr.bf16.vlgmr.msra.gmra.mxu0 %v8414_v16  ;;  %v6885_v26 = vcombine.high %v481_v18, %v485_v20  ;;  %v7012_v33 = vcombine.low %v609_v21, %v613_v23  ;;  %v425_v13 = vld [vmem:[#allocation4 + $0x210] sm:$0xff] }
  0xb8   :  { %2060 = vmatpush1.bf16.msra.mxu0 %v6820_v28  ;;  %2091 = vmatprep.mubr.bf16.mxu0 %v8402_v58  ;;  %v477_v28 = vld [vmem:[#allocation4 + $0x3b0] sm:$0xff] }
  0xb9   :  { %2051 = vmatmul.mubr.bf16.vlgmr.msra.gmra.mxu1 %v8416_v19  ;;  %2061 = vmatprep.subr.bf16.mxu0 %v6813_v30  ;;  %v7013_v30 = vcombine.high %v609_v21, %v613_v23  ;;  %v6876_v40 = vcombine.low %v473_v27, %v477_v28  ;;  %v557_v18 = vld [vmem:[#allocation4 + $0x630] sm:$0xff]  ;;  %v418_v23 = vld [vmem:[#allocation4 + $0x1d8] sm:$0xff] }
  0xba   :  { %2101 = vmatpush1.bf16.msra.mxu1 %v6948_v29  ;;  %2132 = vmatprep.mubr.bf16.mxu1 %v8404_v59  ;;  %v601_v29 = vld [vmem:[#allocation4 + $0x790] sm:$0xff] }
  0xbb   :  { %2102 = vmatprep.subr.bf16.mxu1 %v6941_v34  ;;  %v6877_v34 = vcombine.high %v473_v27, %v477_v28  ;;  %v7004_v41 = vcombine.low %v601_v29, %v605_v31  ;;  %v550_v27 = vld [vmem:[#allocation4 + $0x5f8] sm:$0xff] }
  0xbc   :  { %2062 = vmatpush1.bf16.msra.mxu0 %v6812_v36  ;;  %v469_v36 = vld [vmem:[#allocation4 + $0x370] sm:$0xff] }
  0xbd   :  { %2063 = vmatprep.subr.bf16.mxu0 %v6805_v38  ;;  %v7005_v38 = vcombine.high %v601_v29, %v605_v31  ;;  %v6868_v48 = vcombine.low %v465_v35, %v469_v36  ;;  %v410_v31 = vld [vmem:[#allocation4 + $0x198] sm:$0xff] }
  0xbe   :  { %2103 = vmatpush1.bf16.msra.mxu1 %v6940_v37  ;;  %v593_v37 = vld [vmem:[#allocation4 + $0x750] sm:$0xff] }
  0xbf   :  { %2104 = vmatprep.subr.bf16.mxu1 %v6933_v42  ;;  %v6869_v42 = vcombine.high %v465_v35, %v469_v36  ;;  %v6996_v49 = vcombine.low %v593_v37, %v597_v39  ;;  %v542_v35 = vld [vmem:[#allocation4 + $0x5b8] sm:$0xff] }
  0xc0   :  { %2064 = vmatpush1.bf16.msra.mxu0 %v6804_v44  ;;  %v461_v44 = vld [vmem:[#allocation4 + $0x330] sm:$0xff] }
  0xc1   :  { %2065 = vmatprep.subr.bf16.mxu0 %v6797_v46  ;;  %v6997_v46 = vcombine.high %v593_v37, %v597_v39  ;;  %v6860_v56 = vcombine.low %v457_v43, %v461_v44  ;;  %v402_v39 = vld [vmem:[#allocation4 + $0x158] sm:$0xff] }
  0xc2   :  { %2105 = vmatpush1.bf16.msra.mxu1 %v6932_v45  ;;  %v585_v45 = vld [vmem:[#allocation4 + $0x710] sm:$0xff] }
  0xc3   :  { %2106 = vmatprep.subr.bf16.mxu1 %v6925_v50  ;;  %v6861_v50 = vcombine.high %v457_v43, %v461_v44  ;;  %v6988_v57 = vcombine.low %v585_v45, %v589_v47  ;;  %v534_v43 = vld [vmem:[#allocation4 + $0x578] sm:$0xff] }
  0xc4   :  { %2066 = vmatpush1.bf16.msra.mxu0 %v6796_v52  ;;  %v453_v52 = vld [vmem:[#allocation4 + $0x2f0] sm:$0xff] }
  0xc5   :  { %2067 = vmatprep.subr.bf16.mxu0 %v6789_v54  ;;  %v6989_v54 = vcombine.high %v585_v45, %v589_v47  ;;  %v6852_v2 = vcombine.low %v449_v51, %v453_v52  ;;  %v394_v47 = vld [vmem:[#allocation4 + $0x118] sm:$0xff] }
  0xc6   :  { %2107 = vmatpush1.bf16.msra.mxu1 %v6924_v53  ;;  %v577_v53 = vld [vmem:[#allocation4 + $0x6d0] sm:$0xff] }
  0xc7   :  { %2108 = vmatprep.subr.bf16.mxu1 %v6917_v60  ;;  %v6853_v60 = vcombine.high %v449_v51, %v453_v52  ;;  %v6980_v3 = vcombine.low %v577_v53, %v581_v55  ;;  %v526_v51 = vld [vmem:[#allocation4 + $0x538] sm:$0xff] }
  0xc8   :  { %2068 = vmatpush1.bf16.msra.mxu0 %v6788_v62  ;;  %v445_v62 = vld [vmem:[#allocation4 + $0x2b0] sm:$0xff] }
  0xc9   :  { %2069 = vmatprep.subr.bf16.mxu0 %v6781_v0  ;;  %v6981_v0 = vcombine.high %v577_v53, %v581_v55  ;;  %v6844_v10 = vcombine.low %v441_v61, %v445_v62  ;;  %v386_v55 = vld [vmem:[#allocation4 + $0xd8] sm:$0xff] }
  0xca   :  { %2109 = vmatpush1.bf16.msra.mxu1 %v6916_v63  ;;  %v569_v63 = vld [vmem:[#allocation4 + $0x690] sm:$0xff] }
  0xcb   :  { %2110 = vmatprep.subr.bf16.mxu1 %v6909_v4  ;;  %v6845_v4 = vcombine.high %v441_v61, %v445_v62  ;;  %v6972_v11 = vcombine.low %v569_v63, %v573_v1  ;;  %v518_v61 = vld [vmem:[#allocation4 + $0x4f8] sm:$0xff] }
  0xcc   :  { %2070 = vmatpush1.bf16.msra.mxu0 %v6780_v6  ;;  %v437_v6 = vld [vmem:[#allocation4 + $0x270] sm:$0xff] }
  0xcd   :  { %2071 = vmatprep.subr.bf16.mxu0 %v6773_v8  ;;  %v6973_v8 = vcombine.high %v569_v63, %v573_v1  ;;  %v6836_v20 = vcombine.low %v433_v5, %v437_v6  ;;  %v506_v1 = vld [vmem:[#allocation4 + $0x498] sm:$0xff] }
  0xce   :  { %2111 = vmatpush1.bf16.msra.mxu1 %v6908_v7  ;;  %v561_v7 = vld [vmem:[#allocation4 + $0x650] sm:$0xff] }
  0xcf   :  { %2112 = vmatprep.subr.bf16.mxu1 %v6901_v12  ;;  %v6837_v12 = vcombine.high %v433_v5, %v437_v6  ;;  %v6964_v21 = vcombine.low %v561_v7, %v565_v9 }
  0xd0   :  { %2072 = vmatpush1.bf16.msra.mxu0 %v6772_v14  ;;  %v429_v14 = vld [vmem:[#allocation4 + $0x230] sm:$0xff] }
  0xd1   :  { %2073 = vmatprep.subr.bf16.mxu0 %v6765_v17  ;;  %v6965_v17 = vcombine.high %v561_v7, %v565_v9  ;;  %v6828_v28 = vcombine.low %v425_v13, %v429_v14  ;;  %v370_v7 = vld [vmem:[#allocation4 + $0x58] sm:$0xff] }
  0xd2   :  { %2113 = vmatpush1.bf16.msra.mxu1 %v6900_v15  ;;  %v553_v15 = vld [vmem:[#allocation4 + $0x610] sm:$0xff]  ;;  %v498_v9 = vld [vmem:[#allocation4 + $0x458] sm:$0xff] }
  0xd3   :  { %2114 = vmatprep.subr.bf16.mxu1 %v6893_v22  ;;  %v6829_v22 = vcombine.high %v425_v13, %v429_v14  ;;  %v6956_v29 = vcombine.low %v553_v15, %v557_v18 }
  0xd4   :  { %2074 = vmatpush1.bf16.msra.mxu0 %v6764_v24  ;;  %v422_v24 = vld [vmem:[#allocation4 + $0x1f8] sm:$0xff] }
  0xd5   :  { %2075 = vmatprep.subr.bf16.mxu0 %v6885_v26  ;;  %v6957_v26 = vcombine.high %v553_v15, %v557_v18  ;;  %v6822_v36 = vcombine.low %v418_v23, %v422_v24  ;;  %v362_v15 = vld [vmem:[#allocation4 + $0x18] sm:$0xff] }
  0xd6   :  { %2115 = vmatpush1.bf16.msra.mxu1 %v6892_v25  ;;  %v546_v25 = vld [vmem:[#allocation4 + $0x5d8] sm:$0xff] }
  0xd7   :  { %2116 = vmatprep.subr.bf16.mxu1 %v7013_v30  ;;  %v6823_v30 = vcombine.high %v418_v23, %v422_v24  ;;  %v6950_v37 = vcombine.low %v546_v25, %v550_v27  ;;  %v490_v18 = vld [vmem:[#allocation4 + $0x418] sm:$0xff] }
  0xd8   :  { %2076 = vmatpush2.bf16.msra.mxu0 %v6884_v32  ;;  %v414_v32 = vld [vmem:[#allocation4 + $0x1b8] sm:$0xff] }
  0xd9   :  { %2077 = vmatprep.subr.bf16.mxu0 %v6877_v34  ;;  %v6951_v34 = vcombine.high %v546_v25, %v550_v27  ;;  %v6814_v44 = vcombine.low %v410_v31, %v414_v32  ;;  %v482_v25 = vld [vmem:[#allocation4 + $0x3d8] sm:$0xff] }
  0xda   :  { %2117 = vmatpush2.bf16.msra.mxu1 %v7012_v33  ;;  %v538_v33 = vld [vmem:[#allocation4 + $0x598] sm:$0xff] }
  0xdb   :  { %2118 = vmatprep.subr.bf16.mxu1 %v7005_v38  ;;  %v6815_v38 = vcombine.high %v410_v31, %v414_v32  ;;  %v6942_v45 = vcombine.low %v538_v33, %v542_v35  ;;  %v610_v27 = vld [vmem:[#allocation4 + $0x7d8] sm:$0xff] }
  0xdc   :  { %2078 = vmatpush2.bf16.msra.mxu0 %v6876_v40  ;;  %v6943_v40 = vcombine.high %v538_v33, %v542_v35  ;;  %v474_v33 = vld [vmem:[#allocation4 + $0x398] sm:$0xff] }
  0xdd   :  { %2079 = vmatprep.subr.bf16.mxu0 %v6869_v42  ;;  %v530_v42 = vld [vmem:[#allocation4 + $0x558] sm:$0xff] }
  0xde   :  { %2119 = vmatpush2.bf16.msra.mxu1 %v7004_v41  ;;  %v406_v41 = vld [vmem:[#allocation4 + $0x178] sm:$0xff]  ;;  %v6934_v53 = vcombine.low %v530_v42, %v534_v43 }
  0xdf   :  { %2120 = vmatprep.subr.bf16.mxu1 %v6997_v46  ;;  %v6807_v46 = vcombine.high %v402_v39, %v406_v41  ;;  %v6806_v52 = vcombine.low %v402_v39, %v406_v41  ;;  %v602_v35 = vld [vmem:[#allocation4 + $0x798] sm:$0xff] }
  0xe0   :  { %2080 = vmatpush2.bf16.msra.mxu0 %v6868_v48  ;;  %v398_v48 = vld [vmem:[#allocation4 + $0x138] sm:$0xff] }
  0xe1   :  { %2081 = vmatprep.subr.bf16.mxu0 %v6861_v50  ;;  %v6935_v50 = vcombine.high %v530_v42, %v534_v43  ;;  %v6798_v62 = vcombine.low %v394_v47, %v398_v48  ;;  %v466_v41 = vld [vmem:[#allocation4 + $0x358] sm:$0xff] }
  0xe2   :  { %2121 = vmatpush2.bf16.msra.mxu1 %v6996_v49  ;;  %v522_v49 = vld [vmem:[#allocation4 + $0x518] sm:$0xff] }
  0xe3   :  { %2122 = vmatprep.subr.bf16.mxu1 %v6989_v54  ;;  %v6799_v54 = vcombine.high %v394_v47, %v398_v48  ;;  %v6926_v63 = vcombine.low %v522_v49, %v526_v51  ;;  %v470_v42 = vld [vmem:[#allocation4 + $0x378] sm:$0xff] }
  0xe4   :  { %2082 = vmatpush2.bf16.msra.mxu0 %v6860_v56  ;;  %v390_v56 = vld [vmem:[#allocation4 + $0xf8] sm:$0xff]  ;;  %v6871_v48 = vcombine.high %v466_v41, %v470_v42 }
  0xe5   :  { %2083 = vmatprep.subr.bf16.mxu0 %v6853_v60  ;;  %v6927_v60 = vcombine.high %v522_v49, %v526_v51  ;;  %v594_v43 = vld [vmem:[#allocation4 + $0x758] sm:$0xff] }
  0xe6   :  { %2123 = vmatpush2.bf16.msra.mxu1 %v6988_v57  ;;  %v514_v57 = vld [vmem:[#allocation4 + $0x4d8] sm:$0xff] }
  0xe7   :  { %2124 = vmatprep.subr.bf16.mxu1 %v6981_v0  ;;  %v378_v0 = vld [vmem:[#allocation4 + $0x98] sm:$0xff]  ;;  %v6918_v5 = vcombine.low %v514_v57, %v518_v61 }
  0xe8   :  { %2084 = vmatpush2.bf16.msra.mxu0 %v6852_v2  ;;  %v6919_v2 = vcombine.high %v514_v57, %v518_v61  ;;  %v458_v49 = vld [vmem:[#allocation4 + $0x318] sm:$0xff] }
  0xe9   :  { %2085 = vmatprep.subr.bf16.mxu0 %v6845_v4  ;;  %v6790_v4 = vcombine.low %v386_v55, %v390_v56  ;;  %v586_v51 = vld [vmem:[#allocation4 + $0x718] sm:$0xff] }
  0xea   :  { %2125 = vmatpush2.bf16.msra.mxu1 %v6980_v3  ;;  %v510_v3 = vld [vmem:[#allocation4 + $0x4b8] sm:$0xff] }
  0xeb   :  { %2126 = vmatprep.subr.bf16.mxu1 %v6973_v8  ;;  %v374_v8 = vld [vmem:[#allocation4 + $0x78] sm:$0xff]  ;;  %v6910_v13 = vcombine.low %v506_v1, %v510_v3 }
  0xec   :  { %2086 = vmatpush2.bf16.msra.mxu0 %v6844_v10  ;;  %v6911_v10 = vcombine.high %v506_v1, %v510_v3  ;;  %v6775_v14 = vcombine.high %v370_v7, %v374_v8  ;;  %v450_v57 = vld [vmem:[#allocation4 + $0x2d8] sm:$0xff] }
  0xed   :  { %2087 = vmatprep.subr.bf16.mxu0 %v6837_v12  ;;  %v578_v61 = vld [vmem:[#allocation4 + $0x6d8] sm:$0xff] }
  0xee   :  { %2127 = vmatpush2.bf16.msra.mxu1 %v6972_v11  ;;  %v502_v11 = vld [vmem:[#allocation4 + $0x478] sm:$0xff] }
  0xef   :  { %2128 = vmatprep.subr.bf16.mxu1 %v6965_v17  ;;  %v366_v17 = vld [vmem:[#allocation4 + $0x38] sm:$0xff]  ;;  %v6902_v23 = vcombine.low %v498_v9, %v502_v11 }
  0xf0   :  { %2088 = vmatpush2.bf16.msra.mxu0 %v6836_v20  ;;  %v6903_v20 = vcombine.high %v498_v9, %v502_v11  ;;  %v6767_v24 = vcombine.high %v362_v15, %v366_v17  ;;  %v442_v1 = vld [vmem:[#allocation4 + $0x298] sm:$0xff] }
  0xf1   :  { %2089 = vmatprep.subr.bf16.mxu0 %v6829_v22  ;;  %v6774_v22 = vcombine.low %v370_v7, %v374_v8  ;;  %v570_v3 = vld [vmem:[#allocation4 + $0x698] sm:$0xff] }
  0xf2   :  { %2129 = vmatpush2.bf16.msra.mxu1 %v6964_v21  ;;  %v494_v21 = vld [vmem:[#allocation4 + $0x438] sm:$0xff] }
  0xf3   :  { %2130 = vmatprep.subr.bf16.mxu1 %v6957_v26  ;;  %v486_v26 = vld [vmem:[#allocation4 + $0x3f8] sm:$0xff]  ;;  %v6894_v31 = vcombine.low %v490_v18, %v494_v21 }
  0xf4   :  { %2090 = vmatpush2.bf16.msra.mxu0 %v6828_v28  ;;  %v6895_v28 = vcombine.high %v490_v18, %v494_v21  ;;  %v6887_v32 = vcombine.high %v482_v25, %v486_v26  ;;  %v434_v9 = vld [vmem:[#allocation4 + $0x258] sm:$0xff] }
  0xf5   :  { %2141 = vmatprep.subr.bf16.mxu0 %v6823_v30  ;;  %v6766_v30 = vcombine.low %v362_v15, %v366_v17  ;;  %v562_v11 = vld [vmem:[#allocation4 + $0x658] sm:$0xff] }
  0xf6   :  { %2131 = vmatpush2.bf16.msra.mxu1 %v6956_v29  ;;  %v614_v29 = vld [vmem:[#allocation4 + $0x7f8] sm:$0xff] }
  0xf7   :  { %2182 = vmatprep.subr.bf16.mxu1 %v6951_v34  ;;  %2092 = vmatmul.mubr.bf16.vlgmr.msra.gmra.mxu0 %v8414_v16  ;;  %v478_v34 = vld [vmem:[#allocation4 + $0x3b8] sm:$0xff]  ;;  %v7014_v39 = vcombine.low %v610_v27, %v614_v29 }
  0xf8   :  { %2142 = vmatpush1.bf16.msra.mxu0 %v6822_v36  ;;  %2173 = vmatprep.mubr.bf16.mxu0 %v8402_v58  ;;  %v6791_v58 = vcombine.high %v386_v55, %v390_v56  ;;  %v7015_v36 = vcombine.high %v610_v27, %v614_v29  ;;  %v426_v18 = vld [vmem:[#allocation4 + $0x218] sm:$0xff]  ;;  %v151_v27 = vld [vmem:[#allocation2 + $0x1c0] sm:$0xff] }
  0xf9   :  { %2133 = vmatmul.mubr.bf16.vlgmr.msra.gmra.mxu1 %v8416_v19  ;;  %2143 = vmatprep.subr.bf16.mxu0 %v6815_v38  ;;  %v6886_v38 = vcombine.low %v482_v25, %v486_v26  ;;  %v554_v21 = vld [vmem:[#allocation4 + $0x618] sm:$0xff]  ;;  %v279_v29 = vld [vmem:[#allocation2 + $0x5c0] sm:$0xff] }
  0xfa   :  { %2183 = vmatpush1.bf16.msra.mxu1 %v6950_v37  ;;  %2214 = vmatprep.mubr.bf16.mxu1 %v8404_v59  ;;  %v382_v59 = vld [vmem:[#allocation4 + $0xb8] sm:$0xff] }
  0xfb   :  { %2184 = vmatprep.subr.bf16.mxu1 %v6943_v40  ;;  %v6783_v6 = vcombine.high %v378_v0, %v382_v59  ;;  %v6782_v12 = vcombine.low %v378_v0, %v382_v59  ;;  %v606_v37 = vld [vmem:[#allocation4 + $0x7b8] sm:$0xff]  ;;  %v6879_v40 = vcombine.high %v474_v33, %v478_v34 }
  0xfc   :  { %2144 = vmatpush1.bf16.msra.mxu0 %v6814_v44  ;;  %v7007_v44 = vcombine.high %v602_v35, %v606_v37  ;;  %v7006_v47 = vcombine.low %v602_v35, %v606_v37  ;;  %v271_v37 = vld [vmem:[#allocation2 + $0x580] sm:$0xff] }
  0xfd   :  { %2145 = vmatprep.subr.bf16.mxu0 %v6807_v46  ;;  %v6878_v46 = vcombine.low %v474_v33, %v478_v34  ;;  %v143_v33 = vld [vmem:[#allocation2 + $0x180] sm:$0xff] }
  0xfe   :  { %2185 = vmatpush1.bf16.msra.mxu1 %v6942_v45  ;;  %v598_v45 = vld [vmem:[#allocation4 + $0x778] sm:$0xff]  ;;  %v147_v34 = vld [vmem:[#allocation2 + $0x1a0] sm:$0xff] }
  0xff   :  { %2186 = vmatprep.subr.bf16.mxu1 %v6935_v50  ;;  %v462_v50 = vld [vmem:[#allocation4 + $0x338] sm:$0xff]  ;;  %v6998_v55 = vcombine.low %v594_v43, %v598_v45 }
 0x100   :  { %2146 = vmatpush1.bf16.msra.mxu0 %v6806_v52  ;;  %v6999_v52 = vcombine.high %v594_v43, %v598_v45  ;;  %v6863_v56 = vcombine.high %v458_v49, %v462_v50  ;;  %v135_v45 = vld [vmem:[#allocation2 + $0x140] sm:$0xff] }
 0x101   :  { %2147 = vmatprep.subr.bf16.mxu0 %v6799_v54  ;;  %v6870_v54 = vcombine.low %v466_v41, %v470_v42  ;;  %v90_v41 = vld [vmem:[%s8620_s0 + $0x18] sm:$0xff] }
 0x102   :  { %2187 = vmatpush1.bf16.msra.mxu1 %v6934_v53  ;;  %v590_v53 = vld [vmem:[#allocation4 + $0x738] sm:$0xff] }
 0x103   :  { %2188 = vmatprep.subr.bf16.mxu1 %v6927_v60  ;;  %v454_v60 = vld [vmem:[#allocation4 + $0x2f8] sm:$0xff]  ;;  %v6990_v0 = vcombine.low %v586_v51, %v590_v53 }
 0x104   :  { %2148 = vmatpush1.bf16.msra.mxu0 %v6798_v62  ;;  %v6991_v62 = vcombine.high %v586_v51, %v590_v53  ;;  %v6855_v59 = vcombine.high %v450_v57, %v454_v60 }
 0x105   :  { %2149 = vmatprep.subr.bf16.mxu0 %v6791_v58  ;;  %v6862_v58 = vcombine.low %v458_v49, %v462_v50  ;;  %v267_v49 = vld [vmem:[#allocation2 + $0x560] sm:$0xff] }
 0x106   :  { %2189 = vmatpush1.bf16.msra.mxu1 %v6926_v63  ;;  %v582_v63 = vld [vmem:[#allocation4 + $0x6f8] sm:$0xff] }
 0x107   :  { %2190 = vmatprep.subr.bf16.mxu1 %v6919_v2  ;;  %v446_v2 = vld [vmem:[#allocation4 + $0x2b8] sm:$0xff]  ;;  %v6982_v7 = vcombine.low %v578_v61, %v582_v63 }
 0x108   :  { %2150 = vmatpush1.bf16.msra.mxu0 %v6790_v4  ;;  %v6983_v4 = vcombine.high %v578_v61, %v582_v63  ;;  %v6847_v8 = vcombine.high %v442_v1, %v446_v2  ;;  %v127_v63 = vld [vmem:[#allocation2 + $0x100] sm:$0xff] }
 0x109   :  { %2151 = vmatprep.subr.bf16.mxu0 %v6783_v6  ;;  %v6854_v6 = vcombine.low %v450_v57, %v454_v60 }
 0x10a   :  { %2191 = vmatpush1.bf16.msra.mxu1 %v6918_v5  ;;  %v574_v5 = vld [vmem:[#allocation4 + $0x6b8] sm:$0xff] }
 0x10b   :  { %2192 = vmatprep.subr.bf16.mxu1 %v6911_v10  ;;  %v438_v10 = vld [vmem:[#allocation4 + $0x278] sm:$0xff]  ;;  %v6974_v15 = vcombine.low %v570_v3, %v574_v5 }
 0x10c   :  { %2152 = vmatpush1.bf16.msra.mxu0 %v6782_v12  ;;  %v6975_v12 = vcombine.high %v570_v3, %v574_v5  ;;  %v6839_v17 = vcombine.high %v434_v9, %v438_v10 }
 0x10d   :  { %2153 = vmatprep.subr.bf16.mxu0 %v6775_v14  ;;  %v6846_v14 = vcombine.low %v442_v1, %v446_v2 }
 0x10e   :  { %2193 = vmatpush1.bf16.msra.mxu1 %v6910_v13  ;;  %v566_v13 = vld [vmem:[#allocation4 + $0x678] sm:$0xff] }
 0x10f   :  { %2194 = vmatprep.subr.bf16.mxu1 %v6903_v20  ;;  %v430_v20 = vld [vmem:[#allocation4 + $0x238] sm:$0xff]  ;;  %v6966_v25 = vcombine.low %v562_v11, %v566_v13 }
 0x110   :  { %2154 = vmatpush1.bf16.msra.mxu0 %v6774_v22  ;;  %v6967_v22 = vcombine.high %v562_v11, %v566_v13  ;;  %v6831_v26 = vcombine.high %v426_v18, %v430_v20  ;;  %v251_v11 = vld [vmem:[#allocation2 + $0x4e0] sm:$0xff] }
 0x111   :  { %2155 = vmatprep.subr.bf16.mxu0 %v6767_v24  ;;  %v6838_v24 = vcombine.low %v434_v9, %v438_v10  ;;  %v123_v9 = vld [vmem:[#allocation2 + $0xe0] sm:$0xff] }
 0x112   :  { %2195 = vmatpush1.bf16.msra.mxu1 %v6902_v23  ;;  %v558_v23 = vld [vmem:[#allocation4 + $0x638] sm:$0xff]  ;;  %v247_v10 = vld [vmem:[#allocation2 + $0x4c0] sm:$0xff] }
 0x113   :  { %2196 = vmatprep.subr.bf16.mxu1 %v6895_v28  ;;  %v155_v28 = vld [vmem:[#allocation2 + $0x1e0] sm:$0xff]  ;;  %v6958_v35 = vcombine.low %v554_v21, %v558_v23 }
 0x114   :  { %2156 = vmatpush1.bf16.msra.mxu0 %v6766_v30  ;;  %v6959_v30 = vcombine.high %v554_v21, %v558_v23  ;;  %v7072_v42 = vcombine.low %v151_v27, %v155_v28  ;;  %v243_v21 = vld [vmem:[#allocation2 + $0x4a0] sm:$0xff]  ;;  %v7168_v23 = vcombine.low %v247_v10, %v251_v11 }
 0x115   :  { %2157 = vmatprep.subr.bf16.mxu0 %v6887_v32  ;;  %v6830_v32 = vcombine.low %v426_v18, %v430_v20  ;;  %v115_v18 = vld [vmem:[#allocation2 + $0xa0] sm:$0xff] }
 0x116   :  { %2197 = vmatpush1.bf16.msra.mxu1 %v6894_v31  ;;  %v283_v31 = vld [vmem:[#allocation2 + $0x5e0] sm:$0xff] }
 0x117   :  { %2198 = vmatprep.subr.bf16.mxu1 %v7015_v36  ;;  %v7073_v36 = vcombine.high %v151_v27, %v155_v28  ;;  %v7200_v43 = vcombine.low %v279_v29, %v283_v31  ;;  %v239_v20 = vld [vmem:[#allocation2 + $0x480] sm:$0xff] }
 0x118   :  { %2158 = vmatpush2.bf16.msra.mxu0 %v6886_v38  ;;  %v275_v38 = vld [vmem:[#allocation2 + $0x5a0] sm:$0xff] }
 0x119   :  { %2159 = vmatprep.subr.bf16.mxu0 %v6879_v40  ;;  %v7201_v40 = vcombine.high %v279_v29, %v283_v31  ;;  %v7192_v57 = vcombine.low %v271_v37, %v275_v38  ;;  %v107_v27 = vld [vmem:[#allocation2 + $0x60] sm:$0xff]  ;;  %v7160_v31 = vcombine.low %v239_v20, %v243_v21 }
 0x11a   :  { %2199 = vmatpush2.bf16.msra.mxu1 %v7014_v39  ;;  %v88_v39 = vld [vmem:[%s8620_s0 + $0x8] sm:$0xff]  ;;  %v231_v28 = vld [vmem:[#allocation2 + $0x440] sm:$0xff] }
 0x11b   :  { %2200 = vmatprep.subr.bf16.mxu1 %v7007_v44  ;;  %v7065_v44 = vcombine.high %v143_v33, %v147_v34  ;;  %v8436_v50 = vpack.c.bf16 %v88_v39, %v88_v39  ;;  %v235_v29 = vld [vmem:[#allocation2 + $0x460] sm:$0xff] }
 0x11c   :  { %2160 = vmatpush2.bf16.msra.mxu0 %v6878_v46  ;;  %v139_v46 = vld [vmem:[#allocation2 + $0x160] sm:$0xff]  ;;  %v7152_v39 = vcombine.low %v231_v28, %v235_v29 }
 0x11d   :  { %2161 = vmatprep.subr.bf16.mxu0 %v6871_v48  ;;  %v7193_v48 = vcombine.high %v271_v37, %v275_v38  ;;  %v7057_v60 = vcombine.high %v135_v45, %v139_v46  ;;  %v7056_v2 = vcombine.low %v135_v45, %v139_v46  ;;  %v227_v37 = vld [vmem:[#allocation2 + $0x420] sm:$0xff] }
 0x11e   :  { %2201 = vmatpush2.bf16.msra.mxu1 %v7006_v47  ;;  %v263_v47 = vld [vmem:[#allocation2 + $0x540] sm:$0xff] }
 0x11f   :  { %2202 = vmatprep.subr.bf16.mxu1 %v6999_v52  ;;  %v8439_v52 = vpack.c.bf16 %v90_v41, %v90_v41  ;;  %v347_v45 = vld [vmem:[#allocation2 + $0x7e0] sm:$0xff] }
 0x120   :  { %2162 = vmatpush2.bf16.msra.mxu0 %v6870_v54  ;;  %v7064_v54 = vcombine.low %v143_v33, %v147_v34  ;;  %v7153_v33 = vcombine.high %v231_v28, %v235_v29  ;;  %v95_v34 = vld [vmem:[#allocation2] sm:$0xff] }
 0x121   :  { %2163 = vmatprep.subr.bf16.mxu0 %v6863_v56 }
 0x122   :  { %2203 = vmatpush2.bf16.msra.mxu1 %v6998_v55 }
 0x123   :  { %2204 = vmatprep.subr.bf16.mxu1 %v6991_v62  ;;  %v7185_v62 = vcombine.high %v263_v47, %v267_v49 }
 0x124   :  { %2164 = vmatpush2.bf16.msra.mxu0 %v6862_v58  ;;  %v131_v58 = vld [vmem:[#allocation2 + $0x120] sm:$0xff] }
 0x125   :  { %2165 = vmatprep.subr.bf16.mxu0 %v6855_v59  ;;  %v259_v59 = vld [vmem:[#allocation2 + $0x520] sm:$0xff]  ;;  %v7049_v5 = vcombine.high %v127_v63, %v131_v58 }
 0x126   :  { %2205 = vmatpush2.bf16.msra.mxu1 %v6990_v0 }
 0x127   :  { %2206 = vmatprep.subr.bf16.mxu1 %v6983_v4  ;;  %v7184_v4 = vcombine.low %v263_v47, %v267_v49 }
 0x128   :  { %2166 = vmatpush2.bf16.msra.mxu0 %v6854_v6 }
 0x129   :  { %2167 = vmatprep.subr.bf16.mxu0 %v6847_v8  ;;  %v119_v8 = vld [vmem:[#allocation2 + $0xc0] sm:$0xff] }
 0x12a   :  { %2207 = vmatpush2.bf16.msra.mxu1 %v6982_v7 }
 0x12b   :  { %2208 = vmatprep.subr.bf16.mxu1 %v6975_v12  ;;  %v7048_v12 = vcombine.low %v127_v63, %v131_v58  ;;  %v199_v63 = vld [vmem:[#allocation2 + $0x340] sm:$0xff] }
 0x12c   :  { %2168 = vmatpush2.bf16.msra.mxu0 %v6846_v14  ;;  %v7041_v14 = vcombine.high %v119_v8, %v123_v9  ;;  %v203_v58 = vld [vmem:[#allocation2 + $0x360] sm:$0xff] }
 0x12d   :  { %2169 = vmatprep.subr.bf16.mxu0 %v6839_v17  ;;  %v111_v17 = vld [vmem:[#allocation2 + $0x80] sm:$0xff] }
 0x12e   :  { %2209 = vmatpush2.bf16.msra.mxu1 %v6974_v15  ;;  %v7169_v15 = vcombine.high %v247_v10, %v251_v11 }
 0x12f   :  { %2210 = vmatprep.subr.bf16.mxu1 %v6967_v22  ;;  %v7040_v22 = vcombine.low %v119_v8, %v123_v9  ;;  %v7120_v8 = vcombine.low %v199_v63, %v203_v58 }
 0x130   :  { %2170 = vmatpush2.bf16.msra.mxu0 %v6838_v24  ;;  %v7033_v24 = vcombine.high %v111_v17, %v115_v18 }
 0x131   :  { %2171 = vmatprep.subr.bf16.mxu0 %v6831_v26  ;;  %v103_v26 = vld [vmem:[#allocation2 + $0x40] sm:$0xff] }
 0x132   :  { %2211 = vmatpush2.bf16.msra.mxu1 %v6966_v25  ;;  %v7161_v25 = vcombine.high %v239_v20, %v243_v21  ;;  %v7024_v38 = vcombine.low %v103_v26, %v107_v27 }
 0x133   :  { %2212 = vmatprep.subr.bf16.mxu1 %v6959_v30  ;;  %v7032_v30 = vcombine.low %v111_v17, %v115_v18 }
 0x134   :  { %2172 = vmatpush2.bf16.msra.mxu0 %v6830_v32  ;;  %v7025_v32 = vcombine.high %v103_v26, %v107_v27 }
 0x135   :  { %3503 = vmatprep.subr.bf16.mxu0 %v7073_v36  ;;  %v223_v36 = vld [vmem:[#allocation2 + $0x400] sm:$0xff] }
 0x136   :  { %2213 = vmatpush2.bf16.msra.mxu1 %v6958_v35  ;;  %v99_v35 = vld [vmem:[#allocation2 + $0x20] sm:$0xff]  ;;  %v7145_v41 = vcombine.high %v223_v36, %v227_v37  ;;  %v7144_v47 = vcombine.low %v223_v36, %v227_v37 }
 0x137   :  { %3544 = vmatprep.subr.bf16.mxu1 %v7201_v40  ;;  %v1929_v51 = vpop.f32.mrf.mxu0  ;;  %2174 = vmatmul.mubr.bf16.vlgmr.msra.gmra.mxu0 %v8414_v16  ;;  %v7017_v40 = vcombine.high %v95_v34, %v99_v35  ;;  %v7016_v46 = vcombine.low %v95_v34, %v99_v35 }
 0x138   :  { %3504 = vmatpush1.bf16.msra.mxu0 %v7072_v42  ;;  %3535 = vmatprep.mubr.bf16.mxu0 %v8436_v50  ;;  %v215_v42 = vld [vmem:[#allocation2 + $0x3c0] sm:$0xff] }
 0x139   :  { %v1970_v53 = vpop.f32.mrf.mxu1  ;;  %2215 = vmatmul.mubr.bf16.vlgmr.msra.gmra.mxu1 %v8416_v19  ;;  %v1931_v56 = vpop.f32.mrf.mxu0  ;;  %3505 = vmatprep.subr.bf16.mxu0 %v7065_v44  ;;  %v255_v19 = vld [vmem:[#allocation2 + $0x500] sm:$0xff] }
 0x13a   :  { %v8442_v55 = vadd.f32 %v1970_v53, %v1929_v51  ;;  %3545 = vmatpush1.bf16.msra.mxu1 %v7200_v43  ;;  %3576 = vmatprep.mubr.bf16.mxu1 %v8439_v52  ;;  %v7177_v7 = vcombine.high %v255_v19, %v259_v59  ;;  %v7176_v13 = vcombine.low %v255_v19, %v259_v59  ;;  %v219_v43 = vld [vmem:[#allocation2 + $0x3e0] sm:$0xff] }
 0x13b   :  { %v1972_v61 = vpop.f32.mrf.mxu1  ;;  %3546 = vmatprep.subr.bf16.mxu1 %v7193_v48  ;;  %v1933_v0 = vpop.f32.mrf.mxu0  ;;  %v343_v44 = vld [vmem:[#allocation2 + $0x7c0] sm:$0xff]  ;;  %v7137_v48 = vcombine.high %v215_v42, %v219_v43 }
 0x13c   :  { %v8445_v16 = vadd.f32 %v1972_v61, %v1931_v56  ;;  %3506 = vmatpush1.bf16.msra.mxu0 %v7064_v54  ;;  %v7265_v49 = vcombine.high %v343_v44, %v347_v45  ;;  %v207_v51 = vld [vmem:[#allocation2 + $0x380] sm:$0xff] }
 0x13d   :  { %v1974_v1 = vpop.f32.mrf.mxu1  ;;  %v1934_v3 = vpop.f32.mrf.mxu0  ;;  %3507 = vmatprep.subr.bf16.mxu0 %v7057_v60  ;;  %v211_v53 = vld [vmem:[#allocation2 + $0x3a0] sm:$0xff]  ;;  %v7264_v60 = vcombine.low %v343_v44, %v347_v45 }
 0x13e   :  { %3547 = vmatpush1.bf16.msra.mxu1 %v7192_v57  ;;  %v335_v54 = vld [vmem:[#allocation2 + $0x780] sm:$0xff]  ;;  %v7136_v57 = vcombine.low %v215_v42, %v219_v43  ;;  %v7129_v61 = vcombine.high %v207_v51, %v211_v53  ;;  %v7128_v59 = vcombine.low %v207_v51, %v211_v53 }
 0x13f   :  { %v1975_v6 = vpop.f32.mrf.mxu1  ;;  %3548 = vmatprep.subr.bf16.mxu1 %v7185_v62  ;;  %v339_v56 = vld [vmem:[#allocation2 + $0x7a0] sm:$0xff] }
 0x140   :  { %3508 = vmatpush1.bf16.msra.mxu0 %v7056_v2  ;;  %v7257_v62 = vcombine.high %v335_v54, %v339_v56  ;;  %v327_v0 = vld [vmem:[#allocation2 + $0x740] sm:$0xff]  ;;  %v7256_v1 = vcombine.low %v335_v54, %v339_v56  ;;  %v7121_v2 = vcombine.high %v199_v63, %v203_v58  ;;  %v89_v56 = vld [vmem:[%s8620_s0 + $0x10] sm:$0xff]  ;;  %v272_v58 = vld [vmem:[#allocation2 + $0x588] sm:$0xff] }
 0x141   :  { %3509 = vmatprep.subr.bf16.mxu0 %v7049_v5  ;;  %v331_v19 = vld [vmem:[#allocation2 + $0x760] sm:$0xff] }
 0x142   :  { %3549 = vmatpush1.bf16.msra.mxu1 %v7184_v4  ;;  %v7249_v3 = vcombine.high %v327_v0, %v331_v19  ;;  %v191_v4 = vld [vmem:[#allocation2 + $0x300] sm:$0xff]  ;;  %v7248_v9 = vcombine.low %v327_v0, %v331_v19  ;;  %v276_v0 = vld [vmem:[#allocation2 + $0x5a8] sm:$0xff]  ;;  %v8456_v19 = vpack.c.bf16 %v89_v56, %v89_v56 }
 0x143   :  { %3550 = vmatprep.subr.bf16.mxu1 %v7177_v7  ;;  %v195_v5 = vld [vmem:[#allocation2 + $0x320] sm:$0xff] }
 0x144   :  { %3510 = vmatpush1.bf16.msra.mxu0 %v7048_v12  ;;  %v319_v6 = vld [vmem:[#allocation2 + $0x700] sm:$0xff]  ;;  %v7113_v10 = vcombine.high %v191_v4, %v195_v5  ;;  %v7112_v17 = vcombine.low %v191_v4, %v195_v5  ;;  %v136_v4 = vld [vmem:[#allocation2 + $0x148] sm:$0xff] }
 0x145   :  { %3511 = vmatprep.subr.bf16.mxu0 %v7041_v14  ;;  %v323_v7 = vld [vmem:[#allocation2 + $0x720] sm:$0xff]  ;;  %v140_v5 = vld [vmem:[#allocation2 + $0x168] sm:$0xff] }
 0x146   :  { %3551 = vmatpush1.bf16.msra.mxu1 %v7176_v13  ;;  %v7241_v11 = vcombine.high %v319_v6, %v323_v7  ;;  %v183_v12 = vld [vmem:[#allocation2 + $0x2c0] sm:$0xff]  ;;  %v7240_v18 = vcombine.low %v319_v6, %v323_v7  ;;  %v264_v7 = vld [vmem:[#allocation2 + $0x548] sm:$0xff] }
 0x147   :  { %3552 = vmatprep.subr.bf16.mxu1 %v7169_v15  ;;  %v187_v13 = vld [vmem:[#allocation2 + $0x2e0] sm:$0xff] }
 0x148   :  { %3512 = vmatpush1.bf16.msra.mxu0 %v7040_v22  ;;  %v311_v14 = vld [vmem:[#allocation2 + $0x6c0] sm:$0xff]  ;;  %v7105_v20 = vcombine.high %v183_v12, %v187_v13  ;;  %v7104_v26 = vcombine.low %v183_v12, %v187_v13  ;;  %v7194_v13 = vcombine.low %v272_v58, %v276_v0 }
 0x149   :  { %3513 = vmatprep.subr.bf16.mxu0 %v7033_v24  ;;  %v315_v15 = vld [vmem:[#allocation2 + $0x6e0] sm:$0xff] }
 0x14a   :  { %3553 = vmatpush1.bf16.msra.mxu1 %v7168_v23  ;;  %v7233_v21 = vcombine.high %v311_v14, %v315_v15  ;;  %v175_v22 = vld [vmem:[#allocation2 + $0x280] sm:$0xff]  ;;  %v7232_v27 = vcombine.low %v311_v14, %v315_v15  ;;  %v7059_v14 = vcombine.high %v136_v4, %v140_v5 }
 0x14b   :  { %3554 = vmatprep.subr.bf16.mxu1 %v7161_v25  ;;  %v179_v23 = vld [vmem:[#allocation2 + $0x2a0] sm:$0xff] }
 0x14c   :  { %3514 = vmatpush1.bf16.msra.mxu0 %v7032_v30  ;;  %v303_v24 = vld [vmem:[#allocation2 + $0x680] sm:$0xff]  ;;  %v7097_v28 = vcombine.high %v175_v22, %v179_v23  ;;  %v7096_v34 = vcombine.low %v175_v22, %v179_v23  ;;  %v256_v23 = vld [vmem:[#allocation2 + $0x508] sm:$0xff] }
 0x14d   :  { %3515 = vmatprep.subr.bf16.mxu0 %v7025_v32  ;;  %v307_v25 = vld [vmem:[#allocation2 + $0x6a0] sm:$0xff] }
 0x14e   :  { %3555 = vmatpush1.bf16.msra.mxu1 %v7160_v31  ;;  %v7225_v29 = vcombine.high %v303_v24, %v307_v25  ;;  %v167_v30 = vld [vmem:[#allocation2 + $0x240] sm:$0xff]  ;;  %v7224_v35 = vcombine.low %v303_v24, %v307_v25  ;;  %v260_v24 = vld [vmem:[#allocation2 + $0x528] sm:$0xff] }
 0x14f   :  { %3556 = vmatprep.subr.bf16.mxu1 %v7153_v33  ;;  %v171_v31 = vld [vmem:[#allocation2 + $0x260] sm:$0xff] }
 0x150   :  { %3516 = vmatpush1.bf16.msra.mxu0 %v7024_v38  ;;  %v295_v32 = vld [vmem:[#allocation2 + $0x640] sm:$0xff]  ;;  %v7089_v36 = vcombine.high %v167_v30, %v171_v31  ;;  %v7088_v42 = vcombine.low %v167_v30, %v171_v31  ;;  %v7179_v31 = vcombine.high %v256_v23, %v260_v24 }
 0x151   :  { %3517 = vmatprep.subr.bf16.mxu0 %v7017_v40  ;;  %v299_v33 = vld [vmem:[#allocation2 + $0x660] sm:$0xff] }
 0x152   :  { %3557 = vmatpush1.bf16.msra.mxu1 %v7152_v39  ;;  %v7217_v37 = vcombine.high %v295_v32, %v299_v33  ;;  %v159_v38 = vld [vmem:[#allocation2 + $0x200] sm:$0xff]  ;;  %v7216_v43 = vcombine.low %v295_v32, %v299_v33  ;;  %v120_v32 = vld [vmem:[#allocation2 + $0xc8] sm:$0xff] }
 0x153   :  { %3558 = vmatprep.subr.bf16.mxu1 %v7145_v41  ;;  %v163_v39 = vld [vmem:[#allocation2 + $0x220] sm:$0xff]  ;;  %v124_v33 = vld [vmem:[#allocation2 + $0xe8] sm:$0xff] }
 0x154   :  { %3518 = vmatpush1.bf16.msra.mxu0 %v7016_v46  ;;  %v287_v40 = vld [vmem:[#allocation2 + $0x600] sm:$0xff]  ;;  %v7081_v44 = vcombine.high %v159_v38, %v163_v39  ;;  %v152_v46 = vld [vmem:[#allocation2 + $0x1c8] sm:$0xff]  ;;  %v7080_v51 = vcombine.low %v159_v38, %v163_v39  ;;  %v7043_v38 = vcombine.high %v120_v32, %v124_v33 }
 0x155   :  { %3519 = vmatprep.subr.bf16.mxu0 %v7137_v48  ;;  %v291_v41 = vld [vmem:[#allocation2 + $0x620] sm:$0xff]  ;;  %v280_v48 = vld [vmem:[#allocation2 + $0x5c8] sm:$0xff] }
 0x156   :  { %3559 = vmatpush1.bf16.msra.mxu1 %v7144_v47  ;;  %v7209_v45 = vcombine.high %v287_v40, %v291_v41  ;;  %v156_v47 = vld [vmem:[#allocation2 + $0x1e8] sm:$0xff]  ;;  %v87_v53 = vld [vmem:[%s8620_s0] sm:$0xff]  ;;  %v7208_v54 = vcombine.low %v287_v40, %v291_v41 }
 0x157   :  { %3560 = vmatprep.subr.bf16.mxu1 %v7265_v49  ;;  %v284_v49 = vld [vmem:[#allocation2 + $0x5e8] sm:$0xff]  ;;  %v8454_v63 = vpack.c.bf16 %v87_v53, %v87_v53 }
 0x158   :  { %3520 = vmatpush2.bf16.msra.mxu0 %v7136_v57  ;;  %v7075_v57 = vcombine.high %v152_v46, %v156_v47  ;;  %v112_v40 = vld [vmem:[#allocation2 + $0x88] sm:$0xff] }
 0x159   :  { %3521 = vmatprep.subr.bf16.mxu0 %v7129_v61  ;;  %v144_v61 = vld [vmem:[#allocation2 + $0x188] sm:$0xff] }
 0x15a   :  { %3561 = vmatpush2.bf16.msra.mxu1 %v7264_v60  ;;  %v7203_v60 = vcombine.high %v280_v48, %v284_v49  ;;  %v116_v41 = vld [vmem:[#allocation2 + $0xa8] sm:$0xff] }
 0x15b   :  { %3562 = vmatprep.subr.bf16.mxu1 %v7257_v62  ;;  %v148_v62 = vld [vmem:[#allocation2 + $0x1a8] sm:$0xff] }
 0x15c   :  { %3522 = vmatpush2.bf16.msra.mxu0 %v7128_v59  ;;  %v7074_v59 = vcombine.low %v152_v46, %v156_v47  ;;  %v7035_v46 = vcombine.high %v112_v40, %v116_v41  ;;  %v236_v53 = vld [vmem:[#allocation2 + $0x468] sm:$0xff] }
 0x15d   :  { %3523 = vmatprep.subr.bf16.mxu0 %v7121_v2  ;;  %v7067_v2 = vcombine.high %v144_v61, %v148_v62 }
 0x15e   :  { %3563 = vmatpush2.bf16.msra.mxu1 %v7256_v1  ;;  %v7202_v1 = vcombine.low %v280_v48, %v284_v49  ;;  %v104_v48 = vld [vmem:[#allocation2 + $0x48] sm:$0xff] }
 0x15f   :  { %3564 = vmatprep.subr.bf16.mxu1 %v7249_v3  ;;  %v7195_v3 = vcombine.high %v272_v58, %v276_v0  ;;  %v108_v49 = vld [vmem:[#allocation2 + $0x68] sm:$0xff] }
 0x160   :  { %3524 = vmatpush2.bf16.msra.mxu0 %v7120_v8  ;;  %v268_v8 = vld [vmem:[#allocation2 + $0x568] sm:$0xff] }
 0x161   :  { %3525 = vmatprep.subr.bf16.mxu0 %v7113_v10  ;;  %v7066_v10 = vcombine.low %v144_v61, %v148_v62  ;;  %v96_v61 = vld [vmem:[#allocation2 + $0x8] sm:$0xff] }
 0x162   :  { %3565 = vmatpush2.bf16.msra.mxu1 %v7248_v9  ;;  %v100_v62 = vld [vmem:[#allocation2 + $0x28] sm:$0xff] }
 0x163   :  { %3566 = vmatprep.subr.bf16.mxu1 %v7241_v11  ;;  %v224_v58 = vld [vmem:[#allocation2 + $0x408] sm:$0xff] }
 0x164   :  { %3526 = vmatpush2.bf16.msra.mxu0 %v7112_v17  ;;  %v7187_v17 = vcombine.high %v264_v7, %v268_v8  ;;  %v228_v0 = vld [vmem:[#allocation2 + $0x428] sm:$0xff] }
 0x165   :  { %3527 = vmatprep.subr.bf16.mxu0 %v7105_v20  ;;  %v132_v20 = vld [vmem:[#allocation2 + $0x128] sm:$0xff] }
 0x166   :  { %3567 = vmatpush2.bf16.msra.mxu1 %v7240_v18  ;;  %v128_v18 = vld [vmem:[#allocation2 + $0x108] sm:$0xff] }
 0x167   :  { %3568 = vmatprep.subr.bf16.mxu1 %v7233_v21 }
 0x168   :  { %3528 = vmatpush2.bf16.msra.mxu0 %v7104_v26  ;;  %v7058_v26 = vcombine.low %v136_v4, %v140_v5  ;;  %v216_v4 = vld [vmem:[#allocation2 + $0x3c8] sm:$0xff] }
 0x169   :  { %3529 = vmatprep.subr.bf16.mxu0 %v7097_v28  ;;  %v7186_v28 = vcombine.low %v264_v7, %v268_v8  ;;  %v220_v5 = vld [vmem:[#allocation2 + $0x3e8] sm:$0xff]  ;;  %v7018_v8 = vcombine.low %v96_v61, %v100_v62 }
 0x16a   :  { %3569 = vmatpush2.bf16.msra.mxu1 %v7232_v27  ;;  %v348_v7 = vld [vmem:[#allocation2 + $0x7e8] sm:$0xff] }
 0x16b   :  { %3570 = vmatprep.subr.bf16.mxu1 %v7225_v29  ;;  %v7051_v29 = vcombine.high %v128_v18, %v132_v20 }
 0x16c   :  { %3530 = vmatpush2.bf16.msra.mxu0 %v7096_v34  ;;  %v248_v34 = vld [vmem:[#allocation2 + $0x4c8] sm:$0xff] }
 0x16d   :  { %3531 = vmatprep.subr.bf16.mxu0 %v7089_v36  ;;  %v7050_v36 = vcombine.low %v128_v18, %v132_v20  ;;  %v7138_v18 = vcombine.low %v216_v4, %v220_v5 }
 0x16e   :  { %3571 = vmatpush2.bf16.msra.mxu1 %v7224_v35  ;;  %v252_v35 = vld [vmem:[#allocation2 + $0x4e8] sm:$0xff] }
 0x16f   :  { %3572 = vmatprep.subr.bf16.mxu1 %v7217_v37  ;;  %v7178_v37 = vcombine.low %v256_v23, %v260_v24  ;;  %v7171_v39 = vcombine.high %v248_v34, %v252_v35  ;;  %v200_v24 = vld [vmem:[#allocation2 + $0x348] sm:$0xff] }
 0x170   :  { %3532 = vmatpush2.bf16.msra.mxu0 %v7088_v42  ;;  %v240_v42 = vld [vmem:[#allocation2 + $0x488] sm:$0xff] }
 0x171   :  { %3533 = vmatprep.subr.bf16.mxu0 %v7081_v44  ;;  %v7042_v44 = vcombine.low %v120_v32, %v124_v33  ;;  %v192_v32 = vld [vmem:[#allocation2 + $0x308] sm:$0xff] }
 0x172   :  { %3573 = vmatpush2.bf16.msra.mxu1 %v7216_v43  ;;  %v244_v43 = vld [vmem:[#allocation2 + $0x4a8] sm:$0xff] }
 0x173   :  { %3574 = vmatprep.subr.bf16.mxu1 %v7209_v45  ;;  %v7170_v45 = vcombine.low %v248_v34, %v252_v35  ;;  %v7163_v47 = vcombine.high %v240_v42, %v244_v43  ;;  %v7162_v56 = vcombine.low %v240_v42, %v244_v43  ;;  %v196_v33 = vld [vmem:[#allocation2 + $0x328] sm:$0xff] }
 0x174   :  { %3534 = vmatpush2.bf16.msra.mxu0 %v7080_v51  ;;  %v232_v51 = vld [vmem:[#allocation2 + $0x448] sm:$0xff] }
 0x175   :  { %3585 = vmatprep.subr.bf16.mxu0 %v7075_v57  ;;  %v7027_v57 = vcombine.high %v104_v48, %v108_v49  ;;  %v320_v34 = vld [vmem:[#allocation2 + $0x708] sm:$0xff] }
 0x176   :  { %3575 = vmatpush2.bf16.msra.mxu1 %v7208_v54  ;;  %v7034_v54 = vcombine.low %v112_v40, %v116_v41  ;;  %v324_v35 = vld [vmem:[#allocation2 + $0x728] sm:$0xff] }
 0x177   :  { %3626 = vmatprep.subr.bf16.mxu1 %v7203_v60  ;;  %v2011_v6 = vpop.f32.mrf.mxu0  ;;  %3536 = vmatmul.mubr.bf16.vlgmr.msra.gmra.mxu0 %v8454_v63  ;;  %v7155_v60 = vcombine.high %v232_v51, %v236_v53  ;;  %v184_v40 = vld [vmem:[#allocation2 + $0x2c8] sm:$0xff] }
 0x178   :  { %3586 = vmatpush1.bf16.msra.mxu0 %v7074_v59  ;;  %3617 = vmatprep.mubr.bf16.mxu0 %v8436_v50  ;;  %v7026_v59 = vcombine.low %v104_v48, %v108_v49  ;;  %v188_v41 = vld [vmem:[#allocation2 + $0x2e8] sm:$0xff] }
 0x179   :  { %v2052_v9 = vpop.f32.mrf.mxu1  ;;  %3577 = vmatmul.mubr.bf16.vlgmr.msra.gmra.mxu1 %v8456_v19  ;;  %v2013_v12 = vpop.f32.mrf.mxu0  ;;  %3587 = vmatprep.subr.bf16.mxu0 %v7067_v2  ;;  %v7019_v2 = vcombine.high %v96_v61, %v100_v62  ;;  %v312_v42 = vld [vmem:[#allocation2 + $0x6c8] sm:$0xff] }
 0x17a   :  { %v8460_v11 = vadd.f32 %v2052_v9, %v2011_v6  ;;  %3627 = vmatpush1.bf16.msra.mxu1 %v7202_v1  ;;  %3658 = vmatprep.mubr.bf16.mxu1 %v8439_v52  ;;  %v7154_v1 = vcombine.low %v232_v51, %v236_v53  ;;  %v344_v6 = vld [vmem:[#allocation2 + $0x7c8] sm:$0xff]  ;;  %v7146_v9 = vcombine.low %v224_v58, %v228_v0 }
 0x17b   :  { %v2054_v15 = vpop.f32.mrf.mxu1  ;;  %3628 = vmatprep.subr.bf16.mxu1 %v7195_v3  ;;  %v2015_v22 = vpop.f32.mrf.mxu0  ;;  %v7147_v3 = vcombine.high %v224_v58, %v228_v0  ;;  %v7266_v20 = vcombine.low %v344_v6, %v348_v7  ;;  %v316_v43 = vld [vmem:[#allocation2 + $0x6e8] sm:$0xff] }
 0x17c   :  { %v8463_v21 = vadd.f32 %v2054_v15, %v2013_v12  ;;  %3588 = vmatpush1.bf16.msra.mxu0 %v7066_v10  ;;  %v7139_v10 = vcombine.high %v216_v4, %v220_v5  ;;  %v7267_v12 = vcombine.high %v344_v6, %v348_v7  ;;  %v336_v15 = vld [vmem:[#allocation2 + $0x788] sm:$0xff] }
 0x17d   :  { %v2056_v25 = vpop.f32.mrf.mxu1  ;;  %v2016_v27 = vpop.f32.mrf.mxu0  ;;  %3589 = vmatprep.subr.bf16.mxu0 %v7059_v14  ;;  %v212_v14 = vld [vmem:[#allocation2 + $0x3a8] sm:$0xff] }
 0x17e   :  { %3629 = vmatpush1.bf16.msra.mxu1 %v7194_v13  ;;  %v208_v13 = vld [vmem:[#allocation2 + $0x388] sm:$0xff] }
 0x17f   :  { %v2057_v30 = vpop.f32.mrf.mxu1  ;;  %3630 = vmatprep.subr.bf16.mxu1 %v7187_v17  ;;  %v340_v17 = vld [vmem:[#allocation2 + $0x7a8] sm:$0xff]  ;;  %v7131_v22 = vcombine.high %v208_v13, %v212_v14 }
 0x180   :  { %3590 = vmatpush1.bf16.msra.mxu0 %v7058_v26  ;;  %v7259_v23 = vcombine.high %v336_v15, %v340_v17  ;;  %v204_v25 = vld [vmem:[#allocation2 + $0x368] sm:$0xff] }
 0x181   :  { %3591 = vmatprep.subr.bf16.mxu0 %v7051_v29  ;;  %v328_v26 = vld [vmem:[#allocation2 + $0x748] sm:$0xff]  ;;  %v7258_v29 = vcombine.low %v336_v15, %v340_v17  ;;  %v7123_v30 = vcombine.high %v200_v24, %v204_v25  ;;  %v281_v15 = vld [vmem:[#allocation2 + $0x5d0] sm:$0xff] }
 0x182   :  { %3631 = vmatpush1.bf16.msra.mxu1 %v7186_v28  ;;  %v332_v27 = vld [vmem:[#allocation2 + $0x768] sm:$0xff]  ;;  %v7130_v28 = vcombine.low %v208_v13, %v212_v14  ;;  %v153_v13 = vld [vmem:[#allocation2 + $0x1d0] sm:$0xff] }
 0x183   :  { %3632 = vmatprep.subr.bf16.mxu1 %v7179_v31  ;;  %v7251_v31 = vcombine.high %v328_v26, %v332_v27  ;;  %v176_v48 = vld [vmem:[#allocation2 + $0x288] sm:$0xff]  ;;  %v157_v14 = vld [vmem:[#allocation2 + $0x1f0] sm:$0xff] }
 0x184   :  { %3592 = vmatpush1.bf16.msra.mxu0 %v7050_v36  ;;  %v7122_v36 = vcombine.low %v200_v24, %v204_v25  ;;  %v180_v49 = vld [vmem:[#allocation2 + $0x2a8] sm:$0xff]  ;;  %v285_v17 = vld [vmem:[#allocation2 + $0x5f0] sm:$0xff] }
 0x185   :  { %3593 = vmatprep.subr.bf16.mxu0 %v7043_v38  ;;  %v7115_v38 = vcombine.high %v192_v32, %v196_v33  ;;  %v304_v51 = vld [vmem:[#allocation2 + $0x688] sm:$0xff]  ;;  %v145_v24 = vld [vmem:[#allocation2 + $0x190] sm:$0xff] }
 0x186   :  { %3633 = vmatpush1.bf16.msra.mxu1 %v7178_v37  ;;  %v7250_v37 = vcombine.low %v328_v26, %v332_v27  ;;  %v308_v53 = vld [vmem:[#allocation2 + $0x6a8] sm:$0xff]  ;;  %v149_v25 = vld [vmem:[#allocation2 + $0x1b0] sm:$0xff] }
 0x187   :  { %3634 = vmatprep.subr.bf16.mxu1 %v7171_v39  ;;  %v7243_v39 = vcombine.high %v320_v34, %v324_v35  ;;  %v168_v61 = vld [vmem:[#allocation2 + $0x248] sm:$0xff]  ;;  %v273_v26 = vld [vmem:[#allocation2 + $0x590] sm:$0xff] }
 0x188   :  { %3594 = vmatpush1.bf16.msra.mxu0 %v7042_v44  ;;  %v7114_v44 = vcombine.low %v192_v32, %v196_v33  ;;  %v172_v62 = vld [vmem:[#allocation2 + $0x268] sm:$0xff]  ;;  %v277_v27 = vld [vmem:[#allocation2 + $0x5b0] sm:$0xff] }
 0x189   :  { %3595 = vmatprep.subr.bf16.mxu0 %v7035_v46  ;;  %v7107_v46 = vcombine.high %v184_v40, %v188_v41  ;;  %v296_v58 = vld [vmem:[#allocation2 + $0x648] sm:$0xff]  ;;  %v137_v32 = vld [vmem:[#allocation2 + $0x150] sm:$0xff] }
 0x18a   :  { %3635 = vmatpush1.bf16.msra.mxu1 %v7170_v45  ;;  %v7242_v45 = vcombine.low %v320_v34, %v324_v35  ;;  %v300_v0 = vld [vmem:[#allocation2 + $0x668] sm:$0xff]  ;;  %v141_v33 = vld [vmem:[#allocation2 + $0x170] sm:$0xff] }
 0x18b   :  { %3636 = vmatprep.subr.bf16.mxu1 %v7163_v47  ;;  %v7235_v47 = vcombine.high %v312_v42, %v316_v43  ;;  %v160_v4 = vld [vmem:[#allocation2 + $0x208] sm:$0xff]  ;;  %v265_v35 = vld [vmem:[#allocation2 + $0x550] sm:$0xff] }
 0x18c   :  { %3596 = vmatpush1.bf16.msra.mxu0 %v7034_v54  ;;  %v7106_v54 = vcombine.low %v184_v40, %v188_v41  ;;  %v164_v5 = vld [vmem:[#allocation2 + $0x228] sm:$0xff]  ;;  %v7196_v41 = vcombine.low %v273_v26, %v277_v27 }
 0x18d   :  { %3597 = vmatprep.subr.bf16.mxu0 %v7027_v57  ;;  %v7099_v57 = vcombine.high %v176_v48, %v180_v49  ;;  %v288_v6 = vld [vmem:[#allocation2 + $0x608] sm:$0xff] }
 0x18e   :  { %3637 = vmatpush1.bf16.msra.mxu1 %v7162_v56  ;;  %v7234_v56 = vcombine.low %v312_v42, %v316_v43  ;;  %v292_v7 = vld [vmem:[#allocation2 + $0x628] sm:$0xff]  ;;  %v7061_v42 = vcombine.high %v137_v32, %v141_v33 }
 0x18f   :  { %3638 = vmatprep.subr.bf16.mxu1 %v7155_v60  ;;  %v7227_v60 = vcombine.high %v304_v51, %v308_v53 }
 0x190   :  { %3598 = vmatpush1.bf16.msra.mxu0 %v7026_v59  ;;  %v7098_v59 = vcombine.low %v176_v48, %v180_v49  ;;  %v257_v49 = vld [vmem:[#allocation2 + $0x510] sm:$0xff] }
 0x191   :  { %3599 = vmatprep.subr.bf16.mxu0 %v7019_v2  ;;  %v7091_v2 = vcombine.high %v168_v61, %v172_v62 }
 0x192   :  { %3639 = vmatpush1.bf16.msra.mxu1 %v7154_v1  ;;  %v7226_v1 = vcombine.low %v304_v51, %v308_v53  ;;  %v261_v51 = vld [vmem:[#allocation2 + $0x530] sm:$0xff] }
 0x193   :  { %3640 = vmatprep.subr.bf16.mxu1 %v7147_v3  ;;  %v7219_v3 = vcombine.high %v296_v58, %v300_v0 }
 0x194   :  { %3600 = vmatpush1.bf16.msra.mxu0 %v7018_v8  ;;  %v7090_v8 = vcombine.low %v168_v61, %v172_v62  ;;  %v7181_v62 = vcombine.high %v257_v49, %v261_v51 }
 0x195   :  { %3601 = vmatprep.subr.bf16.mxu0 %v7139_v10  ;;  %v7083_v10 = vcombine.high %v160_v4, %v164_v5 }
 0x196   :  { %3641 = vmatpush1.bf16.msra.mxu1 %v7146_v9  ;;  %v7218_v9 = vcombine.low %v296_v58, %v300_v0  ;;  %v121_v58 = vld [vmem:[#allocation2 + $0xd0] sm:$0xff] }
 0x197   :  { %3642 = vmatprep.subr.bf16.mxu1 %v7267_v12  ;;  %v7211_v12 = vcombine.high %v288_v6, %v292_v7  ;;  %v125_v0 = vld [vmem:[#allocation2 + $0xf0] sm:$0xff] }
 0x198   :  { %3602 = vmatpush2.bf16.msra.mxu0 %v7138_v18  ;;  %v7082_v18 = vcombine.low %v160_v4, %v164_v5  ;;  %v7045_v4 = vcombine.high %v121_v58, %v125_v0 }
 0x199   :  { %3603 = vmatprep.subr.bf16.mxu0 %v7131_v22  ;;  %v7077_v22 = vcombine.high %v153_v13, %v157_v14 }
 0x19a   :  { %3643 = vmatpush2.bf16.msra.mxu1 %v7266_v20  ;;  %v7210_v20 = vcombine.low %v288_v6, %v292_v7  ;;  %v113_v6 = vld [vmem:[#allocation2 + $0x90] sm:$0xff] }
 0x19b   :  { %3644 = vmatprep.subr.bf16.mxu1 %v7259_v23  ;;  %v7205_v23 = vcombine.high %v281_v15, %v285_v17  ;;  %v117_v7 = vld [vmem:[#allocation2 + $0xb0] sm:$0xff] }
 0x19c   :  { %3604 = vmatpush2.bf16.msra.mxu0 %v7130_v28  ;;  %v7076_v28 = vcombine.low %v153_v13, %v157_v14  ;;  %v7037_v13 = vcombine.high %v113_v6, %v117_v7 }
 0x19d   :  { %3605 = vmatprep.subr.bf16.mxu0 %v7123_v30  ;;  %v7069_v30 = vcombine.high %v145_v24, %v149_v25 }
 0x19e   :  { %3645 = vmatpush2.bf16.msra.mxu1 %v7258_v29  ;;  %v7204_v29 = vcombine.low %v281_v15, %v285_v17  ;;  %v105_v15 = vld [vmem:[#allocation2 + $0x50] sm:$0xff] }
 0x19f   :  { %3646 = vmatprep.subr.bf16.mxu1 %v7251_v31  ;;  %v7197_v31 = vcombine.high %v273_v26, %v277_v27  ;;  %v109_v17 = vld [vmem:[#allocation2 + $0x70] sm:$0xff] }
 0x1a0   :  { %3606 = vmatpush2.bf16.msra.mxu0 %v7122_v36  ;;  %v269_v36 = vld [vmem:[#allocation2 + $0x570] sm:$0xff] }
 0x1a1   :  { %3607 = vmatprep.subr.bf16.mxu0 %v7115_v38  ;;  %v7068_v38 = vcombine.low %v145_v24, %v149_v25  ;;  %v7029_v24 = vcombine.high %v105_v15, %v109_v17  ;;  %v97_v26 = vld [vmem:[#allocation2 + $0x10] sm:$0xff] }
 0x1a2   :  { %3647 = vmatpush2.bf16.msra.mxu1 %v7250_v37  ;;  %v101_v27 = vld [vmem:[#allocation2 + $0x30] sm:$0xff] }
 0x1a3   :  { %3648 = vmatprep.subr.bf16.mxu1 %v7243_v39 }
 0x1a4   :  { %3608 = vmatpush2.bf16.msra.mxu0 %v7114_v44  ;;  %v7189_v44 = vcombine.high %v265_v35, %v269_v36 }
 0x1a5   :  { %3609 = vmatprep.subr.bf16.mxu0 %v7107_v46  ;;  %v133_v46 = vld [vmem:[#allocation2 + $0x130] sm:$0xff] }
 0x1a6   :  { %3649 = vmatpush2.bf16.msra.mxu1 %v7242_v45  ;;  %v129_v45 = vld [vmem:[#allocation2 + $0x110] sm:$0xff] }
 0x1a7   :  { %3650 = vmatprep.subr.bf16.mxu1 %v7235_v47 }
 0x1a8   :  { %3610 = vmatpush2.bf16.msra.mxu0 %v7106_v54  ;;  %v7060_v54 = vcombine.low %v137_v32, %v141_v33  ;;  %v7021_v32 = vcombine.high %v97_v26, %v101_v27 }
 0x1a9   :  { %3611 = vmatprep.subr.bf16.mxu0 %v7099_v57  ;;  %v7188_v57 = vcombine.low %v265_v35, %v269_v36  ;;  %v221_v35 = vld [vmem:[#allocation2 + $0x3f0] sm:$0xff] }
 0x1aa   :  { %3651 = vmatpush2.bf16.msra.mxu1 %v7234_v56  ;;  %v345_v36 = vld [vmem:[#allocation2 + $0x7d0] sm:$0xff] }
 0x1ab   :  { %3652 = vmatprep.subr.bf16.mxu1 %v7227_v60  ;;  %v7053_v60 = vcombine.high %v129_v45, %v133_v46 }
 0x1ac   :  { %3612 = vmatpush2.bf16.msra.mxu0 %v7098_v59  ;;  %v249_v59 = vld [vmem:[#allocation2 + $0x4d0] sm:$0xff] }
 0x1ad   :  { %3613 = vmatprep.subr.bf16.mxu0 %v7091_v2  ;;  %v7052_v2 = vcombine.low %v129_v45, %v133_v46  ;;  %v337_v45 = vld [vmem:[#allocation2 + $0x790] sm:$0xff] }
 0x1ae   :  { %3653 = vmatpush2.bf16.msra.mxu1 %v7226_v1  ;;  %v253_v1 = vld [vmem:[#allocation2 + $0x4f0] sm:$0xff] }
 0x1af   :  { %3654 = vmatprep.subr.bf16.mxu1 %v7219_v3  ;;  %v7180_v3 = vcombine.low %v257_v49, %v261_v51  ;;  %v7173_v5 = vcombine.high %v249_v59, %v253_v1  ;;  %v341_v46 = vld [vmem:[#allocation2 + $0x7b0] sm:$0xff] }
 0x1b0   :  { %3614 = vmatpush2.bf16.msra.mxu0 %v7090_v8  ;;  %v241_v8 = vld [vmem:[#allocation2 + $0x490] sm:$0xff] }
 0x1b1   :  { %3615 = vmatprep.subr.bf16.mxu0 %v7083_v10  ;;  %v7044_v10 = vcombine.low %v121_v58, %v125_v0 }
 0x1b2   :  { %3655 = vmatpush2.bf16.msra.mxu1 %v7218_v9  ;;  %v245_v9 = vld [vmem:[#allocation2 + $0x4b0] sm:$0xff] }
 0x1b3   :  { %3656 = vmatprep.subr.bf16.mxu1 %v7211_v12  ;;  %v7172_v12 = vcombine.low %v249_v59, %v253_v1  ;;  %v7165_v14 = vcombine.high %v241_v8, %v245_v9  ;;  %v193_v59 = vld [vmem:[#allocation2 + $0x310] sm:$0xff] }
 0x1b4   :  { %3616 = vmatpush2.bf16.msra.mxu0 %v7082_v18  ;;  %v233_v18 = vld [vmem:[#allocation2 + $0x450] sm:$0xff] }
 0x1b5   :  { %3667 = vmatprep.subr.bf16.mxu0 %v7077_v22  ;;  %v7036_v22 = vcombine.low %v113_v6, %v117_v7  ;;  %v197_v1 = vld [vmem:[#allocation2 + $0x330] sm:$0xff] }
 0x1b6   :  { %3657 = vmatpush2.bf16.msra.mxu1 %v7210_v20  ;;  %v237_v20 = vld [vmem:[#allocation2 + $0x470] sm:$0xff]  ;;  %v7117_v6 = vcombine.high %v193_v59, %v197_v1 }
 0x1b7   :  { %3708 = vmatprep.subr.bf16.mxu1 %v7205_v23  ;;  %v2093_v34 = vpop.f32.mrf.mxu0  ;;  %3618 = vmatmul.mubr.bf16.vlgmr.msra.gmra.mxu0 %v8454_v63  ;;  %v7164_v23 = vcombine.low %v241_v8, %v245_v9  ;;  %v7157_v25 = vcombine.high %v233_v18, %v237_v20  ;;  %v185_v8 = vld [vmem:[#allocation2 + $0x2d0] sm:$0xff] }
 0x1b8   :  { %3668 = vmatpush1.bf16.msra.mxu0 %v7076_v28  ;;  %3699 = vmatprep.mubr.bf16.mxu0 %v8436_v50  ;;  %v225_v28 = vld [vmem:[#allocation2 + $0x410] sm:$0xff] }
 0x1b9   :  { %v2134_v37 = vpop.f32.mrf.mxu1  ;;  %3659 = vmatmul.mubr.bf16.vlgmr.msra.gmra.mxu1 %v8456_v19  ;;  %v2095_v40 = vpop.f32.mrf.mxu0  ;;  %3669 = vmatprep.subr.bf16.mxu0 %v7069_v30  ;;  %v7028_v30 = vcombine.low %v105_v15, %v109_v17  ;;  %v189_v9 = vld [vmem:[#allocation2 + $0x2f0] sm:$0xff] }
 0x1ba   :  { %v8468_v39 = vadd.f32 %v2134_v37, %v2093_v34  ;;  %3709 = vmatpush1.bf16.msra.mxu1 %v7204_v29  ;;  %3740 = vmatprep.mubr.bf16.mxu1 %v8439_v52  ;;  %v229_v29 = vld [vmem:[#allocation2 + $0x430] sm:$0xff]  ;;  %v7109_v15 = vcombine.high %v185_v8, %v189_v9 }
 0x1bb   :  { %v2136_v43 = vpop.f32.mrf.mxu1  ;;  %3710 = vmatprep.subr.bf16.mxu1 %v7197_v31  ;;  %v2097_v48 = vpop.f32.mrf.mxu0  ;;  %v7156_v31 = vcombine.low %v233_v18, %v237_v20  ;;  %v7149_v33 = vcombine.high %v225_v28, %v229_v29  ;;  %v217_v34 = vld [vmem:[#allocation2 + $0x3d0] sm:$0xff] }
 0x1bc   :  { %v8471_v47 = vadd.f32 %v2136_v43, %v2095_v40  ;;  %3670 = vmatpush1.bf16.msra.mxu0 %v7068_v38  ;;  %v349_v37 = vld [vmem:[#allocation2 + $0x7f0] sm:$0xff]  ;;  %v7020_v38 = vcombine.low %v97_v26, %v101_v27  ;;  %v7148_v40 = vcombine.low %v225_v28, %v229_v29  ;;  %v7140_v48 = vcombine.low %v217_v34, %v221_v35 }
 0x1bd   :  { %v2138_v53 = vpop.f32.mrf.mxu1  ;;  %v2098_v56 = vpop.f32.mrf.mxu0  ;;  %3671 = vmatprep.subr.bf16.mxu0 %v7061_v42  ;;  %v7269_v42 = vcombine.high %v345_v36, %v349_v37  ;;  %v209_v43 = vld [vmem:[#allocation2 + $0x390] sm:$0xff]  ;;  %v7268_v49 = vcombine.low %v345_v36, %v349_v37 }
 0x1be   :  { %3711 = vmatpush1.bf16.msra.mxu1 %v7196_v41  ;;  %v7141_v41 = vcombine.high %v217_v34, %v221_v35  ;;  %v7261_v53 = vcombine.high %v337_v45, %v341_v46  ;;  %v205_v56 = vld [vmem:[#allocation2 + $0x370] sm:$0xff] }
 0x1bf   :  { %v2139_v61 = vpop.f32.mrf.mxu1  ;;  %3712 = vmatprep.subr.bf16.mxu1 %v7189_v44  ;;  %v213_v44 = vld [vmem:[#allocation2 + $0x3b0] sm:$0xff] }
 0x1c0   :  { %3672 = vmatpush1.bf16.msra.mxu0 %v7060_v54  ;;  %v7133_v51 = vcombine.high %v209_v43, %v213_v44  ;;  %v201_v54 = vld [vmem:[#allocation2 + $0x350] sm:$0xff]  ;;  %v7132_v61 = vcombine.low %v209_v43, %v213_v44 }
 0x1c1   :  { %3673 = vmatprep.subr.bf16.mxu0 %v7053_v60  ;;  %v333_v60 = vld [vmem:[#allocation2 + $0x770] sm:$0xff]  ;;  %v7125_v58 = vcombine.high %v201_v54, %v205_v56 }
 0x1c2   :  { %3713 = vmatpush1.bf16.msra.mxu1 %v7188_v57  ;;  %v329_v57 = vld [vmem:[#allocation2 + $0x750] sm:$0xff] }
 0x1c3   :  { %3714 = vmatprep.subr.bf16.mxu1 %v7181_v62  ;;  %v7260_v62 = vcombine.low %v337_v45, %v341_v46  ;;  %v7253_v0 = vcombine.high %v329_v57, %v333_v60  ;;  %v177_v18 = vld [vmem:[#allocation2 + $0x290] sm:$0xff]  ;;  %v154_v45 = vld [vmem:[#allocation2 + $0x1d8] sm:$0xff] }
 0x1c4   :  { %3674 = vmatpush1.bf16.msra.mxu0 %v7052_v2  ;;  %v321_v2 = vld [vmem:[#allocation2 + $0x710] sm:$0xff]  ;;  %v158_v46 = vld [vmem:[#allocation2 + $0x1f8] sm:$0xff] }
 0x1c5   :  { %3675 = vmatprep.subr.bf16.mxu0 %v7045_v4  ;;  %v7124_v4 = vcombine.low %v201_v54, %v205_v56  ;;  %v181_v20 = vld [vmem:[#allocation2 + $0x2b0] sm:$0xff]  ;;  %v7079_v54 = vcombine.high %v154_v45, %v158_v46 }
 0x1c6   :  { %3715 = vmatpush1.bf16.msra.mxu1 %v7180_v3  ;;  %v325_v3 = vld [vmem:[#allocation2 + $0x730] sm:$0xff]  ;;  %v7101_v26 = vcombine.high %v177_v18, %v181_v20 }
 0x1c7   :  { %3716 = vmatprep.subr.bf16.mxu1 %v7173_v5  ;;  %v7252_v5 = vcombine.low %v329_v57, %v333_v60  ;;  %v7245_v7 = vcombine.high %v321_v2, %v325_v3  ;;  %v169_v28 = vld [vmem:[#allocation2 + $0x250] sm:$0xff]  ;;  %v146_v57 = vld [vmem:[#allocation2 + $0x198] sm:$0xff] }
 0x1c8   :  { %3676 = vmatpush1.bf16.msra.mxu0 %v7044_v10  ;;  %v313_v10 = vld [vmem:[#allocation2 + $0x6d0] sm:$0xff]  ;;  %v150_v60 = vld [vmem:[#allocation2 + $0x1b8] sm:$0xff] }
 0x1c9   :  { %3677 = vmatprep.subr.bf16.mxu0 %v7037_v13  ;;  %v7116_v13 = vcombine.low %v193_v59, %v197_v1  ;;  %v173_v29 = vld [vmem:[#allocation2 + $0x270] sm:$0xff]  ;;  %v7071_v59 = vcombine.high %v146_v57, %v150_v60 }
 0x1ca   :  { %3717 = vmatpush1.bf16.msra.mxu1 %v7172_v12  ;;  %v317_v12 = vld [vmem:[#allocation2 + $0x6f0] sm:$0xff]  ;;  %v7093_v34 = vcombine.high %v169_v28, %v173_v29 }
 0x1cb   :  { %3718 = vmatprep.subr.bf16.mxu1 %v7165_v14  ;;  %v7244_v14 = vcombine.low %v321_v2, %v325_v3  ;;  %v7237_v17 = vcombine.high %v313_v10, %v317_v12  ;;  %v161_v36 = vld [vmem:[#allocation2 + $0x210] sm:$0xff]  ;;  %v138_v2 = vld [vmem:[#allocation2 + $0x158] sm:$0xff] }
 0x1cc   :  { %3678 = vmatpush1.bf16.msra.mxu0 %v7036_v22  ;;  %v305_v22 = vld [vmem:[#allocation2 + $0x690] sm:$0xff]  ;;  %v142_v3 = vld [vmem:[#allocation2 + $0x178] sm:$0xff] }
 0x1cd   :  { %3679 = vmatprep.subr.bf16.mxu0 %v7029_v24  ;;  %v7108_v24 = vcombine.low %v185_v8, %v189_v9  ;;  %v165_v37 = vld [vmem:[#allocation2 + $0x230] sm:$0xff]  ;;  %v7070_v8 = vcombine.low %v146_v57, %v150_v60 }
 0x1ce   :  { %3719 = vmatpush1.bf16.msra.mxu1 %v7164_v23  ;;  %v309_v23 = vld [vmem:[#allocation2 + $0x6b0] sm:$0xff]  ;;  %v7085_v43 = vcombine.high %v161_v36, %v165_v37 }
 0x1cf   :  { %3720 = vmatprep.subr.bf16.mxu1 %v7157_v25  ;;  %v7236_v25 = vcombine.low %v313_v10, %v317_v12  ;;  %v7229_v27 = vcombine.high %v305_v22, %v309_v23 }
 0x1d0   :  { %3680 = vmatpush1.bf16.msra.mxu0 %v7028_v30  ;;  %v297_v30 = vld [vmem:[#allocation2 + $0x650] sm:$0xff] }
 0x1d1   :  { %3681 = vmatprep.subr.bf16.mxu0 %v7021_v32  ;;  %v7100_v32 = vcombine.low %v177_v18, %v181_v20  ;;  %v134_v18 = vld [vmem:[#allocation2 + $0x138] sm:$0xff] }
 0x1d2   :  { %3721 = vmatpush1.bf16.msra.mxu1 %v7156_v31  ;;  %v301_v31 = vld [vmem:[#allocation2 + $0x670] sm:$0xff] }
 0x1d3   :  { %3722 = vmatprep.subr.bf16.mxu1 %v7149_v33  ;;  %v7228_v33 = vcombine.low %v305_v22, %v309_v23  ;;  %v7221_v35 = vcombine.high %v297_v30, %v301_v31  ;;  %v258_v23 = vld [vmem:[#allocation2 + $0x518] sm:$0xff] }
 0x1d4   :  { %3682 = vmatpush1.bf16.msra.mxu0 %v7020_v38  ;;  %v289_v38 = vld [vmem:[#allocation2 + $0x610] sm:$0xff] }
 0x1d5   :  { %3683 = vmatprep.subr.bf16.mxu0 %v7141_v41  ;;  %v7092_v41 = vcombine.low %v169_v28, %v173_v29 }
 0x1d6   :  { %3723 = vmatpush1.bf16.msra.mxu1 %v7148_v40  ;;  %v293_v40 = vld [vmem:[#allocation2 + $0x630] sm:$0xff] }
 0x1d7   :  { %3724 = vmatprep.subr.bf16.mxu1 %v7269_v42  ;;  %v7220_v42 = vcombine.low %v297_v30, %v301_v31  ;;  %v7213_v44 = vcombine.high %v289_v38, %v293_v40 }
 0x1d8   :  { %3684 = vmatpush2.bf16.msra.mxu0 %v7140_v48  ;;  %v282_v48 = vld [vmem:[#allocation2 + $0x5d8] sm:$0xff] }
 0x1d9   :  { %3685 = vmatprep.subr.bf16.mxu0 %v7133_v51  ;;  %v7084_v51 = vcombine.low %v161_v36, %v165_v37 }
 0x1da   :  { %3725 = vmatpush2.bf16.msra.mxu1 %v7268_v49  ;;  %v286_v49 = vld [vmem:[#allocation2 + $0x5f8] sm:$0xff] }
 0x1db   :  { %3726 = vmatprep.subr.bf16.mxu1 %v7261_v53  ;;  %v7212_v53 = vcombine.low %v289_v38, %v293_v40  ;;  %v7207_v56 = vcombine.high %v282_v48, %v286_v49  ;;  %v114_v38 = vld [vmem:[#allocation2 + $0x98] sm:$0xff] }
 0x1dc   :  { %3686 = vmatpush2.bf16.msra.mxu0 %v7132_v61  ;;  %v274_v61 = vld [vmem:[#allocation2 + $0x598] sm:$0xff] }
 0x1dd   :  { %3687 = vmatprep.subr.bf16.mxu0 %v7125_v58  ;;  %v7078_v58 = vcombine.low %v154_v45, %v158_v46  ;;  %v118_v40 = vld [vmem:[#allocation2 + $0xb8] sm:$0xff] }
 0x1de   :  { %3727 = vmatpush2.bf16.msra.mxu1 %v7260_v62  ;;  %v278_v62 = vld [vmem:[#allocation2 + $0x5b8] sm:$0xff]  ;;  %v7039_v45 = vcombine.high %v114_v38, %v118_v40 }
 0x1df   :  { %3728 = vmatprep.subr.bf16.mxu1 %v7253_v0  ;;  %v7206_v0 = vcombine.low %v282_v48, %v286_v49  ;;  %v7199_v1 = vcombine.high %v274_v61, %v278_v62  ;;  %v7198_v12 = vcombine.low %v274_v61, %v278_v62  ;;  %v106_v48 = vld [vmem:[#allocation2 + $0x58] sm:$0xff] }
 0x1e0   :  { %3688 = vmatpush2.bf16.msra.mxu0 %v7124_v4  ;;  %v110_v49 = vld [vmem:[#allocation2 + $0x78] sm:$0xff] }
 0x1e1   :  { %3689 = vmatprep.subr.bf16.mxu0 %v7117_v6  ;;  %v270_v6 = vld [vmem:[#allocation2 + $0x578] sm:$0xff]  ;;  %v7031_v57 = vcombine.high %v106_v48, %v110_v49 }
 0x1e2   :  { %3729 = vmatpush2.bf16.msra.mxu1 %v7252_v5  ;;  %v266_v5 = vld [vmem:[#allocation2 + $0x558] sm:$0xff] }
 0x1e3   :  { %3730 = vmatprep.subr.bf16.mxu1 %v7245_v7  ;;  %v7190_v28 = vcombine.low %v266_v5, %v270_v6  ;;  %v98_v61 = vld [vmem:[#allocation2 + $0x18] sm:$0xff] }
 0x1e4   :  { %3690 = vmatpush2.bf16.msra.mxu0 %v7116_v13  ;;  %v7063_v13 = vcombine.high %v138_v2, %v142_v3  ;;  %v102_v62 = vld [vmem:[#allocation2 + $0x38] sm:$0xff] }
 0x1e5   :  { %3691 = vmatprep.subr.bf16.mxu0 %v7109_v15  ;;  %v7191_v15 = vcombine.high %v266_v5, %v270_v6  ;;  %v222_v5 = vld [vmem:[#allocation2 + $0x3f8] sm:$0xff] }
 0x1e6   :  { %3731 = vmatpush2.bf16.msra.mxu1 %v7244_v14  ;;  %v346_v6 = vld [vmem:[#allocation2 + $0x7d8] sm:$0xff] }
 0x1e7   :  { %3732 = vmatprep.subr.bf16.mxu1 %v7237_v17  ;;  %v130_v17 = vld [vmem:[#allocation2 + $0x118] sm:$0xff] }
 0x1e8   :  { %3692 = vmatpush2.bf16.msra.mxu0 %v7108_v24  ;;  %v262_v24 = vld [vmem:[#allocation2 + $0x538] sm:$0xff]  ;;  %v7055_v29 = vcombine.high %v130_v17, %v134_v18 }
 0x1e9   :  { %3693 = vmatprep.subr.bf16.mxu0 %v7101_v26  ;;  %v7062_v26 = vcombine.low %v138_v2, %v142_v3  ;;  %v7183_v31 = vcombine.high %v258_v23, %v262_v24  ;;  %v7023_v2 = vcombine.high %v98_v61, %v102_v62 }
 0x1ea   :  { %3733 = vmatpush2.bf16.msra.mxu1 %v7236_v25 }
 0x1eb   :  { %3734 = vmatprep.subr.bf16.mxu1 %v7229_v27 }
 0x1ec   :  { %3694 = vmatpush2.bf16.msra.mxu0 %v7100_v32  ;;  %v122_v32 = vld [vmem:[#allocation2 + $0xd8] sm:$0xff] }
 0x1ed   :  { %3695 = vmatprep.subr.bf16.mxu0 %v7093_v34  ;;  %v254_v34 = vld [vmem:[#allocation2 + $0x4f8] sm:$0xff] }
 0x1ee   :  { %3735 = vmatpush2.bf16.msra.mxu1 %v7228_v33  ;;  %v250_v33 = vld [vmem:[#allocation2 + $0x4d8] sm:$0xff] }
 0x1ef   :  { %3736 = vmatprep.subr.bf16.mxu1 %v7221_v35  ;;  %v7054_v35 = vcombine.low %v130_v17, %v134_v18  ;;  %v7175_v37 = vcombine.high %v250_v33, %v254_v34  ;;  %v338_v17 = vld [vmem:[#allocation2 + $0x798] sm:$0xff] }
 0x1f0   :  { %3696 = vmatpush2.bf16.msra.mxu0 %v7092_v41  ;;  %v242_v41 = vld [vmem:[#allocation2 + $0x498] sm:$0xff] }
 0x1f1   :  { %3697 = vmatprep.subr.bf16.mxu0 %v7085_v43  ;;  %v342_v18 = vld [vmem:[#allocation2 + $0x7b8] sm:$0xff] }
 0x1f2   :  { %3737 = vmatpush2.bf16.msra.mxu1 %v7220_v42  ;;  %v246_v42 = vld [vmem:[#allocation2 + $0x4b8] sm:$0xff] }
 0x1f3   :  { %3738 = vmatprep.subr.bf16.mxu1 %v7213_v44  ;;  %v7174_v44 = vcombine.low %v250_v33, %v254_v34  ;;  %v7167_v46 = vcombine.high %v242_v41, %v246_v42  ;;  %v194_v33 = vld [vmem:[#allocation2 + $0x318] sm:$0xff] }
 0x1f4   :  { %3698 = vmatpush2.bf16.msra.mxu0 %v7084_v51  ;;  %v234_v51 = vld [vmem:[#allocation2 + $0x458] sm:$0xff] }
 0x1f5   :  { %3749 = vmatprep.subr.bf16.mxu0 %v7079_v54  ;;  %v7038_v54 = vcombine.low %v114_v38, %v118_v40  ;;  %v198_v34 = vld [vmem:[#allocation2 + $0x338] sm:$0xff] }
 0x1f6   :  { %3739 = vmatpush2.bf16.msra.mxu1 %v7212_v53  ;;  %v238_v53 = vld [vmem:[#allocation2 + $0x478] sm:$0xff]  ;;  %v7119_v38 = vcombine.high %v194_v33, %v198_v34 }
 0x1f7   :  { %3790 = vmatprep.subr.bf16.mxu1 %v7207_v56  ;;  %v2175_v4 = vpop.f32.mrf.mxu0  ;;  %3700 = vmatmul.mubr.bf16.vlgmr.msra.gmra.mxu0 %v8454_v63  ;;  %v7166_v56 = vcombine.low %v242_v41, %v246_v42  ;;  %v7159_v60 = vcombine.high %v234_v51, %v238_v53  ;;  %v186_v41 = vld [vmem:[#allocation2 + $0x2d8] sm:$0xff] }
 0x1f8   :  { %3750 = vmatpush1.bf16.msra.mxu0 %v7078_v58  ;;  %3781 = vmatprep.mubr.bf16.mxu0 %v8436_v50  ;;  %v126_v50 = vld [vmem:[#allocation2 + $0xf8] sm:$0xff] }
 0x1f9   :  { %v2216_v7 = vpop.f32.mrf.mxu1  ;;  %3741 = vmatmul.mubr.bf16.vlgmr.msra.gmra.mxu1 %v8456_v19  ;;  %v2177_v10 = vpop.f32.mrf.mxu0  ;;  %3751 = vmatprep.subr.bf16.mxu0 %v7071_v59  ;;  %v7047_v36 = vcombine.high %v122_v32, %v126_v50  ;;  %v7046_v43 = vcombine.low %v122_v32, %v126_v50  ;;  %v226_v58 = vld [vmem:[#allocation2 + $0x418] sm:$0xff]  ;;  %v7030_v59 = vcombine.low %v106_v48, %v110_v49 }
 0x1fa   :  { %v8476_v9 = vadd.f32 %v2216_v7, %v2175_v4  ;;  %3791 = vmatpush1.bf16.msra.mxu1 %v7206_v0  ;;  %3822 = vmatprep.mubr.bf16.mxu1 %v8439_v52  ;;  %v7182_v52 = vcombine.low %v258_v23, %v262_v24  ;;  %v230_v0 = vld [vmem:[#allocation2 + $0x438] sm:$0xff] }
 0x1fb   :  { %v2218_v14 = vpop.f32.mrf.mxu1  ;;  %3792 = vmatprep.subr.bf16.mxu1 %v7199_v1  ;;  %v2179_v22 = vpop.f32.mrf.mxu0  ;;  %v7158_v1 = vcombine.low %v234_v51, %v238_v53  ;;  %v7151_v3 = vcombine.high %v226_v58, %v230_v0  ;;  %v218_v4 = vld [vmem:[#allocation2 + $0x3d8] sm:$0xff] }
 0x1fc   :  { %v8479_v20 = vadd.f32 %v2218_v14, %v2177_v10  ;;  %3752 = vmatpush1.bf16.msra.mxu0 %v7070_v8  ;;  %v350_v7 = vld [vmem:[#allocation2 + $0x7f8] sm:$0xff]  ;;  %v7022_v8 = vcombine.low %v98_v61, %v102_v62  ;;  %v7150_v10 = vcombine.low %v226_v58, %v230_v0  ;;  %v7142_v22 = vcombine.low %v218_v4, %v222_v5 }
 0x1fd   :  { %v2220_v25 = vpop.f32.mrf.mxu1  ;;  %v2180_v27 = vpop.f32.mrf.mxu0  ;;  %3753 = vmatprep.subr.bf16.mxu0 %v7063_v13  ;;  %v7271_v13 = vcombine.high %v346_v6, %v350_v7  ;;  %v210_v14 = vld [vmem:[#allocation2 + $0x398] sm:$0xff]  ;;  %v7270_v23 = vcombine.low %v346_v6, %v350_v7 }
 0x1fe   :  { %3793 = vmatpush1.bf16.msra.mxu1 %v7198_v12  ;;  %v7143_v12 = vcombine.high %v218_v4, %v222_v5  ;;  %v7263_v25 = vcombine.high %v338_v17, %v342_v18  ;;  %v206_v27 = vld [vmem:[#allocation2 + $0x378] sm:$0xff] }
 0x1ff   :  { %v2221_v30 = vpop.f32.mrf.mxu1  ;;  %3794 = vmatprep.subr.bf16.mxu1 %v7191_v15  ;;  %v214_v15 = vld [vmem:[#allocation2 + $0x3b8] sm:$0xff] }
 0x200   :  { %3754 = vmatpush1.bf16.msra.mxu0 %v7062_v26  ;;  %v7135_v24 = vcombine.high %v210_v14, %v214_v15  ;;  %v202_v26 = vld [vmem:[#allocation2 + $0x358] sm:$0xff]  ;;  %v7134_v30 = vcombine.low %v210_v14, %v214_v15 }
 0x201   :  { %3755 = vmatprep.subr.bf16.mxu0 %v7055_v29  ;;  %v334_v29 = vld [vmem:[#allocation2 + $0x778] sm:$0xff]  ;;  %v7127_v32 = vcombine.high %v202_v26, %v206_v27 }
 0x202   :  { %3795 = vmatpush1.bf16.msra.mxu1 %v7190_v28  ;;  %v330_v28 = vld [vmem:[#allocation2 + $0x758] sm:$0xff] }
 0x203   :  { %3796 = vmatprep.subr.bf16.mxu1 %v7183_v31  ;;  %v7262_v31 = vcombine.low %v338_v17, %v342_v18  ;;  %v7255_v50 = vcombine.high %v330_v28, %v334_v29  ;;  %v190_v42 = vld [vmem:[#allocation2 + $0x2f8] sm:$0xff]  ;;  %v3833_v18 = vlaneseq }
 0x204   :  { %3756 = vmatpush1.bf16.msra.mxu0 %v7054_v35  ;;  %v322_v35 = vld [vmem:[#allocation2 + $0x718] sm:$0xff]  ;;  %v7111_v48 = vcombine.high %v186_v41, %v190_v42 }
 0x205   :  { %3757 = vmatprep.subr.bf16.mxu0 %v7047_v36  ;;  %v7126_v36 = vcombine.low %v202_v26, %v206_v27  ;;  %v178_v51 = vld [vmem:[#allocation2 + $0x298] sm:$0xff]  ;;  %v7664_v26 = vld [vmem:[#allocation6 + $0xe0] ss:$16 sps:$4 sm:$0xff]   ;;  %v7669_v27 = vld [vmem:[#allocation6 + $0xc4] ss:$16 sps:$4 sm:$0xff]  }
 0x206   :  { %3797 = vmatpush1.bf16.msra.mxu1 %v7182_v52  ;;  %v326_v52 = vld [vmem:[#allocation2 + $0x738] sm:$0xff] }
 0x207   :  { %3798 = vmatprep.subr.bf16.mxu1 %v7175_v37  ;;  %v7254_v37 = vcombine.low %v330_v28, %v334_v29  ;;  %v7247_v40 = vcombine.high %v322_v35, %v326_v52  ;;  %v182_v53 = vld [vmem:[#allocation2 + $0x2b8] sm:$0xff]  ;;  %v7676_v28 = vld [vmem:[#allocation6 + $0x2e0] ss:$16 sps:$4 sm:$0xff]  }
 0x208   :  { %3758 = vmatpush1.bf16.msra.mxu0 %v7046_v43  ;;  %v314_v43 = vld [vmem:[#allocation2 + $0x6d8] sm:$0xff]  ;;  %v7103_v61 = vcombine.high %v178_v51, %v182_v53 }
 0x209   :  { %3759 = vmatprep.subr.bf16.mxu0 %v7039_v45  ;;  %v7118_v45 = vcombine.low %v194_v33, %v198_v34  ;;  %v170_v58 = vld [vmem:[#allocation2 + $0x258] sm:$0xff]  ;;  %v8496_v33 = vld [vmem:[%s8624_s4] sm:$0xff] }
 0x20a   :  { %3799 = vmatpush1.bf16.msra.mxu1 %v7174_v44  ;;  %v318_v44 = vld [vmem:[#allocation2 + $0x6f8] sm:$0xff] }
 0x20b   :  { %3800 = vmatprep.subr.bf16.mxu1 %v7167_v46  ;;  %v7246_v46 = vcombine.low %v322_v35, %v326_v52  ;;  %v7239_v49 = vcombine.high %v314_v43, %v318_v44  ;;  %v174_v0 = vld [vmem:[#allocation2 + $0x278] sm:$0xff]  ;;  %v7672_v35 = vld [vmem:[#allocation6 + $0xa4] ss:$16 sps:$4 sm:$0xff]   ;;  %v7682_v52 = vld [vmem:[#allocation6 + $0x2c0] ss:$16 sps:$4 sm:$0xff]  }
 0x20c   :  { %3760 = vmatpush1.bf16.msra.mxu0 %v7038_v54  ;;  %v306_v54 = vld [vmem:[#allocation2 + $0x698] sm:$0xff]  ;;  %v7095_v4 = vcombine.high %v170_v58, %v174_v0 }
 0x20d   :  { %3761 = vmatprep.subr.bf16.mxu0 %v7031_v57  ;;  %v7110_v57 = vcombine.low %v186_v41, %v190_v42  ;;  %v162_v6 = vld [vmem:[#allocation2 + $0x218] sm:$0xff]  ;;  %v7670_v42 = vld [vmem:[#allocation6 + $0xa0] ss:$16 sps:$4 sm:$0xff]  }
 0x20e   :  { %3801 = vmatpush1.bf16.msra.mxu1 %v7166_v56  ;;  %v310_v56 = vld [vmem:[#allocation2 + $0x6b8] sm:$0xff] }
 0x20f   :  { %3802 = vmatprep.subr.bf16.mxu1 %v7159_v60  ;;  %v7238_v60 = vcombine.low %v314_v43, %v318_v44  ;;  %v7231_v62 = vcombine.high %v306_v54, %v310_v56  ;;  %v166_v7 = vld [vmem:[#allocation2 + $0x238] sm:$0xff]  ;;  %v7675_v44 = vld [vmem:[#allocation6 + $0x84] ss:$16 sps:$4 sm:$0xff]  }
 0x210   :  { %3762 = vmatpush1.bf16.msra.mxu0 %v7030_v59  ;;  %v298_v59 = vld [vmem:[#allocation2 + $0x658] sm:$0xff]  ;;  %v7087_v14 = vcombine.high %v162_v6, %v166_v7  ;;  %v7086_v17 = vcombine.low %v162_v6, %v166_v7  ;;  %v7720_v6 = vld [vmem:[#allocation6 + $0x204] ss:$16 sps:$4 sm:$0xff]   ;;  %v7697_v7 = vld [vmem:[#allocation6] ss:$16 sps:$4 sm:$0xff]  }
 0x211   :  { %3763 = vmatprep.subr.bf16.mxu0 %v7023_v2  ;;  %v7102_v2 = vcombine.low %v178_v51, %v182_v53  ;;  %v7673_v51 = vld [vmem:[#allocation6 + $0x80] ss:$16 sps:$4 sm:$0xff]   ;;  %v7681_v53 = vld [vmem:[#allocation6 + $0x64] ss:$16 sps:$4 sm:$0xff]  }
 0x212   :  { %3803 = vmatpush1.bf16.msra.mxu1 %v7158_v1  ;;  %v302_v1 = vld [vmem:[#allocation2 + $0x678] sm:$0xff] }
 0x213   :  { %3804 = vmatprep.subr.bf16.mxu1 %v7151_v3  ;;  %v7230_v3 = vcombine.low %v306_v54, %v310_v56  ;;  %v7223_v5 = vcombine.high %v298_v59, %v302_v1  ;;  %v7694_v54 = vld [vmem:[#allocation6 + $0x280] ss:$16 sps:$4 sm:$0xff]  }
 0x214   :  { %3764 = vmatpush1.bf16.msra.mxu0 %v7022_v8  ;;  %v290_v8 = vld [vmem:[#allocation2 + $0x618] sm:$0xff] }
 0x215   :  { %3765 = vmatprep.subr.bf16.mxu0 %v7143_v12  ;;  %v7094_v12 = vcombine.low %v170_v58, %v174_v0  ;;  %v7708_v58 = vld [vmem:[#allocation6 + $0x244] ss:$16 sps:$4 sm:$0xff]   ;;  %v7685_v0 = vld [vmem:[#allocation6 + $0x40] ss:$16 sps:$4 sm:$0xff]  }
 0x216   :  { %3805 = vmatpush1.bf16.msra.mxu1 %v7150_v10  ;;  %v294_v10 = vld [vmem:[#allocation2 + $0x638] sm:$0xff] }
 0x217   :  { %3806 = vmatprep.subr.bf16.mxu1 %v7271_v13  ;;  %v7222_v13 = vcombine.low %v298_v59, %v302_v1  ;;  %v7215_v15 = vcombine.high %v290_v8, %v294_v10  ;;  %v7693_v59 = vld [vmem:[#allocation6 + $0x24] ss:$16 sps:$4 sm:$0xff]   ;;  %v7706_v1 = vld [vmem:[#allocation6 + $0x240] ss:$16 sps:$4 sm:$0xff]  }
 0x218   :  { %3766 = vmatpush2.bf16.msra.mxu0 %v7142_v22  ;;  %v7214_v22 = vcombine.low %v290_v8, %v294_v10  ;;  %v7705_v8 = vld [vmem:[#allocation6 + $0x1e4] ss:$16 sps:$4 sm:$0xff]   ;;  %v7718_v10 = vld [vmem:[#allocation6 + $0x200] ss:$16 sps:$4 sm:$0xff]  }
 0x219   :  { %3767 = vmatprep.subr.bf16.mxu0 %v7135_v24  ;;  %v7678_v24 = vld [vmem:[#allocation6 + $0x2e4] ss:$16 sps:$4 sm:$0xff]  }
 0x21a   :  { %3807 = vmatpush2.bf16.msra.mxu1 %v7270_v23  ;;  %v7666_v23 = vld [vmem:[#allocation6 + $0xe4] ss:$16 sps:$4 sm:$0xff]  }
 0x21b   :  { %3808 = vmatprep.subr.bf16.mxu1 %v7263_v25  ;;  %v8482_v25 = vshrl.u32 %v3833_v18, 7  ;;  %v7709_v18 = vld [vmem:[#allocation6 + $0x1c0] ss:$16 sps:$4 sm:$0xff]  }
 0x21c   :  { %3768 = vmatpush2.bf16.msra.mxu0 %v7134_v30  ;;  %v7684_v30 = vld [vmem:[#allocation6 + $0x2c4] ss:$16 sps:$4 sm:$0xff]  }
 0x21d   :  { %3769 = vmatprep.subr.bf16.mxu0 %v7127_v32  ;;  %v8485_v29 = vsub.s32 1, %v8482_v25 }
 0x21e   :  { %3809 = vmatpush2.bf16.msra.mxu1 %v7262_v31 }
 0x21f   :  { %3810 = vmatprep.subr.bf16.mxu1 %v7255_v50  ;;  %v7667_v50 = vld [vmem:[#allocation6 + $0xc0] ss:$16 sps:$4 sm:$0xff]  }
 0x220   :  { %3770 = vmatpush2.bf16.msra.mxu0 %v7126_v36 }
 0x221   :  { %3771 = vmatprep.subr.bf16.mxu0 %v7119_v38 }
 0x222   :  { %3811 = vmatpush2.bf16.msra.mxu1 %v7254_v37 }
 0x223   :  { %3812 = vmatprep.subr.bf16.mxu1 %v7247_v40 }
 0x224   :  { %3772 = vmatpush2.bf16.msra.mxu0 %v7118_v45  ;;  %v7688_v45 = vld [vmem:[#allocation6 + $0x2a0] ss:$16 sps:$4 sm:$0xff]  }
 0x225   :  { %3773 = vmatprep.subr.bf16.mxu0 %v7111_v48 }
 0x226   :  { %3813 = vmatpush2.bf16.msra.mxu1 %v7246_v46 }
 0x227   :  { %3814 = vmatprep.subr.bf16.mxu1 %v7239_v49 }
 0x228   :  { %3774 = vmatpush2.bf16.msra.mxu0 %v7110_v57  ;;  %v7702_v57 = vld [vmem:[#allocation6 + $0x264] ss:$16 sps:$4 sm:$0xff]  }
 0x229   :  { %3775 = vmatprep.subr.bf16.mxu0 %v7103_v61  ;;  %v7687_v61 = vld [vmem:[#allocation6 + $0x44] ss:$16 sps:$4 sm:$0xff]  }
 0x22a   :  { %3815 = vmatpush2.bf16.msra.mxu1 %v7238_v60  ;;  %v7679_v60 = vld [vmem:[#allocation6 + $0x60] ss:$16 sps:$4 sm:$0xff]  }
 0x22b   :  { %3816 = vmatprep.subr.bf16.mxu1 %v7231_v62  ;;  %v7700_v62 = vld [vmem:[#allocation6 + $0x260] ss:$16 sps:$4 sm:$0xff]  }
 0x22c   :  { %3776 = vmatpush2.bf16.msra.mxu0 %v7102_v2  ;;  %v7714_v2 = vld [vmem:[#allocation6 + $0x224] ss:$16 sps:$4 sm:$0xff]  }
 0x22d   :  { %3777 = vmatprep.subr.bf16.mxu0 %v7095_v4  ;;  %v7699_v4 = vld [vmem:[#allocation6 + $0x4] ss:$16 sps:$4 sm:$0xff]  }
 0x22e   :  { %3817 = vmatpush2.bf16.msra.mxu1 %v7230_v3  ;;  %v7691_v3 = vld [vmem:[#allocation6 + $0x20] ss:$16 sps:$4 sm:$0xff]  }
 0x22f   :  { %3818 = vmatprep.subr.bf16.mxu1 %v7223_v5  ;;  %v7712_v5 = vld [vmem:[#allocation6 + $0x220] ss:$16 sps:$4 sm:$0xff]  }
 0x230   :  { %3778 = vmatpush2.bf16.msra.mxu0 %v7094_v12  ;;  %v7726_v12 = vld [vmem:[#allocation6 + $0x3e4] ss:$16 sps:$4 sm:$0xff]  }
 0x231   :  { %3779 = vmatprep.subr.bf16.mxu0 %v7087_v14  ;;  %v7711_v14 = vld [vmem:[#allocation6 + $0x1c4] ss:$16 sps:$4 sm:$0xff]  }
 0x232   :  { %3819 = vmatpush2.bf16.msra.mxu1 %v7222_v13  ;;  %v7703_v13 = vld [vmem:[#allocation6 + $0x1e0] ss:$16 sps:$4 sm:$0xff]  }
 0x233   :  { %3820 = vmatprep.subr.bf16.mxu1 %v7215_v15  ;;  %v7724_v15 = vld [vmem:[#allocation6 + $0x3e0] ss:$16 sps:$4 sm:$0xff]  }
 0x234   :  { %3780 = vmatpush2.bf16.msra.mxu0 %v7086_v17  ;;  %v7732_v17 = vld [vmem:[#allocation6 + $0x3c4] ss:$16 sps:$4 sm:$0xff]  }
 0x235   :  { %5455 = vmatprep.subr.bf16.mxu0 %v7666_v23  ;;  %v7730_v23 = vld [vmem:[#allocation6 + $0x3c0] ss:$16 sps:$4 sm:$0xff]  }
 0x236   :  { %3821 = vmatpush2.bf16.msra.mxu1 %v7214_v22  ;;  %v7717_v22 = vld [vmem:[#allocation6 + $0x1a4] ss:$16 sps:$4 sm:$0xff]  }
 0x237   :  { %5496 = vmatprep.subr.bf16.mxu1 %v7678_v24  ;;  %v8487_v31 = vpop.f32.mrf.mxu0  ;;  %3782 = vmatmul.mubr.bf16.vlgmr.msra.gmra.mxu0 %v8454_v63  ;;  %v3840_v63 = vrot.slane %v8496_v33, %v8485_v29  ;;  %v7738_v24 = vld [vmem:[#allocation6 + $0x3a4] ss:$16 sps:$4 sm:$0xff]  }
 0x238   :  { %5456 = vmatpush1.bf16.msra.mxu0 %v7664_v26  ;;  %v7715_v26 = vld [vmem:[#allocation6 + $0x1a0] ss:$16 sps:$4 sm:$0xff]  }
 0x239   :  { %v8490_v32 = vpop.f32.mrf.mxu1  ;;  %3823 = vmatmul.mubr.bf16.vlgmr.msra.gmra.mxu1 %v8456_v19  ;;  %v3539_v34 = vpop.f32.mrf.mxu0  ;;  %5457 = vmatprep.subr.bf16.mxu0 %v7669_v27  ;;  %v7690_v19 = vld [vmem:[#allocation6 + $0x2a4] ss:$16 sps:$4 sm:$0xff]  }
 0x23a   :  { %5497 = vmatpush1.bf16.msra.mxu1 %v7676_v28  ;;  %v3540_v36 = vadd.f32 %v3539_v34, %v8445_v16  ;;  %v7696_v16 = vld [vmem:[#allocation6 + $0x284] ss:$16 sps:$4 sm:$0xff]   ;;  %v7736_v28 = vld [vmem:[#allocation6 + $0x3a0] ss:$16 sps:$4 sm:$0xff]  }
 0x23b   :  { %v3580_v37 = vpop.f32.mrf.mxu1  ;;  %5498 = vmatprep.subr.bf16.mxu1 %v7684_v30  ;;  %v3541_v38 = vpop.f32.mrf.mxu0  ;;  %v7723_v27 = vld [vmem:[#allocation6 + $0x184] ss:$16 sps:$4 sm:$0xff]  }
 0x23c   :  { %v3581_v40 = vadd.f32 %v3580_v37, %v3540_v36  ;;  %5458 = vmatpush1.bf16.msra.mxu0 %v7667_v50  ;;  %v7744_v30 = vld [vmem:[#allocation6 + $0x384] ss:$16 sps:$4 sm:$0xff]   ;;  %v7721_v50 = vld [vmem:[#allocation6 + $0x180] ss:$16 sps:$4 sm:$0xff]   ;;  %v3538_v37 = vadd.f32 %v8487_v31, %v8442_v55 }
 0x23d   :  { %v3582_v41 = vpop.f32.mrf.mxu1  ;;  %v3542_v43 = vpop.f32.mrf.mxu0  ;;  %5459 = vmatprep.subr.bf16.mxu0 %v7672_v35  ;;  %v7729_v34 = vld [vmem:[#allocation6 + $0x164] ss:$16 sps:$4 sm:$0xff]   ;;  %v7742_v35 = vld [vmem:[#allocation6 + $0x380] ss:$16 sps:$4 sm:$0xff]  }
 0x23e   :  { %5499 = vmatpush1.bf16.msra.mxu1 %v7682_v52  ;;  %v3874_v46 = vadd.f32 %v3840_v63, %v3581_v40  ;;  %v7750_v52 = vld [vmem:[#allocation6 + $0x364] ss:$16 sps:$4 sm:$0xff]   ;;  %v7727_v36 = vld [vmem:[#allocation6 + $0x160] ss:$16 sps:$4 sm:$0xff]   ;;  %v8507_v63 = vsub.s32 0, %v8482_v25 }
 0x23f   :  { %v3583_v48 = vpop.f32.mrf.mxu1  ;;  %5500 = vmatprep.subr.bf16.mxu1 %v7690_v19  ;;  %v7735_v19 = vld [vmem:[#allocation6 + $0x144] ss:$16 sps:$4 sm:$0xff]   ;;  %v7748_v38 = vld [vmem:[#allocation6 + $0x360] ss:$16 sps:$4 sm:$0xff]  }
 0x240   :  { %v3882_v49 = vmax.f32 %v3874_v46, 0.0  ;;  %5460 = vmatpush1.bf16.msra.mxu0 %v7670_v42  ;;  %v7753_v40 = vld [vmem:[#allocation6 + $0x344] ss:$16 sps:$4 sm:$0xff]   ;;  %v7733_v41 = vld [vmem:[#allocation6 + $0x140] ss:$16 sps:$4 sm:$0xff]   ;;  %v3579_v42 = vadd.f32 %v8490_v32, %v3538_v37  ;;  %v3836_v43 = vrot.slane %v8496_v33, %v8507_v63 }
 0x241   :  { %5461 = vmatprep.subr.bf16.mxu0 %v7675_v44  ;;  %v7741_v44 = vld [vmem:[#allocation6 + $0x124] ss:$16 sps:$4 sm:$0xff]   ;;  %v7751_v55 = vld [vmem:[#allocation6 + $0x340] ss:$16 sps:$4 sm:$0xff]  }
 0x242   :  { %5501 = vmatpush1.bf16.msra.mxu1 %v7688_v45  ;;  %v8501_v56 = vpack.c.bf16 %v3882_v49, %v3882_v49  ;;  %v7756_v31 = vld [vmem:[#allocation6 + $0x324] ss:$16 sps:$4 sm:$0xff]   ;;  %v7739_v45 = vld [vmem:[#allocation6 + $0x120] ss:$16 sps:$4 sm:$0xff]   ;;  %v3873_v46 = vadd.f32 %v3836_v43, %v3579_v42 }
 0x243   :  { %5502 = vmatprep.subr.bf16.mxu1 %v7696_v16  ;;  %v7747_v48 = vld [vmem:[#allocation6 + $0x104] ss:$16 sps:$4 sm:$0xff]   ;;  %v7754_v16 = vld [vmem:[#allocation6 + $0x320] ss:$16 sps:$4 sm:$0xff]  }
 0x244   :  { %5462 = vmatpush1.bf16.msra.mxu0 %v7673_v51  ;;  %5487 = vmatprep.mubr.bf16.mxu0 %v8501_v56  ;;  %v7759_v49 = vld [vmem:[#allocation6 + $0x304] ss:$16 sps:$4 sm:$0xff]   ;;  %v7745_v32 = vld [vmem:[#allocation6 + $0x100] ss:$16 sps:$4 sm:$0xff]   ;;  %v3881_v51 = vmax.f32 %v3873_v46, 0.0 }
 0x245   :  { %5463 = vmatprep.subr.bf16.mxu0 %v7681_v53  ;;  %v7757_v53 = vld [vmem:[#allocation6 + $0x300] ss:$16 sps:$4 sm:$0xff]   ;;  %v7828_v42 = vld [vmem:[#allocation6 + $0x684] ss:$16 sps:$4 sm:$0xff]  }
 0x246   :  { %5503 = vmatpush1.bf16.msra.mxu1 %v7694_v54  ;;  %v7762_v54 = vld [vmem:[#allocation6 + $0x4e4] ss:$16 sps:$4 sm:$0xff]   ;;  %v7814_v37 = vld [vmem:[#allocation6 + $0x6c0] ss:$16 sps:$4 sm:$0xff]  }
 0x247   :  { %5504 = vmatprep.subr.bf16.mxu1 %v7702_v57  ;;  %v7810_v57 = vld [vmem:[#allocation6 + $0x6e4] ss:$16 sps:$4 sm:$0xff]   ;;  %v7778_v43 = vld [vmem:[#allocation6 + $0x420] ss:$16 sps:$4 sm:$0xff]  }
 0x248   :  { %5464 = vmatpush1.bf16.msra.mxu0 %v7679_v60  ;;  %v8513_v60 = vsub.s32 2, %v8482_v25  ;;  %v7786_v46 = vld [vmem:[#allocation6 + $0x5e4] ss:$16 sps:$4 sm:$0xff]  }
 0x249   :  { %5465 = vmatprep.subr.bf16.mxu0 %v7687_v61  ;;  %v7760_v61 = vld [vmem:[#allocation6 + $0x4e0] ss:$16 sps:$4 sm:$0xff]  }
 0x24a   :  { %5505 = vmatpush1.bf16.msra.mxu1 %v7700_v62  ;;  %v8515_v62 = vpack.c.bf16 %v3881_v51, %v3881_v51  ;;  %v7838_v51 = vld [vmem:[#allocation6 + $0x640] ss:$16 sps:$4 sm:$0xff]  }
 0x24b   :  { %5506 = vmatprep.subr.bf16.mxu1 %v7708_v58  ;;  %v7765_v58 = vld [vmem:[#allocation6 + $0x4c4] ss:$16 sps:$4 sm:$0xff]  }
 0x24c   :  { %5466 = vmatpush1.bf16.msra.mxu0 %v7685_v0  ;;  %v8518_v0 = vsub.s32 3, %v8482_v25 }
 0x24d   :  { %5467 = vmatprep.subr.bf16.mxu0 %v7693_v59 }
 0x24e   :  { %5507 = vmatpush1.bf16.msra.mxu1 %v7706_v1 }
 0x24f   :  { %5508 = vmatprep.subr.bf16.mxu1 %v7714_v2 }
 0x250   :  { %5468 = vmatpush1.bf16.msra.mxu0 %v7691_v3  ;;  %v3844_v3 = vrot.slane %v8496_v33, %v8513_v60 }
 0x251   :  { %5469 = vmatprep.subr.bf16.mxu0 %v7699_v4  ;;  %v7763_v4 = vld [vmem:[#allocation6 + $0x4c0] ss:$16 sps:$4 sm:$0xff]  }
 0x252   :  { %5509 = vmatpush1.bf16.msra.mxu1 %v7712_v5 }
 0x253   :  { %5510 = vmatprep.subr.bf16.mxu1 %v7720_v6  ;;  %v7768_v6 = vld [vmem:[#allocation6 + $0x4a4] ss:$16 sps:$4 sm:$0xff]  }
 0x254   :  { %5470 = vmatpush1.bf16.msra.mxu0 %v7697_v7 }
 0x255   :  { %5471 = vmatprep.subr.bf16.mxu0 %v7705_v8 }
 0x256   :  { %5511 = vmatpush1.bf16.msra.mxu1 %v7718_v10 }
 0x257   :  { %5512 = vmatprep.subr.bf16.mxu1 %v7726_v12  ;;  %v3848_v12 = vrot.slane %v8496_v33, %v8518_v0 }
 0x258   :  { %5472 = vmatpush2.bf16.msra.mxu0 %v7703_v13 }
 0x259   :  { %5473 = vmatprep.subr.bf16.mxu0 %v7711_v14 }
 0x25a   :  { %5513 = vmatpush2.bf16.msra.mxu1 %v7724_v15 }
 0x25b   :  { %5514 = vmatprep.subr.bf16.mxu1 %v7732_v17  ;;  %v7766_v17 = vld [vmem:[#allocation6 + $0x4a0] ss:$16 sps:$4 sm:$0xff]  }
 0x25c   :  { %5474 = vmatpush2.bf16.msra.mxu0 %v7709_v18 }
 0x25d   :  { %5475 = vmatprep.subr.bf16.mxu0 %v7717_v22  ;;  %v7771_v22 = vld [vmem:[#allocation6 + $0x484] ss:$16 sps:$4 sm:$0xff]  }
 0x25e   :  { %5515 = vmatpush2.bf16.msra.mxu1 %v7730_v23 }
 0x25f   :  { %5516 = vmatprep.subr.bf16.mxu1 %v7738_v24 }
 0x260   :  { %5476 = vmatpush2.bf16.msra.mxu0 %v7715_v26 }
 0x261   :  { %5477 = vmatprep.subr.bf16.mxu0 %v7723_v27 }
 0x262   :  { %5517 = vmatpush2.bf16.msra.mxu1 %v7736_v28  ;;  %v7769_v28 = vld [vmem:[#allocation6 + $0x480] ss:$16 sps:$4 sm:$0xff]  }
 0x263   :  { %5518 = vmatprep.subr.bf16.mxu1 %v7744_v30 }
 0x264   :  { %5478 = vmatpush2.bf16.msra.mxu0 %v7721_v50  ;;  %v7808_v50 = vld [vmem:[#allocation6 + $0x6e0] ss:$16 sps:$4 sm:$0xff]  }
 0x265   :  { %5479 = vmatprep.subr.bf16.mxu0 %v7729_v34 }
 0x266   :  { %5519 = vmatpush2.bf16.msra.mxu1 %v7742_v35  ;;  %v7816_v35 = vld [vmem:[#allocation6 + $0x6c4] ss:$16 sps:$4 sm:$0xff]  }
 0x267   :  { %5520 = vmatprep.subr.bf16.mxu1 %v7750_v52  ;;  %v7772_v52 = vld [vmem:[#allocation6 + $0x460] ss:$16 sps:$4 sm:$0xff]  }
 0x268   :  { %5480 = vmatpush2.bf16.msra.mxu0 %v7727_v36  ;;  %v7777_v36 = vld [vmem:[#allocation6 + $0x444] ss:$16 sps:$4 sm:$0xff]  }
 0x269   :  { %5481 = vmatprep.subr.bf16.mxu0 %v7735_v19  ;;  %v7822_v19 = vld [vmem:[#allocation6 + $0x6a4] ss:$16 sps:$4 sm:$0xff]  }
 0x26a   :  { %5521 = vmatpush2.bf16.msra.mxu1 %v7748_v38  ;;  %v7775_v38 = vld [vmem:[#allocation6 + $0x440] ss:$16 sps:$4 sm:$0xff]  }
 0x26b   :  { %5522 = vmatprep.subr.bf16.mxu1 %v7753_v40  ;;  %v7780_v40 = vld [vmem:[#allocation6 + $0x424] ss:$16 sps:$4 sm:$0xff]  }
 0x26c   :  { %5482 = vmatpush2.bf16.msra.mxu0 %v7733_v41  ;;  %v7820_v41 = vld [vmem:[#allocation6 + $0x6a0] ss:$16 sps:$4 sm:$0xff]  }
 0x26d   :  { %5483 = vmatprep.subr.bf16.mxu0 %v7741_v44  ;;  %v7783_v44 = vld [vmem:[#allocation6 + $0x404] ss:$16 sps:$4 sm:$0xff]  }
 0x26e   :  { %5523 = vmatpush2.bf16.msra.mxu1 %v7751_v55  ;;  %v7826_v55 = vld [vmem:[#allocation6 + $0x680] ss:$16 sps:$4 sm:$0xff]  }
 0x26f   :  { %5524 = vmatprep.subr.bf16.mxu1 %v7756_v31  ;;  %v7834_v31 = vld [vmem:[#allocation6 + $0x664] ss:$16 sps:$4 sm:$0xff]  }
 0x270   :  { %5484 = vmatpush2.bf16.msra.mxu0 %v7739_v45  ;;  %v7781_v45 = vld [vmem:[#allocation6 + $0x400] ss:$16 sps:$4 sm:$0xff]  }
 0x271   :  { %5485 = vmatprep.subr.bf16.mxu0 %v7747_v48  ;;  %v7832_v48 = vld [vmem:[#allocation6 + $0x660] ss:$16 sps:$4 sm:$0xff]  }
 0x272   :  { %5525 = vmatpush2.bf16.msra.mxu1 %v7754_v16  ;;  %v7840_v16 = vld [vmem:[#allocation6 + $0x644] ss:$16 sps:$4 sm:$0xff]  }
 0x273   :  { %5526 = vmatprep.subr.bf16.mxu1 %v7759_v49  ;;  %v7784_v49 = vld [vmem:[#allocation6 + $0x5e0] ss:$16 sps:$4 sm:$0xff]  }
 0x274   :  { %5486 = vmatpush2.bf16.msra.mxu0 %v7745_v32  ;;  %v7789_v32 = vld [vmem:[#allocation6 + $0x5c4] ss:$16 sps:$4 sm:$0xff]  }
 0x275   :  { %5537 = vmatprep.subr.bf16.mxu0 %v7762_v54  ;;  %v7787_v54 = vld [vmem:[#allocation6 + $0x5c0] ss:$16 sps:$4 sm:$0xff]  }
 0x276   :  { %5527 = vmatpush2.bf16.msra.mxu1 %v7757_v53  ;;  %v7846_v53 = vld [vmem:[#allocation6 + $0x624] ss:$16 sps:$4 sm:$0xff]  }
 0x277   :  { %5578 = vmatprep.subr.bf16.mxu1 %v7810_v57  ;;  %v3619_v59 = vpop.f32.mrf.mxu0  ;;  %5488 = vmatmul.mubr.bf16.vlgmr.msra.gmra.mxu0 %v8515_v62  ;;  %v7792_v57 = vld [vmem:[#allocation6 + $0x5a4] ss:$16 sps:$4 sm:$0xff]  }
 0x278   :  { %v3620_v1 = vadd.f32 %v3619_v59, %v8460_v11  ;;  %5538 = vmatpush1.bf16.msra.mxu0 %v7760_v61  ;;  %v7844_v61 = vld [vmem:[#allocation6 + $0x620] ss:$16 sps:$4 sm:$0xff]  }
 0x279   :  { %v3660_v2 = vpop.f32.mrf.mxu1  ;;  %v3621_v5 = vpop.f32.mrf.mxu0  ;;  %5539 = vmatprep.subr.bf16.mxu0 %v7765_v58  ;;  %v7852_v58 = vld [vmem:[#allocation6 + $0x604] ss:$16 sps:$4 sm:$0xff]   ;;  %v7790_v59 = vld [vmem:[#allocation6 + $0x5a0] ss:$16 sps:$4 sm:$0xff]  }
 0x27a   :  { %v3661_v7 = vadd.f32 %v3660_v2, %v3620_v1  ;;  %v3622_v8 = vadd.f32 %v3621_v5, %v8463_v21  ;;  %v7774_v21 = vld [vmem:[#allocation6 + $0x464] ss:$16 sps:$4 sm:$0xff]   ;;  %v7850_v2 = vld [vmem:[#allocation6 + $0x600] ss:$16 sps:$4 sm:$0xff]  }
 0x27b   :  { %v3662_v10 = vpop.f32.mrf.mxu1  ;;  %v3623_v13 = vpop.f32.mrf.mxu0  ;;  %v7795_v1 = vld [vmem:[#allocation6 + $0x584] ss:$16 sps:$4 sm:$0xff]  }
 0x27c   :  { %v3875_v14 = vadd.f32 %v3844_v3, %v3661_v7  ;;  %v3663_v15 = vadd.f32 %v3662_v10, %v3622_v8  ;;  %5540 = vmatpush1.bf16.msra.mxu0 %v7763_v4  ;;  %v7858_v3 = vld [vmem:[#allocation6 + $0x7e4] ss:$16 sps:$4 sm:$0xff]   ;;  %v7793_v4 = vld [vmem:[#allocation6 + $0x580] ss:$16 sps:$4 sm:$0xff]  }
 0x27d   :  { %v3664_v11 = vpop.f32.mrf.mxu1  ;;  %v3624_v18 = vpop.f32.mrf.mxu0  ;;  %5541 = vmatprep.subr.bf16.mxu0 %v7768_v6  ;;  %v7798_v5 = vld [vmem:[#allocation6 + $0x564] ss:$16 sps:$4 sm:$0xff]   ;;  %v7856_v6 = vld [vmem:[#allocation6 + $0x7e0] ss:$16 sps:$4 sm:$0xff]  }
 0x27e   :  { %v3876_v23 = vadd.f32 %v3848_v12, %v3663_v15  ;;  %v3883_v26 = vmax.f32 %v3875_v14, 0.0  ;;  %v7864_v7 = vld [vmem:[#allocation6 + $0x7c4] ss:$16 sps:$4 sm:$0xff]   ;;  %v7796_v8 = vld [vmem:[#allocation6 + $0x560] ss:$16 sps:$4 sm:$0xff]  }
 0x27f   :  { %v3665_v24 = vpop.f32.mrf.mxu1  ;;  %v7801_v10 = vld [vmem:[#allocation6 + $0x544] ss:$16 sps:$4 sm:$0xff]   ;;  %v7862_v12 = vld [vmem:[#allocation6 + $0x7c0] ss:$16 sps:$4 sm:$0xff]  }
 0x280   :  { %v3884_v27 = vmax.f32 %v3876_v23, 0.0  ;;  %5542 = vmatpush1.bf16.msra.mxu0 %v7766_v17  ;;  %v8529_v34 = vpack.c.bf16 %v3883_v26, %v3883_v26  ;;  %v7870_v13 = vld [vmem:[#allocation6 + $0x7a4] ss:$16 sps:$4 sm:$0xff]   ;;  %v7799_v14 = vld [vmem:[#allocation6 + $0x540] ss:$16 sps:$4 sm:$0xff]  }
 0x281   :  { %5543 = vmatprep.subr.bf16.mxu0 %v7771_v22  ;;  %v7804_v15 = vld [vmem:[#allocation6 + $0x524] ss:$16 sps:$4 sm:$0xff]   ;;  %v7868_v11 = vld [vmem:[#allocation6 + $0x7a0] ss:$16 sps:$4 sm:$0xff]  }
 0x282   :  { %v8527_v30 = vpack.c.bf16 %v3884_v27, %v3884_v27  ;;  %v7876_v17 = vld [vmem:[#allocation6 + $0x784] ss:$16 sps:$4 sm:$0xff]   ;;  %v7802_v18 = vld [vmem:[#allocation6 + $0x520] ss:$16 sps:$4 sm:$0xff]   ;;  %v7813_v27 = vld [vmem:[#allocation6 + $0xec] ss:$16 sps:$4 sm:$0xff]  }
 0x283   :  { %v7807_v22 = vld [vmem:[#allocation6 + $0x504] ss:$16 sps:$4 sm:$0xff]   ;;  %v7874_v23 = vld [vmem:[#allocation6 + $0x780] ss:$16 sps:$4 sm:$0xff]  }
 0x284   :  { %5528 = vmatprep.mubr.bf16.mxu1 %v8527_v30  ;;  %5544 = vmatpush1.bf16.msra.mxu0 %v7769_v28  ;;  %v7882_v24 = vld [vmem:[#allocation6 + $0x764] ss:$16 sps:$4 sm:$0xff]   ;;  %v7805_v26 = vld [vmem:[#allocation6 + $0x500] ss:$16 sps:$4 sm:$0xff]  }
 0x285   :  { %5529 = vmatmul.mubr.bf16.vlgmr.msra.gmra.mxu1 %v8529_v34  ;;  %5545 = vmatprep.subr.bf16.mxu0 %v7774_v21  ;;  %v7880_v28 = vld [vmem:[#allocation6 + $0x760] ss:$16 sps:$4 sm:$0xff]   ;;  %v7888_v21 = vld [vmem:[#allocation6 + $0x744] ss:$16 sps:$4 sm:$0xff]  }
 0x286   :  { %5579 = vmatpush1.bf16.msra.mxu1 %v7808_v50  ;;  %v3851_v50 = vsub.s32 4, %v8482_v25 }
 0x287   :  { %5580 = vmatprep.subr.bf16.mxu1 %v7816_v35  ;;  %v3855_v35 = vsub.s32 5, %v8482_v25 }
 0x288   :  { %5546 = vmatpush1.bf16.msra.mxu0 %v7772_v52  ;;  %v7886_v52 = vld [vmem:[#allocation6 + $0x740] ss:$16 sps:$4 sm:$0xff]  }
 0x289   :  { %5547 = vmatprep.subr.bf16.mxu0 %v7777_v36 }
 0x28a   :  { %5581 = vmatpush1.bf16.msra.mxu1 %v7814_v37  ;;  %v7894_v37 = vld [vmem:[#allocation6 + $0x724] ss:$16 sps:$4 sm:$0xff]  }
 0x28b   :  { %5582 = vmatprep.subr.bf16.mxu1 %v7822_v19 }
 0x28c   :  { %5548 = vmatpush1.bf16.msra.mxu0 %v7775_v38 }
 0x28d   :  { %5549 = vmatprep.subr.bf16.mxu0 %v7780_v40  ;;  %v3852_v40 = vrot.slane %v8496_v33, %v3851_v50  ;;  %v7891_v50 = vld [vmem:[#allocation6 + $0x14c] ss:$16 sps:$4 sm:$0xff]  }
 0x28e   :  { %5583 = vmatpush1.bf16.msra.mxu1 %v7820_v41 }
 0x28f   :  { %5584 = vmatprep.subr.bf16.mxu1 %v7828_v42 }
 0x290   :  { %5550 = vmatpush1.bf16.msra.mxu0 %v7778_v43 }
 0x291   :  { %5551 = vmatprep.subr.bf16.mxu0 %v7783_v44 }
 0x292   :  { %5585 = vmatpush1.bf16.msra.mxu1 %v7826_v55  ;;  %v3856_v55 = vrot.slane %v8496_v33, %v3855_v35  ;;  %v3859_v35 = vsub.s32 6, %v8482_v25 }
 0x293   :  { %5586 = vmatprep.subr.bf16.mxu1 %v7834_v31  ;;  %v7892_v31 = vld [vmem:[#allocation6 + $0x720] ss:$16 sps:$4 sm:$0xff]  }
 0x294   :  { %5552 = vmatpush1.bf16.msra.mxu0 %v7781_v45 }
 0x295   :  { %5553 = vmatprep.subr.bf16.mxu0 %v7786_v46  ;;  %v7900_v46 = vld [vmem:[#allocation6 + $0x704] ss:$16 sps:$4 sm:$0xff]  }
 0x296   :  { %5587 = vmatpush1.bf16.msra.mxu1 %v7832_v48 }
 0x297   :  { %5588 = vmatprep.subr.bf16.mxu1 %v7840_v16 }
 0x298   :  { %5554 = vmatpush2.bf16.msra.mxu0 %v7784_v49 }
 0x299   :  { %5555 = vmatprep.subr.bf16.mxu0 %v7789_v32 }
 0x29a   :  { %5589 = vmatpush1.bf16.msra.mxu1 %v7838_v51 }
 0x29b   :  { %5590 = vmatprep.subr.bf16.mxu1 %v7846_v53  ;;  %v7898_v53 = vld [vmem:[#allocation6 + $0x700] ss:$16 sps:$4 sm:$0xff]  }
 0x29c   :  { %5556 = vmatpush2.bf16.msra.mxu0 %v7787_v54 }
 0x29d   :  { %5557 = vmatprep.subr.bf16.mxu0 %v7792_v57  ;;  %v7906_v57 = vld [vmem:[#allocation6 + $0x2ec] ss:$16 sps:$4 sm:$0xff]  }
 0x29e   :  { %5591 = vmatpush1.bf16.msra.mxu1 %v7844_v61 }
 0x29f   :  { %5592 = vmatprep.subr.bf16.mxu1 %v7852_v58  ;;  %v7811_v58 = vld [vmem:[#allocation6 + $0xe8] ss:$16 sps:$4 sm:$0xff]  }
 0x2a0   :  { %5558 = vmatpush2.bf16.msra.mxu0 %v7790_v59 }
 0x2a1   :  { %5559 = vmatprep.subr.bf16.mxu0 %v7795_v1  ;;  %v7819_v1 = vld [vmem:[#allocation6 + $0xcc] ss:$16 sps:$4 sm:$0xff]  }
 0x2a2   :  { %5593 = vmatpush1.bf16.msra.mxu1 %v7850_v2  ;;  %v7817_v2 = vld [vmem:[#allocation6 + $0xc8] ss:$16 sps:$4 sm:$0xff]  }
 0x2a3   :  { %5594 = vmatprep.subr.bf16.mxu1 %v7858_v3  ;;  %v7825_v3 = vld [vmem:[#allocation6 + $0xac] ss:$16 sps:$4 sm:$0xff]  }
 0x2a4   :  { %5560 = vmatpush2.bf16.msra.mxu0 %v7793_v4  ;;  %v7823_v4 = vld [vmem:[#allocation6 + $0xa8] ss:$16 sps:$4 sm:$0xff]  }
 0x2a5   :  { %5561 = vmatprep.subr.bf16.mxu0 %v7798_v5  ;;  %v7831_v5 = vld [vmem:[#allocation6 + $0x8c] ss:$16 sps:$4 sm:$0xff]  }
 0x2a6   :  { %5595 = vmatpush2.bf16.msra.mxu1 %v7856_v6  ;;  %v7829_v6 = vld [vmem:[#allocation6 + $0x88] ss:$16 sps:$4 sm:$0xff]  }
 0x2a7   :  { %5596 = vmatprep.subr.bf16.mxu1 %v7864_v7  ;;  %v7837_v7 = vld [vmem:[#allocation6 + $0x6c] ss:$16 sps:$4 sm:$0xff]  }
 0x2a8   :  { %5562 = vmatpush2.bf16.msra.mxu0 %v7796_v8  ;;  %v7835_v8 = vld [vmem:[#allocation6 + $0x68] ss:$16 sps:$4 sm:$0xff]  }
 0x2a9   :  { %5563 = vmatprep.subr.bf16.mxu0 %v7801_v10  ;;  %v7843_v10 = vld [vmem:[#allocation6 + $0x4c] ss:$16 sps:$4 sm:$0xff]  }
 0x2aa   :  { %5597 = vmatpush2.bf16.msra.mxu1 %v7862_v12  ;;  %v7841_v12 = vld [vmem:[#allocation6 + $0x48] ss:$16 sps:$4 sm:$0xff]  }
 0x2ab   :  { %5598 = vmatprep.subr.bf16.mxu1 %v7870_v13  ;;  %v7849_v13 = vld [vmem:[#allocation6 + $0x2c] ss:$16 sps:$4 sm:$0xff]  }
 0x2ac   :  { %5564 = vmatpush2.bf16.msra.mxu0 %v7799_v14  ;;  %v7855_v14 = vld [vmem:[#allocation6 + $0xc] ss:$16 sps:$4 sm:$0xff]  }
 0x2ad   :  { %5565 = vmatprep.subr.bf16.mxu0 %v7804_v15  ;;  %v7853_v15 = vld [vmem:[#allocation6 + $0x8] ss:$16 sps:$4 sm:$0xff]  }
 0x2ae   :  { %5599 = vmatpush2.bf16.msra.mxu1 %v7868_v11  ;;  %v7861_v11 = vld [vmem:[#allocation6 + $0x1ec] ss:$16 sps:$4 sm:$0xff]  }
 0x2af   :  { %5600 = vmatprep.subr.bf16.mxu1 %v7876_v17  ;;  %v7859_v17 = vld [vmem:[#allocation6 + $0x1e8] ss:$16 sps:$4 sm:$0xff]  }
 0x2b0   :  { %5566 = vmatpush2.bf16.msra.mxu0 %v7802_v18  ;;  %v7867_v18 = vld [vmem:[#allocation6 + $0x1cc] ss:$16 sps:$4 sm:$0xff]  }
 0x2b1   :  { %5567 = vmatprep.subr.bf16.mxu0 %v7807_v22  ;;  %v7865_v22 = vld [vmem:[#allocation6 + $0x1c8] ss:$16 sps:$4 sm:$0xff]  }
 0x2b2   :  { %5601 = vmatpush2.bf16.msra.mxu1 %v7874_v23  ;;  %v7873_v23 = vld [vmem:[#allocation6 + $0x1ac] ss:$16 sps:$4 sm:$0xff]  }
 0x2b3   :  { %5602 = vmatprep.subr.bf16.mxu1 %v7882_v24  ;;  %v7871_v24 = vld [vmem:[#allocation6 + $0x1a8] ss:$16 sps:$4 sm:$0xff]  }
 0x2b4   :  { %5568 = vmatpush2.bf16.msra.mxu0 %v7805_v26  ;;  %v7879_v26 = vld [vmem:[#allocation6 + $0x18c] ss:$16 sps:$4 sm:$0xff]  }
 0x2b5   :  { %5619 = vmatprep.subr.bf16.mxu0 %v7813_v27  ;;  %v7877_v27 = vld [vmem:[#allocation6 + $0x188] ss:$16 sps:$4 sm:$0xff]  }
 0x2b6   :  { %5603 = vmatpush2.bf16.msra.mxu1 %v7880_v28  ;;  %v7885_v28 = vld [vmem:[#allocation6 + $0x16c] ss:$16 sps:$4 sm:$0xff]  }
 0x2b7   :  { %v3701_v36 = vpop.f32.mrf.mxu0  ;;  %5604 = vmatprep.subr.bf16.mxu1 %v7888_v21  ;;  %v7883_v21 = vld [vmem:[#allocation6 + $0x168] ss:$16 sps:$4 sm:$0xff]  }
 0x2b8   :  { %v3702_v19 = vadd.f32 %v3701_v36, %v8468_v39  ;;  %v3863_v36 = vsub.s32 7, %v8482_v25  ;;  %v7903_v25 = vld [vmem:[#allocation6 + $0x10c] ss:$16 sps:$4 sm:$0xff]  }
 0x2b9   :  { %v3742_v38 = vpop.f32.mrf.mxu1  ;;  %v3703_v41 = vpop.f32.mrf.mxu0 }
 0x2ba   :  { %v3743_v42 = vadd.f32 %v3742_v38, %v3702_v19  ;;  %v3704_v43 = vadd.f32 %v3703_v41, %v8471_v47  ;;  %5605 = vmatpush2.bf16.msra.mxu1 %v7886_v52  ;;  %v7889_v52 = vld [vmem:[#allocation6 + $0x148] ss:$16 sps:$4 sm:$0xff]   ;;  %v7897_v19 = vld [vmem:[#allocation6 + $0x12c] ss:$16 sps:$4 sm:$0xff]   ;;  %v3860_v41 = vrot.slane %v8496_v33, %v3859_v35 }
 0x2bb   :  { %v3744_v44 = vpop.f32.mrf.mxu1  ;;  %v3705_v45 = vpop.f32.mrf.mxu0  ;;  %5606 = vmatprep.subr.bf16.mxu1 %v7894_v37  ;;  %v7954_v35 = vld [vmem:[#allocation6 + $0x3ec] ss:$16 sps:$4 sm:$0xff]  }
 0x2bc   :  { %v3877_v48 = vadd.f32 %v3852_v40, %v3743_v42  ;;  %v3745_v16 = vadd.f32 %v3744_v44, %v3704_v43  ;;  %v7895_v45 = vld [vmem:[#allocation6 + $0x128] ss:$16 sps:$4 sm:$0xff]  }
 0x2bd   :  { %v3746_v49 = vpop.f32.mrf.mxu1  ;;  %v3706_v32 = vpop.f32.mrf.mxu0 }
 0x2be   :  { %v3878_v39 = vadd.f32 %v3856_v55, %v3745_v16  ;;  %5607 = vmatpush2.bf16.msra.mxu1 %v7892_v31  ;;  %v3885_v54 = vmax.f32 %v3877_v48, 0.0  ;;  %v3864_v31 = vrot.slane %v8496_v33, %v3863_v36  ;;  %v7904_v33 = vld [vmem:[#allocation6 + $0x2e8] ss:$16 sps:$4 sm:$0xff]  }
 0x2bf   :  { %v3747_v51 = vpop.f32.mrf.mxu1  ;;  %5608 = vmatprep.subr.bf16.mxu1 %v7900_v46  ;;  %v7952_v36 = vld [vmem:[#allocation6 + $0x3e8] ss:$16 sps:$4 sm:$0xff]  }
 0x2c0   :  { %v3886_v47 = vmax.f32 %v3878_v39, 0.0  ;;  %v8541_v59 = vpack.c.bf16 %v3885_v54, %v3885_v54  ;;  %v7901_v51 = vld [vmem:[#allocation6 + $0x108] ss:$16 sps:$4 sm:$0xff]   ;;  %v7909_v54 = vld [vmem:[#allocation6 + $0x4ec] ss:$16 sps:$4 sm:$0xff]  }
 0x2c2   :  { %v8539_v61 = vpack.c.bf16 %v3886_v47, %v3886_v47  ;;  %5609 = vmatpush2.bf16.msra.mxu1 %v7898_v53  ;;  %v7907_v47 = vld [vmem:[#allocation6 + $0x4e8] ss:$16 sps:$4 sm:$0xff]  }
 0x2c3   :  { %5660 = vmatprep.subr.bf16.mxu1 %v7906_v57 }
 0x2c4   :  { %5569 = vmatprep.mubr.bf16.mxu0 %v8539_v61 }
 0x2c5   :  { %5570 = vmatmul.mubr.bf16.vlgmr.msra.gmra.mxu0 %v8541_v59 }
 0x2c6   :  { %5620 = vmatpush1.bf16.msra.mxu0 %v7811_v58  ;;  %5651 = vmatprep.mubr.bf16.mxu0 %v8501_v56  ;;  %v7847_v56 = vld [vmem:[#allocation6 + $0x28] ss:$16 sps:$4 sm:$0xff]  }
 0x2c7   :  { %5621 = vmatprep.subr.bf16.mxu0 %v7819_v1  ;;  %v7912_v1 = vld [vmem:[#allocation6 + $0x2cc] ss:$16 sps:$4 sm:$0xff]  }
 0x2ca   :  { %5622 = vmatpush1.bf16.msra.mxu0 %v7817_v2  ;;  %v7915_v2 = vld [vmem:[#allocation6 + $0x4cc] ss:$16 sps:$4 sm:$0xff]  }
 0x2cb   :  { %5623 = vmatprep.subr.bf16.mxu0 %v7825_v3  ;;  %v7910_v3 = vld [vmem:[#allocation6 + $0x2c8] ss:$16 sps:$4 sm:$0xff]  }
 0x2ce   :  { %5624 = vmatpush1.bf16.msra.mxu0 %v7823_v4  ;;  %v7913_v4 = vld [vmem:[#allocation6 + $0x4c8] ss:$16 sps:$4 sm:$0xff]  }
 0x2cf   :  { %5625 = vmatprep.subr.bf16.mxu0 %v7831_v5  ;;  %v7918_v5 = vld [vmem:[#allocation6 + $0x2ac] ss:$16 sps:$4 sm:$0xff]  }
 0x2d2   :  { %5626 = vmatpush1.bf16.msra.mxu0 %v7829_v6  ;;  %v7921_v6 = vld [vmem:[#allocation6 + $0x4ac] ss:$16 sps:$4 sm:$0xff]  }
 0x2d3   :  { %5627 = vmatprep.subr.bf16.mxu0 %v7837_v7  ;;  %v7916_v7 = vld [vmem:[#allocation6 + $0x2a8] ss:$16 sps:$4 sm:$0xff]  }
 0x2d6   :  { %5628 = vmatpush1.bf16.msra.mxu0 %v7835_v8  ;;  %v7919_v8 = vld [vmem:[#allocation6 + $0x4a8] ss:$16 sps:$4 sm:$0xff]  }
 0x2d7   :  { %5629 = vmatprep.subr.bf16.mxu0 %v7843_v10  ;;  %v7927_v10 = vld [vmem:[#allocation6 + $0x48c] ss:$16 sps:$4 sm:$0xff]  }
 0x2da   :  { %5630 = vmatpush1.bf16.msra.mxu0 %v7841_v12  ;;  %v7922_v12 = vld [vmem:[#allocation6 + $0x288] ss:$16 sps:$4 sm:$0xff]  }
 0x2db   :  { %5631 = vmatprep.subr.bf16.mxu0 %v7849_v13  ;;  %v7925_v13 = vld [vmem:[#allocation6 + $0x488] ss:$16 sps:$4 sm:$0xff]  }
 0x2de   :  { %5632 = vmatpush1.bf16.msra.mxu0 %v7847_v56  ;;  %v7928_v56 = vld [vmem:[#allocation6 + $0x268] ss:$16 sps:$4 sm:$0xff]  }
 0x2df   :  { %5633 = vmatprep.subr.bf16.mxu0 %v7855_v14  ;;  %v7931_v14 = vld [vmem:[#allocation6 + $0x468] ss:$16 sps:$4 sm:$0xff]  }
 0x2e2   :  { %5634 = vmatpush1.bf16.msra.mxu0 %v7853_v15  ;;  %v7936_v15 = vld [vmem:[#allocation6 + $0x24c] ss:$16 sps:$4 sm:$0xff]  }
 0x2e3   :  { %5635 = vmatprep.subr.bf16.mxu0 %v7861_v11  ;;  %v7939_v11 = vld [vmem:[#allocation6 + $0x44c] ss:$16 sps:$4 sm:$0xff]  }
 0x2e6   :  { %5636 = vmatpush2.bf16.msra.mxu0 %v7859_v17  ;;  %v7934_v17 = vld [vmem:[#allocation6 + $0x248] ss:$16 sps:$4 sm:$0xff]  }
 0x2e7   :  { %5637 = vmatprep.subr.bf16.mxu0 %v7867_v18  ;;  %v7937_v18 = vld [vmem:[#allocation6 + $0x448] ss:$16 sps:$4 sm:$0xff]  }
 0x2ea   :  { %5638 = vmatpush2.bf16.msra.mxu0 %v7865_v22  ;;  %v7942_v22 = vld [vmem:[#allocation6 + $0x22c] ss:$16 sps:$4 sm:$0xff]  }
 0x2eb   :  { %5639 = vmatprep.subr.bf16.mxu0 %v7873_v23  ;;  %v7945_v23 = vld [vmem:[#allocation6 + $0x42c] ss:$16 sps:$4 sm:$0xff]  }
 0x2ee   :  { %5640 = vmatpush2.bf16.msra.mxu0 %v7871_v24  ;;  %v7940_v24 = vld [vmem:[#allocation6 + $0x228] ss:$16 sps:$4 sm:$0xff]  }
 0x2ef   :  { %5641 = vmatprep.subr.bf16.mxu0 %v7879_v26  ;;  %v7943_v26 = vld [vmem:[#allocation6 + $0x428] ss:$16 sps:$4 sm:$0xff]  }
 0x2f2   :  { %5642 = vmatpush2.bf16.msra.mxu0 %v7877_v27  ;;  %v7948_v27 = vld [vmem:[#allocation6 + $0x20c] ss:$16 sps:$4 sm:$0xff]  }
 0x2f3   :  { %5643 = vmatprep.subr.bf16.mxu0 %v7885_v28  ;;  %v7951_v28 = vld [vmem:[#allocation6 + $0x40c] ss:$16 sps:$4 sm:$0xff]  }
 0x2f6   :  { %5644 = vmatpush2.bf16.msra.mxu0 %v7883_v21  ;;  %v7946_v21 = vld [vmem:[#allocation6 + $0x208] ss:$16 sps:$4 sm:$0xff]  }
 0x2f7   :  { %v3783_v37 = vpop.f32.mrf.mxu0  ;;  %5645 = vmatprep.subr.bf16.mxu0 %v7891_v50  ;;  %v7949_v50 = vld [vmem:[#allocation6 + $0x408] ss:$16 sps:$4 sm:$0xff]  }
 0x2f8   :  { %v3784_v38 = vadd.f32 %v3783_v37, %v8476_v9  ;;  %v7955_v37 = vld [vmem:[#allocation6 + $0x5e8] ss:$16 sps:$4 sm:$0xff]  }
 0x2f9   :  { %v3824_v40 = vpop.f32.mrf.mxu1  ;;  %v3785_v42 = vpop.f32.mrf.mxu0 }
 0x2fa   :  { %v3825_v43 = vadd.f32 %v3824_v40, %v3784_v38  ;;  %v3786_v44 = vadd.f32 %v3785_v42, %v8479_v20  ;;  %5646 = vmatpush2.bf16.msra.mxu0 %v7889_v52  ;;  %v7957_v52 = vld [vmem:[#allocation6 + $0x5ec] ss:$16 sps:$4 sm:$0xff]   ;;  %v7958_v40 = vld [vmem:[#allocation6 + $0x3c8] ss:$16 sps:$4 sm:$0xff]  }
 0x2fb   :  { %v3826_v55 = vpop.f32.mrf.mxu1  ;;  %v3787_v46 = vpop.f32.mrf.mxu0  ;;  %5647 = vmatprep.subr.bf16.mxu0 %v7897_v19  ;;  %v7960_v19 = vld [vmem:[#allocation6 + $0x3cc] ss:$16 sps:$4 sm:$0xff]  }
 0x2fc   :  { %v3879_v48 = vadd.f32 %v3860_v41, %v3825_v43  ;;  %v3827_v16 = vadd.f32 %v3826_v55, %v3786_v44  ;;  %v7963_v38 = vld [vmem:[#allocation6 + $0x5cc] ss:$16 sps:$4 sm:$0xff]   ;;  %v7961_v41 = vld [vmem:[#allocation6 + $0x5c8] ss:$16 sps:$4 sm:$0xff]  }
 0x2fd   :  { %v3828_v49 = vpop.f32.mrf.mxu1  ;;  %v3788_v32 = vpop.f32.mrf.mxu0  ;;  %v7966_v42 = vld [vmem:[#allocation6 + $0x3ac] ss:$16 sps:$4 sm:$0xff]   ;;  %v7964_v44 = vld [vmem:[#allocation6 + $0x3a8] ss:$16 sps:$4 sm:$0xff]  }
 0x2fe   :  { %v3880_v9 = vadd.f32 %v3864_v31, %v3827_v16  ;;  %5648 = vmatpush2.bf16.msra.mxu0 %v7895_v45  ;;  %v3887_v53 = vmax.f32 %v3879_v48, 0.0  ;;  %v7969_v43 = vld [vmem:[#allocation6 + $0x5ac] ss:$16 sps:$4 sm:$0xff]   ;;  %v7967_v55 = vld [vmem:[#allocation6 + $0x5a8] ss:$16 sps:$4 sm:$0xff]  }
 0x2ff   :  { %v3829_v39 = vpop.f32.mrf.mxu1  ;;  %5649 = vmatprep.subr.bf16.mxu0 %v7903_v25  ;;  %v7972_v31 = vld [vmem:[#allocation6 + $0x38c] ss:$16 sps:$4 sm:$0xff]   ;;  %v7970_v46 = vld [vmem:[#allocation6 + $0x388] ss:$16 sps:$4 sm:$0xff]  }
 0x300   :  { %v3888_v20 = vmax.f32 %v3880_v9, 0.0  ;;  %v8554_v58 = vpack.c.bf16 %v3887_v53, %v3887_v53  ;;  %v7975_v45 = vld [vmem:[#allocation6 + $0x58c] ss:$16 sps:$4 sm:$0xff]   ;;  %v7973_v25 = vld [vmem:[#allocation6 + $0x588] ss:$16 sps:$4 sm:$0xff]  }
 0x301   :  { %v7978_v48 = vld [vmem:[#allocation6 + $0x36c] ss:$16 sps:$4 sm:$0xff]   ;;  %v7976_v49 = vld [vmem:[#allocation6 + $0x368] ss:$16 sps:$4 sm:$0xff]  }
 0x302   :  { %v8552_v57 = vpack.c.bf16 %v3888_v20, %v3888_v20  ;;  %5650 = vmatpush2.bf16.msra.mxu0 %v7901_v51  ;;  %v7981_v16 = vld [vmem:[#allocation6 + $0x56c] ss:$16 sps:$4 sm:$0xff]   ;;  %v7979_v32 = vld [vmem:[#allocation6 + $0x568] ss:$16 sps:$4 sm:$0xff]  }
 0x303   :  { %5701 = vmatprep.subr.bf16.mxu0 %v7909_v54  ;;  %v7984_v9 = vld [vmem:[#allocation6 + $0x34c] ss:$16 sps:$4 sm:$0xff]   ;;  %v7982_v51 = vld [vmem:[#allocation6 + $0x348] ss:$16 sps:$4 sm:$0xff]  }
 0x304   :  { %5610 = vmatprep.mubr.bf16.mxu1 %v8552_v57  ;;  %v7987_v39 = vld [vmem:[#allocation6 + $0x54c] ss:$16 sps:$4 sm:$0xff]   ;;  %v7985_v53 = vld [vmem:[#allocation6 + $0x548] ss:$16 sps:$4 sm:$0xff]  }
 0x305   :  { %5652 = vmatmul.mubr.bf16.vlgmr.msra.gmra.mxu0 %v8515_v62  ;;  %5611 = vmatmul.mubr.bf16.vlgmr.msra.gmra.mxu1 %v8554_v58  ;;  %v7924_v62 = vld [vmem:[#allocation6 + $0x28c] ss:$16 sps:$4 sm:$0xff]  }
 0x306   :  { %5661 = vmatpush1.bf16.msra.mxu1 %v7904_v33  ;;  %5702 = vmatpush1.bf16.msra.mxu0 %v7907_v47  ;;  %v7990_v20 = vld [vmem:[#allocation6 + $0x32c] ss:$16 sps:$4 sm:$0xff]  }
 0x307   :  { %5733 = vmatprep.mubr.bf16.mxu0 %v8539_v61  ;;  %5692 = vmatprep.mubr.bf16.mxu1 %v8527_v30  ;;  %v7930_v61 = vld [vmem:[#allocation6 + $0x26c] ss:$16 sps:$4 sm:$0xff]  }
 0x308   :  { %5662 = vmatprep.subr.bf16.mxu1 %v7912_v1  ;;  %5703 = vmatprep.subr.bf16.mxu0 %v7915_v2  ;;  %v7933_v30 = vld [vmem:[#allocation6 + $0x46c] ss:$16 sps:$4 sm:$0xff]   ;;  %v7988_v1 = vld [vmem:[#allocation6 + $0x328] ss:$16 sps:$4 sm:$0xff]  }
 0x309   :  { %v7993_v33 = vld [vmem:[#allocation6 + $0x52c] ss:$16 sps:$4 sm:$0xff]   ;;  %v7991_v2 = vld [vmem:[#allocation6 + $0x528] ss:$16 sps:$4 sm:$0xff]  }
 0x30a   :  { %5663 = vmatpush1.bf16.msra.mxu1 %v7910_v3  ;;  %5704 = vmatpush1.bf16.msra.mxu0 %v7913_v4  ;;  %v7996_v4 = vld [vmem:[#allocation6 + $0x30c] ss:$16 sps:$4 sm:$0xff]  }
 0x30b   :  { %5664 = vmatprep.subr.bf16.mxu1 %v7918_v5  ;;  %5705 = vmatprep.subr.bf16.mxu0 %v7921_v6  ;;  %v7999_v5 = vld [vmem:[#allocation6 + $0x50c] ss:$16 sps:$4 sm:$0xff]   ;;  %v8564_v6 = vld [vmem:[%s8626_s6] sm:$0xf] }
 0x30e   :  { %5665 = vmatpush1.bf16.msra.mxu1 %v7916_v7  ;;  %5706 = vmatpush1.bf16.msra.mxu0 %v7919_v8  ;;  %v7994_v8 = vld [vmem:[#allocation6 + $0x308] ss:$16 sps:$4 sm:$0xff]  }
 0x30f   :  { %5666 = vmatprep.subr.bf16.mxu1 %v7924_v62  ;;  %5707 = vmatprep.subr.bf16.mxu0 %v7927_v10  ;;  %v7997_v62 = vld [vmem:[#allocation6 + $0x508] ss:$16 sps:$4 sm:$0xff]   ;;  %v8002_v10 = vld [vmem:[#allocation6 + $0x6ec] ss:$16 sps:$4 sm:$0xff]  }
 0x312   :  { %5667 = vmatpush1.bf16.msra.mxu1 %v7922_v12  ;;  %5708 = vmatpush1.bf16.msra.mxu0 %v7925_v13  ;;  %v8050_v12 = vld [vmem:[#allocation7 + $0xe4] ss:$16 sps:$4 sm:$0xff]   ;;  %v4158_v13 = vrot.slane %v8564_v6, %v8507_v63 }
 0x313   :  { %5668 = vmatprep.subr.bf16.mxu1 %v7930_v61  ;;  %5709 = vmatprep.subr.bf16.mxu0 %v7933_v30  ;;  %v4162_v61 = vrot.slane %v8564_v6, %v8485_v29  ;;  %v8000_v30 = vld [vmem:[#allocation6 + $0x6e8] ss:$16 sps:$4 sm:$0xff]  }
 0x316   :  { %5669 = vmatpush1.bf16.msra.mxu1 %v7928_v56  ;;  %5710 = vmatpush1.bf16.msra.mxu0 %v7931_v14  ;;  %v8005_v56 = vld [vmem:[#allocation6 + $0x6cc] ss:$16 sps:$4 sm:$0xff]   ;;  %v8048_v14 = vld [vmem:[#allocation7 + $0xe0] ss:$16 sps:$4 sm:$0xff]  }
 0x317   :  { %5670 = vmatprep.subr.bf16.mxu1 %v7936_v15  ;;  %5711 = vmatprep.subr.bf16.mxu0 %v7939_v11  ;;  %v8053_v11 = vld [vmem:[#allocation7 + $0xc4] ss:$16 sps:$4 sm:$0xff]  }
 0x31a   :  { %5671 = vmatpush1.bf16.msra.mxu1 %v7934_v17  ;;  %5712 = vmatpush1.bf16.msra.mxu0 %v7937_v18 }
 0x31b   :  { %5672 = vmatprep.subr.bf16.mxu1 %v7942_v22  ;;  %5713 = vmatprep.subr.bf16.mxu0 %v7945_v23  ;;  %v8003_v23 = vld [vmem:[#allocation6 + $0x6c8] ss:$16 sps:$4 sm:$0xff]  }
 0x31e   :  { %5673 = vmatpush1.bf16.msra.mxu1 %v7940_v24  ;;  %5714 = vmatpush1.bf16.msra.mxu0 %v7943_v26  ;;  %v8008_v26 = vld [vmem:[#allocation6 + $0x6ac] ss:$16 sps:$4 sm:$0xff]  }
 0x31f   :  { %5674 = vmatprep.subr.bf16.mxu1 %v7948_v27  ;;  %5715 = vmatprep.subr.bf16.mxu0 %v7951_v28  ;;  %v8051_v27 = vld [vmem:[#allocation7 + $0xc0] ss:$16 sps:$4 sm:$0xff]  }
 0x322   :  { %5675 = vmatpush1.bf16.msra.mxu1 %v7946_v21  ;;  %5716 = vmatpush1.bf16.msra.mxu0 %v7949_v50  ;;  %v8056_v21 = vld [vmem:[#allocation7 + $0xa4] ss:$16 sps:$4 sm:$0xff]  }
 0x323   :  { %5676 = vmatprep.subr.bf16.mxu1 %v7954_v35  ;;  %5717 = vmatprep.subr.bf16.mxu0 %v7957_v52  ;;  %v8011_v35 = vld [vmem:[#allocation6 + $0x68c] ss:$16 sps:$4 sm:$0xff]   ;;  %v8054_v52 = vld [vmem:[#allocation7 + $0xa0] ss:$16 sps:$4 sm:$0xff]  }
 0x326   :  { %5677 = vmatpush2.bf16.msra.mxu1 %v7952_v36  ;;  %5718 = vmatpush2.bf16.msra.mxu0 %v7955_v37  ;;  %v8009_v36 = vld [vmem:[#allocation6 + $0x688] ss:$16 sps:$4 sm:$0xff]   ;;  %v8014_v37 = vld [vmem:[#allocation6 + $0x66c] ss:$16 sps:$4 sm:$0xff]  }
 0x327   :  { %5678 = vmatprep.subr.bf16.mxu1 %v7960_v19  ;;  %5719 = vmatprep.subr.bf16.mxu0 %v7963_v38  ;;  %v8057_v19 = vld [vmem:[#allocation7 + $0x80] ss:$16 sps:$4 sm:$0xff]   ;;  %v8062_v38 = vld [vmem:[#allocation7 + $0x64] ss:$16 sps:$4 sm:$0xff]  }
 0x32a   :  { %5679 = vmatpush2.bf16.msra.mxu1 %v7958_v40  ;;  %5720 = vmatpush2.bf16.msra.mxu0 %v7961_v41  ;;  %v8012_v40 = vld [vmem:[#allocation6 + $0x668] ss:$16 sps:$4 sm:$0xff]   ;;  %v8017_v41 = vld [vmem:[#allocation6 + $0x64c] ss:$16 sps:$4 sm:$0xff]  }
 0x32b   :  { %5680 = vmatprep.subr.bf16.mxu1 %v7966_v42  ;;  %5721 = vmatprep.subr.bf16.mxu0 %v7969_v43  ;;  %v8060_v42 = vld [vmem:[#allocation7 + $0x60] ss:$16 sps:$4 sm:$0xff]   ;;  %v8065_v43 = vld [vmem:[#allocation7 + $0x44] ss:$16 sps:$4 sm:$0xff]  }
 0x32e   :  { %5681 = vmatpush2.bf16.msra.mxu1 %v7964_v44  ;;  %5722 = vmatpush2.bf16.msra.mxu0 %v7967_v55  ;;  %v8015_v44 = vld [vmem:[#allocation6 + $0x648] ss:$16 sps:$4 sm:$0xff]   ;;  %v8020_v55 = vld [vmem:[#allocation6 + $0x62c] ss:$16 sps:$4 sm:$0xff]  }
 0x32f   :  { %5682 = vmatprep.subr.bf16.mxu1 %v7972_v31  ;;  %5723 = vmatprep.subr.bf16.mxu0 %v7975_v45  ;;  %v8063_v31 = vld [vmem:[#allocation7 + $0x40] ss:$16 sps:$4 sm:$0xff]   ;;  %v8068_v45 = vld [vmem:[#allocation7 + $0x24] ss:$16 sps:$4 sm:$0xff]  }
 0x332   :  { %5683 = vmatpush2.bf16.msra.mxu1 %v7970_v46  ;;  %5724 = vmatpush2.bf16.msra.mxu0 %v7973_v25  ;;  %v8018_v46 = vld [vmem:[#allocation6 + $0x628] ss:$16 sps:$4 sm:$0xff]   ;;  %v8023_v25 = vld [vmem:[#allocation6 + $0x60c] ss:$16 sps:$4 sm:$0xff]  }
 0x333   :  { %5684 = vmatprep.subr.bf16.mxu1 %v7978_v48  ;;  %5725 = vmatprep.subr.bf16.mxu0 %v7981_v16  ;;  %v8066_v48 = vld [vmem:[#allocation7 + $0x20] ss:$16 sps:$4 sm:$0xff]   ;;  %v8071_v16 = vld [vmem:[#allocation7 + $0x4] ss:$16 sps:$4 sm:$0xff]  }
 0x336   :  { %5685 = vmatpush2.bf16.msra.mxu1 %v7976_v49  ;;  %5726 = vmatpush2.bf16.msra.mxu0 %v7979_v32  ;;  %v8021_v49 = vld [vmem:[#allocation6 + $0x608] ss:$16 sps:$4 sm:$0xff]   ;;  %v8026_v32 = vld [vmem:[#allocation6 + $0x7ec] ss:$16 sps:$4 sm:$0xff]  }
 0x337   :  { %v5489_v54 = vpop.f32.mrf.mxu0  ;;  %5686 = vmatprep.subr.bf16.mxu1 %v7984_v9  ;;  %5727 = vmatprep.subr.bf16.mxu0 %v7987_v39  ;;  %v8069_v9 = vld [vmem:[#allocation7] ss:$16 sps:$4 sm:$0xff]   ;;  %v8074_v39 = vld [vmem:[#allocation7 + $0x1e4] ss:$16 sps:$4 sm:$0xff]  }
 0x338   :  { %v5490_v15 = vadd.f32 %v5489_v54, %v4158_v13  ;;  %v8072_v54 = vld [vmem:[#allocation7 + $0x1e0] ss:$16 sps:$4 sm:$0xff]   ;;  %v8036_v13 = vld [vmem:[#allocation6 + $0x768] ss:$16 sps:$4 sm:$0xff]  }
 0x339   :  { %v5491_v47 = vpop.f32.mrf.mxu0 }
 0x33a   :  { %5687 = vmatpush2.bf16.msra.mxu1 %v7982_v51  ;;  %5728 = vmatpush2.bf16.msra.mxu0 %v7985_v53  ;;  %v5492_v18 = vadd.f32 %v5491_v47, %v4162_v61  ;;  %v8024_v51 = vld [vmem:[#allocation6 + $0x7e8] ss:$16 sps:$4 sm:$0xff]   ;;  %v8029_v53 = vld [vmem:[#allocation6 + $0x7cc] ss:$16 sps:$4 sm:$0xff]  }
 0x33b   :  { %v5493_v3 = vpop.f32.mrf.mxu0  ;;  %5688 = vmatprep.subr.bf16.mxu1 %v7990_v20  ;;  %5729 = vmatprep.subr.bf16.mxu0 %v7993_v33  ;;  %v8077_v20 = vld [vmem:[#allocation7 + $0x1c4] ss:$16 sps:$4 sm:$0xff]   ;;  %v8027_v33 = vld [vmem:[#allocation6 + $0x7c8] ss:$16 sps:$4 sm:$0xff]   ;;  %v8032_v47 = vld [vmem:[#allocation6 + $0x7ac] ss:$16 sps:$4 sm:$0xff]  }
 0x33c   :  { %v8030_v3 = vld [vmem:[#allocation6 + $0x7a8] ss:$16 sps:$4 sm:$0xff]   ;;  %v8041_v61 = vld [vmem:[#allocation6 + $0x74c] ss:$16 sps:$4 sm:$0xff]  }
 0x33d   :  { %v5494_v7 = vpop.f32.mrf.mxu0 }
 0x33e   :  { %5689 = vmatpush2.bf16.msra.mxu1 %v7988_v1  ;;  %5730 = vmatpush2.bf16.msra.mxu0 %v7991_v2  ;;  %v8075_v1 = vld [vmem:[#allocation7 + $0x1c0] ss:$16 sps:$4 sm:$0xff]   ;;  %v8080_v2 = vld [vmem:[#allocation7 + $0x1a4] ss:$16 sps:$4 sm:$0xff]  }
 0x33f   :  { %5690 = vmatprep.subr.bf16.mxu1 %v7996_v4  ;;  %5731 = vmatprep.subr.bf16.mxu0 %v7999_v5  ;;  %v8035_v4 = vld [vmem:[#allocation6 + $0x78c] ss:$16 sps:$4 sm:$0xff]   ;;  %v8078_v5 = vld [vmem:[#allocation7 + $0x1a0] ss:$16 sps:$4 sm:$0xff]   ;;  %v8083_v7 = vld [vmem:[#allocation7 + $0x184] ss:$16 sps:$4 sm:$0xff]  }
 0x342   :  { %5691 = vmatpush2.bf16.msra.mxu1 %v7994_v8  ;;  %5732 = vmatpush2.bf16.msra.mxu0 %v7997_v62  ;;  %v8033_v8 = vld [vmem:[#allocation6 + $0x788] ss:$16 sps:$4 sm:$0xff]   ;;  %v8038_v62 = vld [vmem:[#allocation6 + $0x76c] ss:$16 sps:$4 sm:$0xff]  }
 0x343   :  { %5742 = vmatprep.subr.bf16.mxu1 %v8002_v10  ;;  %6581 = vmatprep.subr.bf16.mxu0 %v8050_v12  ;;  %v8081_v10 = vld [vmem:[#allocation7 + $0x180] ss:$16 sps:$4 sm:$0xff]   ;;  %v8086_v12 = vld [vmem:[#allocation7 + $0x164] ss:$16 sps:$4 sm:$0xff]  }
 0x345   :  { %5693 = vmatmul.mubr.bf16.vlgmr.msra.gmra.mxu1 %v8529_v34  ;;  %5734 = vmatmul.mubr.bf16.vlgmr.msra.gmra.mxu0 %v8541_v59  ;;  %v5530_v17 = vpop.f32.mrf.mxu1  ;;  %v8006_v59 = vld [vmem:[#allocation6 + $0x6a8] ss:$16 sps:$4 sm:$0xff]  }
 0x346   :  { %v8572_v22 = vadd.f32 %v5530_v17, %v5490_v15  ;;  %5743 = vmatpush1.bf16.msra.mxu1 %v8000_v30  ;;  %5774 = vmatprep.mubr.bf16.mxu1 %v8552_v57  ;;  %v8059_v57 = vld [vmem:[#allocation7 + $0x84] ss:$16 sps:$4 sm:$0xff]   ;;  %v8084_v30 = vld [vmem:[#allocation7 + $0x160] ss:$16 sps:$4 sm:$0xff]   ;;  %v8044_v15 = vld [vmem:[#allocation6 + $0x72c] ss:$16 sps:$4 sm:$0xff]  }
 0x347   :  { %v5532_v24 = vpop.f32.mrf.mxu1  ;;  %5744 = vmatprep.subr.bf16.mxu1 %v8005_v56  ;;  %6582 = vmatpush1.bf16.msra.mxu0 %v8048_v14  ;;  %v8089_v56 = vld [vmem:[#allocation7 + $0x144] ss:$16 sps:$4 sm:$0xff]   ;;  %v8039_v14 = vld [vmem:[#allocation6 + $0x748] ss:$16 sps:$4 sm:$0xff]  }
 0x348   :  { %v8575_v28 = vadd.f32 %v5532_v24, %v5492_v18  ;;  %6583 = vmatprep.subr.bf16.mxu0 %v8053_v11  ;;  %v8087_v11 = vld [vmem:[#allocation7 + $0x140] ss:$16 sps:$4 sm:$0xff]   ;;  %v8092_v17 = vld [vmem:[#allocation7 + $0x124] ss:$16 sps:$4 sm:$0xff]   ;;  %v8042_v18 = vld [vmem:[#allocation6 + $0x728] ss:$16 sps:$4 sm:$0xff]  }
 0x349   :  { %v5534_v34 = vpop.f32.mrf.mxu1  ;;  %v8090_v24 = vld [vmem:[#allocation7 + $0x120] ss:$16 sps:$4 sm:$0xff]  }
 0x34a   :  { %5745 = vmatpush1.bf16.msra.mxu1 %v8003_v23  ;;  %v8047_v23 = vld [vmem:[#allocation6 + $0x70c] ss:$16 sps:$4 sm:$0xff]  }
 0x34b   :  { %v5535_v50 = vpop.f32.mrf.mxu1  ;;  %5746 = vmatprep.subr.bf16.mxu1 %v8008_v26  ;;  %6584 = vmatpush1.bf16.msra.mxu0 %v8051_v27  ;;  %v8095_v26 = vld [vmem:[#allocation7 + $0x104] ss:$16 sps:$4 sm:$0xff]   ;;  %v8045_v27 = vld [vmem:[#allocation6 + $0x708] ss:$16 sps:$4 sm:$0xff]   ;;  %v8098_v34 = vld [vmem:[#allocation7 + $0xec] ss:$16 sps:$4 sm:$0xff]  }
 0x34c   :  { %6585 = vmatprep.subr.bf16.mxu0 %v8056_v21  ;;  %v8093_v21 = vld [vmem:[#allocation7 + $0x100] ss:$16 sps:$4 sm:$0xff]  }
 0x34e   :  { %5747 = vmatpush1.bf16.msra.mxu1 %v8006_v59 }
 0x34f   :  { %5748 = vmatprep.subr.bf16.mxu1 %v8011_v35  ;;  %6586 = vmatpush1.bf16.msra.mxu0 %v8054_v52 }
 0x350   :  { %6587 = vmatprep.subr.bf16.mxu0 %v8059_v57 }
 0x352   :  { %5749 = vmatpush1.bf16.msra.mxu1 %v8009_v36  ;;  %v8144_v36 = vld [vmem:[#allocation7 + $0x2e0] ss:$16 sps:$4 sm:$0xff]  }
 0x353   :  { %5750 = vmatprep.subr.bf16.mxu1 %v8014_v37  ;;  %6588 = vmatpush1.bf16.msra.mxu0 %v8057_v19  ;;  %v8146_v37 = vld [vmem:[#allocation7 + $0x2e4] ss:$16 sps:$4 sm:$0xff]   ;;  %v8147_v19 = vld [vmem:[#allocation7 + $0x2c0] ss:$16 sps:$4 sm:$0xff]  }
 0x354   :  { %6589 = vmatprep.subr.bf16.mxu0 %v8062_v38  ;;  %v8149_v38 = vld [vmem:[#allocation7 + $0x2c4] ss:$16 sps:$4 sm:$0xff]  }
 0x356   :  { %5751 = vmatpush1.bf16.msra.mxu1 %v8012_v40  ;;  %v8152_v40 = vld [vmem:[#allocation7 + $0x2a4] ss:$16 sps:$4 sm:$0xff]  }
 0x357   :  { %5752 = vmatprep.subr.bf16.mxu1 %v8017_v41  ;;  %6590 = vmatpush1.bf16.msra.mxu0 %v8060_v42  ;;  %v8150_v41 = vld [vmem:[#allocation7 + $0x2a0] ss:$16 sps:$4 sm:$0xff]   ;;  %v8155_v42 = vld [vmem:[#allocation7 + $0x284] ss:$16 sps:$4 sm:$0xff]  }
 0x358   :  { %6591 = vmatprep.subr.bf16.mxu0 %v8065_v43  ;;  %v8156_v43 = vld [vmem:[#allocation7 + $0x260] ss:$16 sps:$4 sm:$0xff]  }
 0x35a   :  { %5753 = vmatpush1.bf16.msra.mxu1 %v8015_v44  ;;  %v8161_v44 = vld [vmem:[#allocation7 + $0x244] ss:$16 sps:$4 sm:$0xff]  }
 0x35b   :  { %5754 = vmatprep.subr.bf16.mxu1 %v8020_v55  ;;  %6592 = vmatpush1.bf16.msra.mxu0 %v8063_v31  ;;  %v8159_v55 = vld [vmem:[#allocation7 + $0x240] ss:$16 sps:$4 sm:$0xff]   ;;  %v8164_v31 = vld [vmem:[#allocation7 + $0x224] ss:$16 sps:$4 sm:$0xff]  }
 0x35c   :  { %6593 = vmatprep.subr.bf16.mxu0 %v8068_v45  ;;  %v8162_v45 = vld [vmem:[#allocation7 + $0x220] ss:$16 sps:$4 sm:$0xff]  }
 0x35e   :  { %5755 = vmatpush1.bf16.msra.mxu1 %v8018_v46  ;;  %v8167_v46 = vld [vmem:[#allocation7 + $0x204] ss:$16 sps:$4 sm:$0xff]  }
 0x35f   :  { %5756 = vmatprep.subr.bf16.mxu1 %v8023_v25  ;;  %6594 = vmatpush1.bf16.msra.mxu0 %v8066_v48  ;;  %v8165_v25 = vld [vmem:[#allocation7 + $0x200] ss:$16 sps:$4 sm:$0xff]   ;;  %v8170_v48 = vld [vmem:[#allocation7 + $0x3e4] ss:$16 sps:$4 sm:$0xff]  }
 0x360   :  { %6595 = vmatprep.subr.bf16.mxu0 %v8071_v16  ;;  %v8168_v16 = vld [vmem:[#allocation7 + $0x3e0] ss:$16 sps:$4 sm:$0xff]  }
 0x362   :  { %5757 = vmatpush1.bf16.msra.mxu1 %v8021_v49  ;;  %v8173_v49 = vld [vmem:[#allocation7 + $0x3c4] ss:$16 sps:$4 sm:$0xff]  }
 0x363   :  { %5758 = vmatprep.subr.bf16.mxu1 %v8026_v32  ;;  %6596 = vmatpush1.bf16.msra.mxu0 %v8069_v9  ;;  %v8171_v32 = vld [vmem:[#allocation7 + $0x3c0] ss:$16 sps:$4 sm:$0xff]   ;;  %v8176_v9 = vld [vmem:[#allocation7 + $0x3a4] ss:$16 sps:$4 sm:$0xff]  }
 0x364   :  { %6597 = vmatprep.subr.bf16.mxu0 %v8074_v39  ;;  %v8174_v39 = vld [vmem:[#allocation7 + $0x3a0] ss:$16 sps:$4 sm:$0xff]  }
 0x366   :  { %5759 = vmatpush2.bf16.msra.mxu1 %v8024_v51  ;;  %v8179_v51 = vld [vmem:[#allocation7 + $0x384] ss:$16 sps:$4 sm:$0xff]  }
 0x367   :  { %5760 = vmatprep.subr.bf16.mxu1 %v8029_v53  ;;  %6598 = vmatpush2.bf16.msra.mxu0 %v8072_v54  ;;  %v8177_v53 = vld [vmem:[#allocation7 + $0x380] ss:$16 sps:$4 sm:$0xff]   ;;  %v8182_v54 = vld [vmem:[#allocation7 + $0x364] ss:$16 sps:$4 sm:$0xff]  }
 0x368   :  { %6599 = vmatprep.subr.bf16.mxu0 %v8077_v20  ;;  %v8180_v20 = vld [vmem:[#allocation7 + $0x360] ss:$16 sps:$4 sm:$0xff]  }
 0x36a   :  { %5761 = vmatpush2.bf16.msra.mxu1 %v8027_v33  ;;  %v8185_v33 = vld [vmem:[#allocation7 + $0x344] ss:$16 sps:$4 sm:$0xff]  }
 0x36b   :  { %5762 = vmatprep.subr.bf16.mxu1 %v8032_v47  ;;  %6600 = vmatpush2.bf16.msra.mxu0 %v8075_v1  ;;  %v8183_v47 = vld [vmem:[#allocation7 + $0x340] ss:$16 sps:$4 sm:$0xff]  }
 0x36c   :  { %6601 = vmatprep.subr.bf16.mxu0 %v8080_v2 }
 0x36e   :  { %5763 = vmatpush2.bf16.msra.mxu1 %v8030_v3  ;;  %v8188_v3 = vld [vmem:[#allocation7 + $0x324] ss:$16 sps:$4 sm:$0xff]  }
 0x36f   :  { %5764 = vmatprep.subr.bf16.mxu1 %v8035_v4  ;;  %6602 = vmatpush2.bf16.msra.mxu0 %v8078_v5 }
 0x370   :  { %6603 = vmatprep.subr.bf16.mxu0 %v8083_v7  ;;  %v8186_v7 = vld [vmem:[#allocation7 + $0x320] ss:$16 sps:$4 sm:$0xff]  }
 0x372   :  { %5765 = vmatpush2.bf16.msra.mxu1 %v8033_v8 }
 0x373   :  { %5766 = vmatprep.subr.bf16.mxu1 %v8038_v62  ;;  %6604 = vmatpush2.bf16.msra.mxu0 %v8081_v10 }
 0x374   :  { %6605 = vmatprep.subr.bf16.mxu0 %v8086_v12 }
 0x376   :  { %5767 = vmatpush2.bf16.msra.mxu1 %v8036_v13 }
 0x377   :  { %5768 = vmatprep.subr.bf16.mxu1 %v8041_v61  ;;  %6606 = vmatpush2.bf16.msra.mxu0 %v8084_v30  ;;  %v8191_v30 = vld [vmem:[#allocation7 + $0x304] ss:$16 sps:$4 sm:$0xff]  }
 0x378   :  { %6607 = vmatprep.subr.bf16.mxu0 %v8089_v56 }
 0x37a   :  { %5769 = vmatpush2.bf16.msra.mxu1 %v8039_v14  ;;  %v8189_v14 = vld [vmem:[#allocation7 + $0x300] ss:$16 sps:$4 sm:$0xff]  }
 0x37b   :  { %5770 = vmatprep.subr.bf16.mxu1 %v8044_v15  ;;  %6608 = vmatpush2.bf16.msra.mxu0 %v8087_v11 }
 0x37c   :  { %6609 = vmatprep.subr.bf16.mxu0 %v8092_v17 }
 0x37e   :  { %5771 = vmatpush2.bf16.msra.mxu1 %v8042_v18 }
 0x37f   :  { %5772 = vmatprep.subr.bf16.mxu1 %v8047_v23  ;;  %6610 = vmatpush2.bf16.msra.mxu0 %v8090_v24  ;;  %v8101_v23 = vld [vmem:[#allocation7 + $0xcc] ss:$16 sps:$4 sm:$0xff]  }
 0x380   :  { %6611 = vmatprep.subr.bf16.mxu0 %v8095_v26  ;;  %v8194_v24 = vld [vmem:[#allocation7 + $0x2ec] ss:$16 sps:$4 sm:$0xff]   ;;  %v8099_v26 = vld [vmem:[#allocation7 + $0xc8] ss:$16 sps:$4 sm:$0xff]  }
 0x382   :  { %5773 = vmatpush2.bf16.msra.mxu1 %v8045_v27  ;;  %v8104_v27 = vld [vmem:[#allocation7 + $0xac] ss:$16 sps:$4 sm:$0xff]  }
 0x383   :  { %6612 = vmatpush2.bf16.msra.mxu0 %v8093_v21  ;;  %6622 = vmatprep.subr.bf16.mxu1 %v8146_v37  ;;  %v8102_v21 = vld [vmem:[#allocation7 + $0xa8] ss:$16 sps:$4 sm:$0xff]  }
 0x384   :  { %6663 = vmatprep.subr.bf16.mxu0 %v8098_v34  ;;  %v8107_v34 = vld [vmem:[#allocation7 + $0x8c] ss:$16 sps:$4 sm:$0xff]   ;;  %v8114_v37 = vld [vmem:[#allocation7 + $0x28] ss:$16 sps:$4 sm:$0xff]  }
 0x385   :  { %5775 = vmatmul.mubr.bf16.vlgmr.msra.gmra.mxu1 %v8554_v58  ;;  %v5571_v59 = vpop.f32.mrf.mxu0  ;;  %v8153_v58 = vld [vmem:[#allocation7 + $0x280] ss:$16 sps:$4 sm:$0xff]  }
 0x386   :  { %v8579_v50 = vadd.f32 %v5571_v59, %v8572_v22  ;;  %6623 = vmatpush1.bf16.msra.mxu1 %v8144_v36  ;;  %v8158_v22 = vld [vmem:[#allocation7 + $0x264] ss:$16 sps:$4 sm:$0xff]   ;;  %v8105_v59 = vld [vmem:[#allocation7 + $0x88] ss:$16 sps:$4 sm:$0xff]   ;;  %v8116_v36 = vld [vmem:[#allocation7 + $0x2c] ss:$16 sps:$4 sm:$0xff]  }
 0x387   :  { %v5573_v35 = vpop.f32.mrf.mxu0  ;;  %6624 = vmatprep.subr.bf16.mxu1 %v8149_v38  ;;  %v8117_v38 = vld [vmem:[#allocation7 + $0x8] ss:$16 sps:$4 sm:$0xff]  }
 0x388   :  { %v5574_v4 = vadd.f32 %v5573_v35, %v8575_v28  ;;  %v8096_v28 = vld [vmem:[#allocation7 + $0xe8] ss:$16 sps:$4 sm:$0xff]  }
 0x389   :  { %v5575_v52 = vpop.f32.mrf.mxu0  ;;  %v8108_v35 = vld [vmem:[#allocation7 + $0x68] ss:$16 sps:$4 sm:$0xff]  }
 0x38a   :  { %6625 = vmatpush1.bf16.msra.mxu1 %v8147_v19  ;;  %v8113_v52 = vld [vmem:[#allocation7 + $0x4c] ss:$16 sps:$4 sm:$0xff]  }
 0x38b   :  { %v5576_v57 = vpop.f32.mrf.mxu0  ;;  %6626 = vmatprep.subr.bf16.mxu1 %v8152_v40  ;;  %v8119_v19 = vld [vmem:[#allocation7 + $0xc] ss:$16 sps:$4 sm:$0xff]  }
 0x38c   :  { %v8111_v57 = vld [vmem:[#allocation7 + $0x48] ss:$16 sps:$4 sm:$0xff]   ;;  %v8122_v40 = vld [vmem:[#allocation7 + $0x1ec] ss:$16 sps:$4 sm:$0xff]  }
 0x38e   :  { %6627 = vmatpush1.bf16.msra.mxu1 %v8150_v41  ;;  %v8120_v41 = vld [vmem:[#allocation7 + $0x1e8] ss:$16 sps:$4 sm:$0xff]  }
 0x38f   :  { %6628 = vmatprep.subr.bf16.mxu1 %v8155_v42  ;;  %v8125_v42 = vld [vmem:[#allocation7 + $0x1cc] ss:$16 sps:$4 sm:$0xff]  }
 0x392   :  { %6629 = vmatpush1.bf16.msra.mxu1 %v8153_v58  ;;  %v8123_v58 = vld [vmem:[#allocation7 + $0x1c8] ss:$16 sps:$4 sm:$0xff]  }
 0x393   :  { %6630 = vmatprep.subr.bf16.mxu1 %v8158_v22  ;;  %v8128_v22 = vld [vmem:[#allocation7 + $0x1ac] ss:$16 sps:$4 sm:$0xff]  }
 0x396   :  { %6631 = vmatpush1.bf16.msra.mxu1 %v8156_v43  ;;  %v8126_v43 = vld [vmem:[#allocation7 + $0x1a8] ss:$16 sps:$4 sm:$0xff]  }
 0x397   :  { %6632 = vmatprep.subr.bf16.mxu1 %v8161_v44  ;;  %v8131_v44 = vld [vmem:[#allocation7 + $0x18c] ss:$16 sps:$4 sm:$0xff]  }
 0x39a   :  { %6633 = vmatpush1.bf16.msra.mxu1 %v8159_v55  ;;  %v8129_v55 = vld [vmem:[#allocation7 + $0x188] ss:$16 sps:$4 sm:$0xff]  }
 0x39b   :  { %6634 = vmatprep.subr.bf16.mxu1 %v8164_v31  ;;  %v8134_v31 = vld [vmem:[#allocation7 + $0x16c] ss:$16 sps:$4 sm:$0xff]  }
 0x39e   :  { %6635 = vmatpush1.bf16.msra.mxu1 %v8162_v45  ;;  %v8132_v45 = vld [vmem:[#allocation7 + $0x168] ss:$16 sps:$4 sm:$0xff]  }
 0x39f   :  { %6636 = vmatprep.subr.bf16.mxu1 %v8167_v46  ;;  %v8137_v46 = vld [vmem:[#allocation7 + $0x14c] ss:$16 sps:$4 sm:$0xff]  }
 0x3a2   :  { %6637 = vmatpush1.bf16.msra.mxu1 %v8165_v25  ;;  %v4166_v25 = vrot.slane %v8564_v6, %v8513_v60 }
 0x3a3   :  { %6638 = vmatprep.subr.bf16.mxu1 %v8170_v48  ;;  %v8135_v48 = vld [vmem:[#allocation7 + $0x148] ss:$16 sps:$4 sm:$0xff]  }
 0x3a6   :  { %6639 = vmatpush2.bf16.msra.mxu1 %v8168_v16  ;;  %v8140_v16 = vld [vmem:[#allocation7 + $0x12c] ss:$16 sps:$4 sm:$0xff]  }
 0x3a7   :  { %6640 = vmatprep.subr.bf16.mxu1 %v8173_v49 }
 0x3aa   :  { %6641 = vmatpush2.bf16.msra.mxu1 %v8171_v32  ;;  %v8138_v32 = vld [vmem:[#allocation7 + $0x128] ss:$16 sps:$4 sm:$0xff]  }
 0x3ab   :  { %6642 = vmatprep.subr.bf16.mxu1 %v8176_v9 }
 0x3ae   :  { %6643 = vmatpush2.bf16.msra.mxu1 %v8174_v39 }
 0x3af   :  { %6644 = vmatprep.subr.bf16.mxu1 %v8179_v51  ;;  %v8143_v51 = vld [vmem:[#allocation7 + $0x10c] ss:$16 sps:$4 sm:$0xff]  }
 0x3b2   :  { %6645 = vmatpush2.bf16.msra.mxu1 %v8177_v53 }
 0x3b3   :  { %6646 = vmatprep.subr.bf16.mxu1 %v8182_v54 }
 0x3b6   :  { %6647 = vmatpush2.bf16.msra.mxu1 %v8180_v20 }
 0x3b7   :  { %6648 = vmatprep.subr.bf16.mxu1 %v8185_v33 }
 0x3ba   :  { %6649 = vmatpush2.bf16.msra.mxu1 %v8183_v47  ;;  %v8141_v47 = vld [vmem:[#allocation7 + $0x108] ss:$16 sps:$4 sm:$0xff]  }
 0x3bb   :  { %6650 = vmatprep.subr.bf16.mxu1 %v8188_v3 }
 0x3be   :  { %6651 = vmatpush2.bf16.msra.mxu1 %v8186_v7 }
 0x3bf   :  { %6652 = vmatprep.subr.bf16.mxu1 %v8191_v30 }
 0x3c2   :  { %6653 = vmatpush2.bf16.msra.mxu1 %v8189_v14 }
 0x3c3   :  { %6704 = vmatprep.subr.bf16.mxu1 %v8194_v24  ;;  %v8198_v24 = vld [vmem:[#allocation7 + $0x2a8] ss:$16 sps:$4 sm:$0xff]  }
 0x3c5   :  { %v8581_v1 = vpop.f32.mrf.mxu0  ;;  %v5612_v2 = vpop.f32.mrf.mxu1 }
 0x3c6   :  { %v5613_v5 = vadd.f32 %v5612_v2, %v8579_v50  ;;  %v8110_v50 = vld [vmem:[#allocation7 + $0x6c] ss:$16 sps:$4 sm:$0xff]   ;;  %v5654_v49 = vadd.f32 %v8581_v1, %v4166_v25  ;;  %v4170_v1 = vrot.slane %v8564_v6, %v8518_v0  ;;  %v8195_v6 = vld [vmem:[#allocation7 + $0x2c8] ss:$16 sps:$4 sm:$0xff]  }
 0x3c7   :  { %v8585_v8 = vpop.f32.mrf.mxu0  ;;  %v5614_v62 = vpop.f32.mrf.mxu1  ;;  %v8239_v25 = vld [vmem:[#allocation7 + $0x30c] ss:$16 sps:$4 sm:$0xff]  }
 0x3c8   :  { %v5615_v10 = vadd.f32 %v5614_v62, %v5574_v4  ;;  %v5783_v12 = vmax.f32 %v5613_v5, 0.0  ;;  %v5656_v7 = vadd.f32 %v8585_v8, %v4170_v1  ;;  %v8200_v8 = vld [vmem:[#allocation7 + $0x2ac] ss:$16 sps:$4 sm:$0xff]  }
 0x3c9   :  { %v5657_v13 = vpop.f32.mrf.mxu0  ;;  %v5616_v61 = vpop.f32.mrf.mxu1 }
 0x3ca   :  { %v5784_v56 = vmax.f32 %v5615_v10, 0.0  ;;  %v8587_v18 = vpack.c.bf16 %v5783_v12, %v5783_v12 }
 0x3cb   :  { %v5658_v15 = vpop.f32.mrf.mxu0  ;;  %v5617_v11 = vpop.f32.mrf.mxu1 }
 0x3cc   :  { %v5788_v17 = vpack.c.bf16 %v5784_v56, %v5784_v56 }
 0x3ce   :  { %6613 = vmatprep.mubr.bf16.mxu0 %v5788_v17 }
 0x3cf   :  { %6614 = vmatmul.mubr.bf16.vlgmr.msra.gmra.mxu0 %v8587_v18 }
 0x3d0   :  { %6664 = vmatpush1.bf16.msra.mxu0 %v8096_v28  ;;  %6695 = vmatprep.mubr.bf16.mxu0 %v5788_v17  ;;  %v8192_v28 = vld [vmem:[#allocation7 + $0x2e8] ss:$16 sps:$4 sm:$0xff]  }
 0x3d1   :  { %6665 = vmatprep.subr.bf16.mxu0 %v8101_v23 }
 0x3d4   :  { %6666 = vmatpush1.bf16.msra.mxu0 %v8099_v26  ;;  %v8203_v26 = vld [vmem:[#allocation7 + $0x28c] ss:$16 sps:$4 sm:$0xff]  }
 0x3d5   :  { %6667 = vmatprep.subr.bf16.mxu0 %v8104_v27  ;;  %v8201_v27 = vld [vmem:[#allocation7 + $0x288] ss:$16 sps:$4 sm:$0xff]  }
 0x3d8   :  { %6668 = vmatpush1.bf16.msra.mxu0 %v8102_v21  ;;  %v8206_v21 = vld [vmem:[#allocation7 + $0x26c] ss:$16 sps:$4 sm:$0xff]  }
 0x3d9   :  { %6669 = vmatprep.subr.bf16.mxu0 %v8107_v34  ;;  %v8204_v34 = vld [vmem:[#allocation7 + $0x268] ss:$16 sps:$4 sm:$0xff]  }
 0x3dc   :  { %6670 = vmatpush1.bf16.msra.mxu0 %v8105_v59  ;;  %v8209_v59 = vld [vmem:[#allocation7 + $0x24c] ss:$16 sps:$4 sm:$0xff]  }
 0x3dd   :  { %6671 = vmatprep.subr.bf16.mxu0 %v8110_v50  ;;  %v8207_v50 = vld [vmem:[#allocation7 + $0x248] ss:$16 sps:$4 sm:$0xff]  }
 0x3e0   :  { %6672 = vmatpush1.bf16.msra.mxu0 %v8108_v35  ;;  %v8212_v35 = vld [vmem:[#allocation7 + $0x22c] ss:$16 sps:$4 sm:$0xff]  }
 0x3e1   :  { %6673 = vmatprep.subr.bf16.mxu0 %v8113_v52  ;;  %v8210_v52 = vld [vmem:[#allocation7 + $0x228] ss:$16 sps:$4 sm:$0xff]  }
 0x3e4   :  { %6674 = vmatpush1.bf16.msra.mxu0 %v8111_v57  ;;  %v8215_v57 = vld [vmem:[#allocation7 + $0x20c] ss:$16 sps:$4 sm:$0xff]  }
 0x3e5   :  { %6675 = vmatprep.subr.bf16.mxu0 %v8116_v36  ;;  %v8213_v36 = vld [vmem:[#allocation7 + $0x208] ss:$16 sps:$4 sm:$0xff]  }
 0x3e8   :  { %6676 = vmatpush1.bf16.msra.mxu0 %v8114_v37  ;;  %v8218_v37 = vld [vmem:[#allocation7 + $0x3ec] ss:$16 sps:$4 sm:$0xff]  }
 0x3e9   :  { %6677 = vmatprep.subr.bf16.mxu0 %v8119_v19  ;;  %v8216_v19 = vld [vmem:[#allocation7 + $0x3e8] ss:$16 sps:$4 sm:$0xff]  }
 0x3ec   :  { %6678 = vmatpush1.bf16.msra.mxu0 %v8117_v38  ;;  %v8221_v38 = vld [vmem:[#allocation7 + $0x3cc] ss:$16 sps:$4 sm:$0xff]  }
 0x3ed   :  { %6679 = vmatprep.subr.bf16.mxu0 %v8122_v40  ;;  %v8219_v40 = vld [vmem:[#allocation7 + $0x3c8] ss:$16 sps:$4 sm:$0xff]  }
 0x3f0   :  { %6680 = vmatpush2.bf16.msra.mxu0 %v8120_v41  ;;  %v8224_v41 = vld [vmem:[#allocation7 + $0x3ac] ss:$16 sps:$4 sm:$0xff]  }
 0x3f1   :  { %6681 = vmatprep.subr.bf16.mxu0 %v8125_v42  ;;  %v8222_v42 = vld [vmem:[#allocation7 + $0x3a8] ss:$16 sps:$4 sm:$0xff]  }
 0x3f4   :  { %6682 = vmatpush2.bf16.msra.mxu0 %v8123_v58  ;;  %v8227_v58 = vld [vmem:[#allocation7 + $0x38c] ss:$16 sps:$4 sm:$0xff]  }
 0x3f5   :  { %6683 = vmatprep.subr.bf16.mxu0 %v8128_v22  ;;  %v8225_v22 = vld [vmem:[#allocation7 + $0x388] ss:$16 sps:$4 sm:$0xff]  }
 0x3f8   :  { %6684 = vmatpush2.bf16.msra.mxu0 %v8126_v43  ;;  %v8230_v43 = vld [vmem:[#allocation7 + $0x36c] ss:$16 sps:$4 sm:$0xff]  }
 0x3f9   :  { %6685 = vmatprep.subr.bf16.mxu0 %v8131_v44  ;;  %v8228_v44 = vld [vmem:[#allocation7 + $0x368] ss:$16 sps:$4 sm:$0xff]  }
 0x3fc   :  { %6686 = vmatpush2.bf16.msra.mxu0 %v8129_v55  ;;  %v8233_v55 = vld [vmem:[#allocation7 + $0x34c] ss:$16 sps:$4 sm:$0xff]  }
 0x3fd   :  { %6687 = vmatprep.subr.bf16.mxu0 %v8134_v31  ;;  %v8231_v31 = vld [vmem:[#allocation7 + $0x348] ss:$16 sps:$4 sm:$0xff]  }
 0x400   :  { %6688 = vmatpush2.bf16.msra.mxu0 %v8132_v45  ;;  %v8236_v45 = vld [vmem:[#allocation7 + $0x32c] ss:$16 sps:$4 sm:$0xff]  }
 0x401   :  { %6689 = vmatprep.subr.bf16.mxu0 %v8137_v46  ;;  %v8234_v46 = vld [vmem:[#allocation7 + $0x328] ss:$16 sps:$4 sm:$0xff]  }
 0x404   :  { %6690 = vmatpush2.bf16.msra.mxu0 %v8135_v48  ;;  %v8237_v48 = vld [vmem:[#allocation7 + $0x308] ss:$16 sps:$4 sm:$0xff]  }
 0x405   :  { %v5694_v9 = vpop.f32.mrf.mxu1  ;;  %v5735_v39 = vpop.f32.mrf.mxu0  ;;  %6691 = vmatprep.subr.bf16.mxu0 %v8140_v16 }
 0x406   :  { %v5695_v53 = vadd.f32 %v5694_v9, %v5654_v49 }
 0x407   :  { %v5696_v54 = vpop.f32.mrf.mxu1  ;;  %v5737_v20 = vpop.f32.mrf.mxu0 }
 0x408   :  { %v5736_v33 = vadd.f32 %v5735_v39, %v5695_v53  ;;  %6692 = vmatpush2.bf16.msra.mxu0 %v8138_v32  ;;  %v5697_v62 = vadd.f32 %v5696_v54, %v5656_v7  ;;  %v5919_v39 = vld [vmem:[%s8628_s8] sm:$0xf] }
 0x409   :  { %v5698_v2 = vpop.f32.mrf.mxu1  ;;  %v5739_v3 = vpop.f32.mrf.mxu0  ;;  %6693 = vmatprep.subr.bf16.mxu0 %v8143_v51  ;;  %v5932_v51 = vrot.slane %v5919_v39, %v8513_v60  ;;  %v5936_v53 = vrot.slane %v5919_v39, %v8518_v0 }
 0x40a   :  { %v5738_v12 = vadd.f32 %v5737_v20, %v5697_v62 }
 0x40b   :  { %v5699_v4 = vpop.f32.mrf.mxu1  ;;  %v5740_v5 = vpop.f32.mrf.mxu0 }
 0x40c   :  { %6694 = vmatpush2.bf16.msra.mxu0 %v8141_v47  ;;  %v5924_v4 = vrot.slane %v5919_v39, %v8507_v63  ;;  %v5928_v5 = vrot.slane %v5919_v39, %v8485_v29 }
 0x40f   :  { %6696 = vmatmul.mubr.bf16.vlgmr.msra.gmra.mxu0 %v8587_v18  ;;  %v8197_v18 = vld [vmem:[#allocation7 + $0x2cc] ss:$16 sps:$4 sm:$0xff]  }
 0x445   :  { %v5776_v10 = vpop.f32.mrf.mxu1 }
 0x446   :  { %v5777_v13 = vadd.f32 %v5776_v10, %v5736_v33 }
 0x447   :  { %v5778_v61 = vpop.f32.mrf.mxu1 }
 0x448   :  { %v5779_v30 = vadd.f32 %v5778_v61, %v5738_v12  ;;  %v5785_v56 = vmax.f32 %v5777_v13, 0.0 }
 0x449   :  { %v5780_v14 = vpop.f32.mrf.mxu1 }
 0x44a   :  { %v5786_v15 = vmax.f32 %v5779_v30, 0.0  ;;  %v8597_v23 = vpack.c.bf16 %v5785_v56, %v5785_v56 }
 0x44b   :  { %v5781_v11 = vpop.f32.mrf.mxu1 }
 0x44c   :  { %v5790_v17 = vpack.c.bf16 %v5786_v15, %v5786_v15 }
 0x44e   :  { %6654 = vmatprep.mubr.bf16.mxu1 %v5790_v17 }
 0x44f   :  { %6655 = vmatmul.mubr.bf16.vlgmr.msra.gmra.mxu1 %v8597_v23 }
 0x450   :  { %6705 = vmatpush1.bf16.msra.mxu1 %v8192_v28  ;;  %6736 = vmatprep.mubr.bf16.mxu1 %v5790_v17 }
 0x451   :  { %6706 = vmatprep.subr.bf16.mxu1 %v8197_v18 }
 0x454   :  { %6707 = vmatpush1.bf16.msra.mxu1 %v8195_v6 }
 0x455   :  { %6708 = vmatprep.subr.bf16.mxu1 %v8200_v8 }
 0x458   :  { %6709 = vmatpush1.bf16.msra.mxu1 %v8198_v24 }
 0x459   :  { %6710 = vmatprep.subr.bf16.mxu1 %v8203_v26 }
 0x45c   :  { %6711 = vmatpush1.bf16.msra.mxu1 %v8201_v27 }
 0x45d   :  { %6712 = vmatprep.subr.bf16.mxu1 %v8206_v21 }
 0x460   :  { %6713 = vmatpush1.bf16.msra.mxu1 %v8204_v34 }
 0x461   :  { %6714 = vmatprep.subr.bf16.mxu1 %v8209_v59 }
 0x464   :  { %6715 = vmatpush1.bf16.msra.mxu1 %v8207_v50 }
 0x465   :  { %6716 = vmatprep.subr.bf16.mxu1 %v8212_v35 }
 0x468   :  { %6717 = vmatpush1.bf16.msra.mxu1 %v8210_v52 }
 0x469   :  { %6718 = vmatprep.subr.bf16.mxu1 %v8215_v57 }
 0x46c   :  { %6719 = vmatpush1.bf16.msra.mxu1 %v8213_v36 }
 0x46d   :  { %6720 = vmatprep.subr.bf16.mxu1 %v8218_v37 }
 0x470   :  { %6721 = vmatpush2.bf16.msra.mxu1 %v8216_v19 }
 0x471   :  { %6722 = vmatprep.subr.bf16.mxu1 %v8221_v38 }
 0x474   :  { %6723 = vmatpush2.bf16.msra.mxu1 %v8219_v40 }
 0x475   :  { %6724 = vmatprep.subr.bf16.mxu1 %v8224_v41 }
 0x478   :  { %6725 = vmatpush2.bf16.msra.mxu1 %v8222_v42 }
 0x479   :  { %6726 = vmatprep.subr.bf16.mxu1 %v8227_v58 }
 0x47c   :  { %6727 = vmatpush2.bf16.msra.mxu1 %v8225_v22 }
 0x47d   :  { %6728 = vmatprep.subr.bf16.mxu1 %v8230_v43 }
 0x480   :  { %6729 = vmatpush2.bf16.msra.mxu1 %v8228_v44 }
 0x481   :  { %6730 = vmatprep.subr.bf16.mxu1 %v8233_v55 }
 0x484   :  { %6731 = vmatpush2.bf16.msra.mxu1 %v8231_v31 }
 0x485   :  { %6732 = vmatprep.subr.bf16.mxu1 %v8236_v45 }
 0x488   :  { %6733 = vmatpush2.bf16.msra.mxu1 %v8234_v46 }
 0x489   :  { %6734 = vmatprep.subr.bf16.mxu1 %v8239_v25 }
 0x48c   :  { %6735 = vmatpush2.bf16.msra.mxu1 %v8237_v48 }
 0x48f   :  { %6737 = vmatmul.mubr.bf16.vlgmr.msra.gmra.mxu1 %v8597_v23  ;;  %v6615_v16 = vpop.f32.mrf.mxu0 }
 0x490   :  { %v6616_v1 = vadd.f32 %v6615_v16, %v5924_v4 }
 0x491   :  { %v6617_v49 = vpop.f32.mrf.mxu0 }
 0x492   :  { %v6618_v62 = vadd.f32 %v6617_v49, %v5928_v5 }
 0x493   :  { %v6619_v32 = vpop.f32.mrf.mxu0 }
 0x495   :  { %v6620_v9 = vpop.f32.mrf.mxu0 }
 0x4cf   :  { %v6697_v54 = vpop.f32.mrf.mxu0 }
 0x4d0   :  { %v6698_v20 = vadd.f32 %v6697_v54, %v5932_v51 }
 0x4d1   :  { %v6699_v33 = vpop.f32.mrf.mxu0 }
 0x4d2   :  { %v6700_v47 = vadd.f32 %v6699_v33, %v5936_v53 }
 0x4d3   :  { %v6701_v2 = vpop.f32.mrf.mxu0 }
 0x4d5   :  { %v6702_v3 = vpop.f32.mrf.mxu0 }
 0x50f   :  { %v6656_v7 = vpop.f32.mrf.mxu1 }
 0x510   :  { %v6657_v10 = vadd.f32 %v6656_v7, %v6616_v1 }
 0x511   :  { %v6658_v12 = vpop.f32.mrf.mxu1 }
 0x512   :  { %v6745_v13 = vmax.f32 %v6657_v10, 0.0  ;;  %v6659_v61 = vadd.f32 %v6658_v12, %v6618_v62 }
 0x513   :  { %v6660_v60 = vpop.f32.mrf.mxu1 }
 0x514   :  { %6749 = vst [vmem:[%s8629_s9] sm:$0xff] %v6745_v13  ;;  %v6746_v0 = vmax.f32 %v6659_v61, 0.0 }
 0x515   :  { %v6661_v30 = vpop.f32.mrf.mxu1 }
 0x516   :  { %6750 = vst [vmem:[%s8629_s9 + $0x8] sm:$0xff] %v6746_v0 }
 0x54f   :  { %v6738_v63 = vpop.f32.mrf.mxu1 }
 0x550   :  { %v6739_v29 = vadd.f32 %v6738_v63, %v6698_v20 }
 0x551   :  { %v6740_v56 = vpop.f32.mrf.mxu1 }
 0x552   :  { %v6747_v14 = vmax.f32 %v6739_v29, 0.0  ;;  %v6741_v15 = vadd.f32 %v6740_v56, %v6700_v47 }
 0x553   :  { %v6742_v11 = vpop.f32.mrf.mxu1 }
 0x554   :  { %6751 = vst [vmem:[%s8629_s9 + $0x10] sm:$0xff] %v6747_v14  ;;  %v6748_v17 = vmax.f32 %v6741_v15, 0.0 }
 0x555   :  { %v6743_v28 = vpop.f32.mrf.mxu1 }
 0x556   :  { %6752 = vst [vmem:[%s8629_s9 + $0x18] sm:$0xff] %v6748_v17 }
 0x557   :  { %6757 = vsyncpa [#allocation3], 1 }
 0x558   :  { %6758 = vsyncpa [#allocation5], 1 }
 0x559   :  { %6759 = vsyncpa [#allocation8], 1 }

</bundles_post_ra>
